<compile_context>
chip_gen: v7x
topology: tpu7x:2x2x1
jax: 0.10.0
libtpu: 0.0.40
codegen_flags: <defaults>
</compile_context>

<pallas_src>
import functools

import jax
import jax.numpy as jnp
from jax.experimental import pallas as pl
from jax.experimental.pallas import tpu as pltpu

F_PAD = 128                  # lane-dense output / weight-N width
IN_PAD = 32                  # contraction padding for raw node features (5 / 6 -> 32)
ROW_ALIGN = 8                # sublane alignment for node counts
E_ALIGN = 128                # lane alignment for the padded edge lists
MATMUL_DTYPE = jnp.bfloat16  # weight-matmul operand dtype (f32 accumulation)


def _round_up(n, m):
    return (n + m - 1) // m * m


# ----------------------------------------------------------------------------
# Fused Pallas kernel: adjacency build + entire layer chain, all VMEM-resident.
# ----------------------------------------------------------------------------
def _fused_kernel(e_rows_ref, e_cols_ref, ew_ref, gx_ref, sx_ref, w_ref, b_ref,
                  out_ref, *, hidden):
    f32 = jnp.float32
    ngp, in_pad = gx_ref.shape
    nsp = sx_ref.shape[0]
    e_pad = e_rows_ref.shape[1]
    hp = _round_up(hidden, 16)

    # ---- helpers -----------------------------------------------------------
    def oh_rows(k, n):
        """(n, E) one-hot: [i, e] == 1 iff row-oriented ids[k, e] == i."""
        ids = e_rows_ref[k:k + 1, :]                                       # (1, E)
        return (jax.lax.broadcasted_iota(jnp.int32, (n, e_pad), 0) == ids).astype(f32)

    def oh_cols(k, n):
        """(E, n) one-hot: [e, j] == 1 iff column-oriented ids[e, k] == j."""
        ids = e_cols_ref[:, k:k + 1]                                       # (E, 1)
        return (jax.lax.broadcasted_iota(jnp.int32, (e_pad, n), 1) == ids).astype(f32)

    def mmf(a, b):   # adjacency-side matmuls: keep f32 (tiny, accuracy-critical)
        return jnp.dot(a, b, preferred_element_type=f32)

    def mmw(x, w):   # weight matmuls: bf16 operands, f32 accumulation on the MXU
        return jnp.dot(x.astype(MATMUL_DTYPE), w, preferred_element_type=f32)

    def bias(k):
        return b_ref[k:k + 1, :]                                           # (1, 128)

    # ---- message-passing operators, built fully in VMEM (no XLA scatters) ---
    def gcn_adj(k, n):
        # D^{-1/2} A D^{-1/2}, no self loops (PyG TAGConv default). Rows=dst, cols=src.
        oh_d = oh_rows(k, n)                                  # (n, E) dst one-hot
        oh_s = oh_cols(k, n)                                  # (E, n) src one-hot
        oh_dc = oh_cols(4 + k, n)                             # (E, n) dst one-hot (col)
        deg_c = jnp.sum(oh_d, axis=1, keepdims=True)          # (n, 1) in-degree
        deg_r = jnp.sum(oh_dc, axis=0, keepdims=True)         # (1, n) same values
        dinv_c = jnp.where(deg_c > 0, jax.lax.rsqrt(jnp.maximum(deg_c, 1e-12)), 0.0)
        dinv_r = jnp.where(deg_r > 0, jax.lax.rsqrt(jnp.maximum(deg_r, 1e-12)), 0.0)
        return mmf(oh_d, oh_s) * dinv_c * dinv_r              # (n, n)

    a_vv = gcn_adj(0, ngp)                                    # game  <- game
    a_ss = gcn_adj(1, nsp)                                    # state <- state

    oh_d_h = oh_rows(2, nsp)
    a_hist = mmf(oh_d_h * ew_ref[...], oh_cols(2, ngp))       # weighted-sum aggregation
    oh_d_i = oh_rows(3, nsp)
    cnt = mmf(oh_d_i, oh_cols(3, ngp))
    deg_i = jnp.sum(oh_d_i, axis=1, keepdims=True)
    a_in = cnt * (1.0 / jnp.maximum(deg_i, 1.0))              # mean aggregation

    # ---- static weight-slab offsets (all multiples of the bf16 sublane tile) --
    o1 = 0                      # conv1: 3 hop weights, in_pad rows each
    o2 = o1 + 3 * in_pad        # conv2: 4 hop weights
    o3 = o2 + 4 * in_pad        # conv3:  [w_rel ; w_root]
    o32 = o3 + 2 * hp           # conv32: [w_rel ; w_root]
    o4 = o32 + 2 * hp           # conv4:  [w_l   ; w_r]
    o42 = o4 + 2 * hp           # conv42: [w_l   ; w_r]
    ol = o42 + 2 * hp           # lin

    def tag(a, x, off, b, hops):
        # TAGConv: sum_k (A^k x) W_k^T + b, ReLU.  Hop chain stays f32.
        h = x
        acc = mmw(h, w_ref[off:off + in_pad, :])
        for k in range(1, hops + 1):
            h = mmf(a, h)
            acc = acc + mmw(h, w_ref[off + k * in_pad:off + (k + 1) * in_pad, :])
        return jnp.maximum(acc + b, 0.0)

    def bip(agg, dst, off, b):
        # GraphConv / SAGEConv: agg W_a^T + x_dst W_b^T + b, ReLU.
        acc = (mmw(agg, w_ref[off:off + hp, :]) +
               mmw(dst, w_ref[off + hp:off + 2 * hp, :]))
        return jnp.maximum(acc + b, 0.0)

    g = tag(a_vv, gx_ref[...], o1, bias(0), 2)                # conv1 + relu  (ngp, 128)
    s = tag(a_ss, sx_ref[...], o2, bias(1), 3)                # conv2 + relu  (nsp, 128)

    g_h = g[:, :hp]                                           # hoisted once for 4 layers
    agg_hist = mmf(a_hist, g_h)                               # shared by conv3 & conv32
    agg_in = mmf(a_in, g_h)                                   # shared by conv4 & conv42

    s = bip(agg_hist, s[:, :hp], o3, bias(2))                 # conv3  + relu
    s = bip(agg_hist, s[:, :hp], o32, bias(3))                # conv32 + relu
    s = bip(agg_in, s[:, :hp], o4, bias(4))                   # conv4  + relu
    s = bip(agg_in, s[:, :hp], o42, bias(5))                  # conv42 + relu

    out_ref[...] = (mmw(s[:, :hp], w_ref[ol:ol + hp, :]) + bias(6)).astype(out_ref.dtype)


def _full_block(shape):
    zeros = (0,) * len(shape)
    return pl.BlockSpec(shape, lambda i: zeros)


def _fused_forward(e_rows, e_cols, ew, gx, sx, w_slab, b_slab, *, hidden):
    operands = (e_rows, e_cols, ew, gx, sx, w_slab, b_slab)
    nsp = sx.shape[0]
    # TODO(synk): packed weights are call-invariant; a cross-call prefetch (P10)
    #             could keep them VMEM-resident across layers/steps.
    return pl.pallas_call(
        functools.partial(_fused_kernel, hidden=hidden),
        out_shape=jax.ShapeDtypeStruct((nsp, F_PAD), jnp.float32),
        grid=(1,),                                 # single block: no per-tile overhead
        in_specs=[_full_block(op.shape) for op in operands],
        out_specs=pl.BlockSpec((nsp, F_PAD), lambda i: (0, 0)),
        compiler_params=pltpu.CompilerParams(dimension_semantics=("arbitrary",)),
    )(*operands)


# ----------------------------------------------------------------------------
# Parameters: torch-layout init + one-time packing (transpose, tight-K pad,
# bf16 cast, single weight slab + single bias slab).
# ----------------------------------------------------------------------------
def init_params(key, hidden, out_channels):
    def lin_w(k, fan_in, fan_out):   # torch Linear weight layout: [out, in]
        return jax.random.normal(k, (fan_out, fan_in), jnp.float32) / jnp.sqrt(
            jnp.float32(fan_in))

    ks = iter(jax.random.split(key, 32))
    p = {}
    # conv1 = TAGConv(5, H, K=2)  -> 3 hop linears (bias=False) + bias
    p["conv1"] = {"ws": [lin_w(next(ks), 5, hidden) for _ in range(3)],
                  "b": jax.random.normal(next(ks), (hidden,), jnp.float32) * 0.01}
    # conv2 = TAGConv(6, H, K=3)  -> 4 hop linears + bias
    p["conv2"] = {"ws": [lin_w(next(ks), 6, hidden) for _ in range(4)],
                  "b": jax.random.normal(next(ks), (hidden,), jnp.float32) * 0.01}
    # conv3 / conv32 = GraphConv((H, H), H)
    for name in ("conv3", "conv32"):
        p[name] = {"w_rel": lin_w(next(ks), hidden, hidden),
                   "b_rel": jax.random.normal(next(ks), (hidden,), jnp.float32) * 0.01,
                   "w_root": lin_w(next(ks), hidden, hidden)}
    # conv4 / conv42 = SAGEConv((H, H), H)
    for name in ("conv4", "conv42"):
        p[name] = {"w_l": lin_w(next(ks), hidden, hidden),
                   "b_l": jax.random.normal(next(ks), (hidden,), jnp.float32) * 0.01,
                   "w_r": lin_w(next(ks), hidden, hidden)}
    # lin = Linear(H, out)
    p["lin"] = {"w": lin_w(next(ks), hidden, out_channels),
                "b": jax.random.normal(next(ks), (out_channels,), jnp.float32) * 0.01}
    return p


def pack_params(params, hidden):
    """One-time: transpose to [in, out], pad K only to 32/hp (not 128), stack
    everything into one bf16 weight slab and one f32 bias slab."""
    hp = _round_up(hidden, 16)

    def wt(w, rows):                 # torch [out, in] -> [rows(K-pad), 128]
        w = jnp.asarray(w, jnp.float32).T
        return jnp.zeros((rows, F_PAD), jnp.float32).at[:w.shape[0], :w.shape[1]].set(w)

    blocks = [wt(w, IN_PAD) for w in params["conv1"]["ws"]]           # 3 * IN_PAD rows
    blocks += [wt(w, IN_PAD) for w in params["conv2"]["ws"]]          # 4 * IN_PAD rows
    for name, ka, kb in (("conv3", "w_rel", "w_root"), ("conv32", "w_rel", "w_root"),
                         ("conv4", "w_l", "w_r"), ("conv42", "w_l", "w_r")):
        blocks += [wt(params[name][ka], hp), wt(params[name][kb], hp)]
    blocks.append(wt(params["lin"]["w"], hp))
    w_slab = jnp.concatenate(blocks, axis=0).astype(MATMUL_DTYPE)     # (7*32+9*hp, 128)

    def bp(b):
        b = jnp.asarray(b, jnp.float32)
        return jnp.zeros((F_PAD,), jnp.float32).at[:b.shape[0]].set(b)

    b_slab = jnp.stack([bp(params["conv1"]["b"]), bp(params["conv2"]["b"]),
                        bp(params["conv3"]["b_rel"]), bp(params["conv32"]["b_rel"]),
                        bp(params["conv4"]["b_l"]), bp(params["conv42"]["b_l"]),
                        bp(params["lin"]["b"]), jnp.zeros((F_PAD,), jnp.float32)])
    return {"W": w_slab, "B": b_slab}


def _pad2(x, rows, cols):
    x = x.astype(jnp.float32)
    return jnp.zeros((rows, cols), jnp.float32).at[:x.shape[0], :x.shape[1]].set(x)


# ----------------------------------------------------------------------------
# Full forward pass (mirrors StateModelEncoder.forward)
# ----------------------------------------------------------------------------
@functools.partial(jax.jit, static_argnames=("hidden", "out_channels"))
def state_model_encoder(packed, game_x, state_x,
                        edge_index_v_v, edge_type_v_v,
                        edge_index_history_v_s, edge_attr_history_v_s,
                        edge_index_in_v_s, edge_index_s_s, *, hidden, out_channels):
    del edge_type_v_v  # unused in the reference forward()
    n_game, n_state = game_x.shape[0], state_x.shape[0]
    ngp = _round_up(n_game, ROW_ALIGN)
    nsp = _round_up(n_state, ROW_ALIGN)
    e_pad = _round_up(max(edge_index_v_v.shape[1], edge_index_s_s.shape[1],
                          edge_index_history_v_s.shape[1], edge_index_in_v_s.shape[1]),
                      E_ALIGN)

    # Edge lists, -1 padded (never matches an iota node id inside the kernel).
    # TODO(synk): for graphs beyond a few hundred nodes, replace the in-kernel
    #             O(N^2) dense operators with a scalar-prefetch segment-sum kernel.
    def ids(e):
        return jnp.full((e_pad,), -1, jnp.int32).at[:e.shape[0]].set(e.astype(jnp.int32))

    fill = jnp.full((e_pad,), -1, jnp.int32)
    # rows 0..3: dst ids of [v_v, s_s, hist, in]  (row-oriented, for (n, E) one-hots)
    e_rows = jnp.stack([ids(edge_index_v_v[1]), ids(edge_index_s_s[1]),
                        ids(edge_index_history_v_s[1]), ids(edge_index_in_v_s[1]),
                        fill, fill, fill, fill])
    # cols 0..3: src ids of [v_v, s_s, hist, in]; cols 4..5: dst ids of [v_v, s_s]
    e_cols = jnp.stack([ids(edge_index_v_v[0]), ids(edge_index_s_s[0]),
                        ids(edge_index_history_v_s[0]), ids(edge_index_in_v_s[0]),
                        ids(edge_index_v_v[1]), ids(edge_index_s_s[1]),
                        fill, fill]).T
    ew = jnp.zeros((1, e_pad), jnp.float32).at[
        0, :edge_attr_history_v_s.shape[0]].set(edge_attr_history_v_s.astype(jnp.float32))

    gx = _pad2(game_x, ngp, IN_PAD)
    sx = _pad2(state_x, nsp, IN_PAD)

    out = _fused_forward(e_rows, e_cols, ew, gx, sx, packed["W"], packed["B"],
                         hidden=hidden)
    return out[:n_state, :out_channels]


# ----------------------------------------------------------------------------
# Pure-JAX f32 reference (no Pallas) for a correctness sanity check.
# ----------------------------------------------------------------------------
def gcn_norm_dense(edge_index, num_nodes):
    src, dst = edge_index[0], edge_index[1]
    ones = jnp.ones(src.shape, jnp.float32)
    deg = jnp.zeros((num_nodes,), jnp.float32).at[dst].add(ones)
    dinv = jnp.where(deg > 0, jax.lax.rsqrt(jnp.maximum(deg, 1e-12)), 0.0)
    wgt = dinv[src] * dinv[dst]
    return jnp.zeros((num_nodes, num_nodes), jnp.float32).at[dst, src].add(wgt)


def weighted_adj(edge_index, edge_weight, n_dst, n_src):
    src, dst = edge_index[0], edge_index[1]
    return jnp.zeros((n_dst, n_src), jnp.float32).at[dst, src].add(
        edge_weight.astype(jnp.float32))


def mean_adj(edge_index, n_dst, n_src):
    src, dst = edge_index[0], edge_index[1]
    cnt = jnp.zeros((n_dst, n_src), jnp.float32).at[dst, src].add(1.0)
    deg = cnt.sum(axis=1, keepdims=True)
    return cnt / jnp.maximum(deg, 1.0)


def reference_forward(params, game_x, state_x, ei_vv, ei_hist, ea_hist, ei_in, ei_ss):
    def tag(x, a, ws, b):
        feats, h = [x], x
        for _ in range(len(ws) - 1):
            h = a @ h
            feats.append(h)
        return jnp.maximum(sum(f @ w.T for f, w in zip(feats, ws)) + b, 0.0)

    def gconv(x_src, x_dst, ei, ewt, w_rel, b_rel, w_root):
        a = weighted_adj(ei, ewt, x_dst.shape[0], x_src.shape[0])
        return jnp.maximum((a @ x_src) @ w_rel.T + b_rel + x_dst @ w_root.T, 0.0)

    def sage(x_src, x_dst, ei, w_l, b_l, w_r):
        a = mean_adj(ei, x_dst.shape[0], x_src.shape[0])
        return jnp.maximum((a @ x_src) @ w_l.T + b_l + x_dst @ w_r.T, 0.0)

    a_vv = gcn_norm_dense(ei_vv, game_x.shape[0])
    a_ss = gcn_norm_dense(ei_ss, state_x.shape[0])
    g = tag(game_x, a_vv, params["conv1"]["ws"], params["conv1"]["b"])
    s = tag(state_x, a_ss, params["conv2"]["ws"], params["conv2"]["b"])
    s = gconv(g, s, ei_hist, ea_hist, params["conv3"]["w_rel"],
              params["conv3"]["b_rel"], params["conv3"]["w_root"])
    s = gconv(g, s, ei_hist, ea_hist, params["conv32"]["w_rel"],
              params["conv32"]["b_rel"], params["conv32"]["w_root"])
    s = sage(g, s, ei_in, params["conv4"]["w_l"], params["conv4"]["b_l"],
             params["conv4"]["w_r"])
    s = sage(g, s, ei_in, params["conv42"]["w_l"], params["conv42"]["b_l"],
             params["conv42"]["w_r"])
    return s @ params["lin"]["w"].T + params["lin"]["b"]


if __name__ == "__main__":
    key = jax.random.PRNGKey(0)
    (k_par, k_gx, k_sx, k_e1, k_e2, k_e3, k_e4, k_e5, k_e6, k_w) = jax.random.split(key, 10)

    HIDDEN, OUT = 32, 8
    N_GAME, N_STATE = 64, 32
    E_VV, E_SS, E_H, E_IN = 256, 96, 128, 64

    params = init_params(k_par, HIDDEN, OUT)
    packed = pack_params(params, HIDDEN)   # one-time: bf16 + tight-K + single slabs

    game_x = jax.random.normal(k_gx, (N_GAME, 5), jnp.float32)
    state_x = jax.random.normal(k_sx, (N_STATE, 6), jnp.float32)

    edge_index_v_v = jax.random.randint(k_e1, (2, E_VV), 0, N_GAME, jnp.int32)
    edge_type_v_v = jnp.zeros((E_VV,), jnp.int32)  # unused, as in reference
    edge_index_s_s = jax.random.randint(k_e2, (2, E_SS), 0, N_STATE, jnp.int32)
    edge_index_history_v_s = jnp.stack([
        jax.random.randint(k_e3, (E_H,), 0, N_GAME, jnp.int32),    # src: game
        jax.random.randint(k_e4, (E_H,), 0, N_STATE, jnp.int32),   # dst: state
    ])
    edge_attr_history_v_s = jax.random.uniform(k_w, (E_H,), jnp.float32)
    edge_index_in_v_s = jnp.stack([
        jax.random.randint(k_e5, (E_IN,), 0, N_GAME, jnp.int32),
        jax.random.randint(k_e6, (E_IN,), 0, N_STATE, jnp.int32),
    ])

    out = state_model_encoder(packed, game_x, state_x,
                              edge_index_v_v, edge_type_v_v,
                              edge_index_history_v_s, edge_attr_history_v_s,
                              edge_index_in_v_s, edge_index_s_s,
                              hidden=HIDDEN, out_channels=OUT)
    out = jax.block_until_ready(out)

    assert out.shape == (N_STATE, OUT) and out.dtype == jnp.float32
    assert bool(jnp.all(jnp.isfinite(out)))

    ref = reference_forward(params, game_x, state_x, edge_index_v_v,
                            edge_index_history_v_s, edge_attr_history_v_s,
                            edge_index_in_v_s, edge_index_s_s)
    # bf16 weight matmuls (f32 accumulation, f32 adjacency path) vs f32 reference
    assert bool(jnp.allclose(out, ref, rtol=1e-1, atol=1e-1))

    print("KERNEL_OK")
</pallas_src>

<mosaic_0001>
module attributes {stable_mosaic.version = 11 : i64} {
  func.func @_fused_kernel(%arg0: i32, %arg1: memref<8x256xi32, #tpu.memory_space<vmem>>, %arg2: memref<256x8xi32, #tpu.memory_space<vmem>>, %arg3: memref<1x256xf32, #tpu.memory_space<vmem>>, %arg4: memref<64x32xf32, #tpu.memory_space<vmem>>, %arg5: memref<32x32xf32, #tpu.memory_space<vmem>>, %arg6: memref<512x128xbf16, #tpu.memory_space<vmem>>, %arg7: memref<8x128xf32, #tpu.memory_space<vmem>>, %arg8: memref<32x128xf32, #tpu.memory_space<vmem>>) attributes {dimension_semantics = [#tpu.dimension_semantics<arbitrary>], iteration_bounds = array<i64: 1>, scalar_prefetch = 0 : i64, scratch_operands = 0 : i64, tpu.core_type = #tpu.core_type<tc>, window_params = [{pipeline_mode = #tpu.pipeline_mode<synchronous>, transform_indices = @transform_0, window_bounds = array<i64: 8, 256>}, {pipeline_mode = #tpu.pipeline_mode<synchronous>, transform_indices = @transform_1, window_bounds = array<i64: 256, 8>}, {pipeline_mode = #tpu.pipeline_mode<synchronous>, transform_indices = @transform_2, window_bounds = array<i64: 1, 256>}, {pipeline_mode = #tpu.pipeline_mode<synchronous>, transform_indices = @transform_3, window_bounds = array<i64: 64, 32>}, {pipeline_mode = #tpu.pipeline_mode<synchronous>, transform_indices = @transform_4, window_bounds = array<i64: 32, 32>}, {pipeline_mode = #tpu.pipeline_mode<synchronous>, transform_indices = @transform_5, window_bounds = array<i64: 512, 128>}, {pipeline_mode = #tpu.pipeline_mode<synchronous>, transform_indices = @transform_6, window_bounds = array<i64: 8, 128>}, {pipeline_mode = #tpu.pipeline_mode<synchronous>, transform_indices = @transform_7, window_bounds = array<i64: 32, 128>}]} {
    %c0 = arith.constant 0 : index
    %c0_0 = arith.constant 0 : index
    %0 = vector.load %arg1[%c0, %c0_0] : memref<8x256xi32, #tpu.memory_space<vmem>>, vector<1x256xi32>
    %1 = tpu.iota {dimensions = array<i32: 0>} : vector<64x256xi32>
    %2 = vector.broadcast %0 : vector<1x256xi32> to vector<64x256xi32>
    %3 = arith.cmpi eq, %1, %2 : vector<64x256xi32>
    %4 = arith.extui %3 : vector<64x256xi1> to vector<64x256xi32>
    %5 = arith.sitofp %4 : vector<64x256xi32> to vector<64x256xf32>
    %c0_1 = arith.constant 0 : index
    %c0_2 = arith.constant 0 : index
    %6 = vector.load %arg2[%c0_1, %c0_2] : memref<256x8xi32, #tpu.memory_space<vmem>>, vector<256x1xi32>
    %7 = tpu.iota {dimensions = array<i32: 1>} : vector<256x64xi32>
    %8 = vector.broadcast %6 : vector<256x1xi32> to vector<256x64xi32>
    %9 = arith.cmpi eq, %7, %8 : vector<256x64xi32>
    %10 = arith.extui %9 : vector<256x64xi1> to vector<256x64xi32>
    %11 = arith.sitofp %10 : vector<256x64xi32> to vector<256x64xf32>
    %c0_3 = arith.constant 0 : index
    %c4 = arith.constant 4 : index
    %12 = vector.load %arg2[%c0_3, %c4] : memref<256x8xi32, #tpu.memory_space<vmem>>, vector<256x1xi32>
    %13 = tpu.iota {dimensions = array<i32: 1>} : vector<256x64xi32>
    %14 = vector.broadcast %12 : vector<256x1xi32> to vector<256x64xi32>
    %15 = arith.cmpi eq, %13, %14 : vector<256x64xi32>
    %16 = arith.extui %15 : vector<256x64xi1> to vector<256x64xi32>
    %17 = arith.sitofp %16 : vector<256x64xi32> to vector<256x64xf32>
    %cst = arith.constant dense<0.000000e+00> : vector<64xf32>
    %18 = vector.multi_reduction <add>, %5, %cst [1] : vector<64x256xf32> to vector<64xf32>
    %19 = vector.shape_cast %18 : vector<64xf32> to vector<64x1xf32>
    %cst_4 = arith.constant dense<0.000000e+00> : vector<64xf32>
    %20 = vector.multi_reduction <add>, %17, %cst_4 [0] : vector<256x64xf32> to vector<64xf32>
    %21 = vector.shape_cast %20 : vector<64xf32> to vector<1x64xf32>
    %cst_5 = arith.constant 0.000000e+00 : f32
    %22 = vector.broadcast %cst_5 : f32 to vector<64x1xf32>
    %23 = arith.cmpf ogt, %19, %22 : vector<64x1xf32>
    %cst_6 = arith.constant 9.99999996E-13 : f32
    %24 = vector.broadcast %cst_6 : f32 to vector<64x1xf32>
    %25 = arith.maximumf %19, %24 : vector<64x1xf32>
    %26 = math.rsqrt %25 : vector<64x1xf32>
    %cst_7 = arith.constant 0.000000e+00 : f32
    %27 = vector.broadcast %cst_7 : f32 to vector<64x1xf32>
    %28 = arith.select %23, %26, %27 : vector<64x1xi1>, vector<64x1xf32>
    %cst_8 = arith.constant 0.000000e+00 : f32
    %29 = vector.broadcast %cst_8 : f32 to vector<1x64xf32>
    %30 = arith.cmpf ogt, %21, %29 : vector<1x64xf32>
    %cst_9 = arith.constant 9.99999996E-13 : f32
    %31 = vector.broadcast %cst_9 : f32 to vector<1x64xf32>
    %32 = arith.maximumf %21, %31 : vector<1x64xf32>
    %33 = math.rsqrt %32 : vector<1x64xf32>
    %cst_10 = arith.constant 0.000000e+00 : f32
    %34 = vector.broadcast %cst_10 : f32 to vector<1x64xf32>
    %35 = arith.select %30, %33, %34 : vector<1x64xi1>, vector<1x64xf32>
    %cst_11 = arith.constant dense<0.000000e+00> : vector<64x64xf32>
    %36 = tpu.matmul %5, %11, %cst_11 {dimension_numbers = #tpu.dot_dimension_numbers<[1], [0], [0], [1], [0, 0, 1, 1], [], []>} : vector<64x256xf32>, vector<256x64xf32>, vector<64x64xf32> -> vector<64x64xf32>
    %37 = vector.broadcast %28 : vector<64x1xf32> to vector<64x64xf32>
    %38 = arith.mulf %36, %37 : vector<64x64xf32>
    %39 = vector.broadcast %35 : vector<1x64xf32> to vector<64x64xf32>
    %40 = arith.mulf %38, %39 : vector<64x64xf32>
    %c1 = arith.constant 1 : index
    %c0_12 = arith.constant 0 : index
    %41 = vector.load %arg1[%c1, %c0_12] : memref<8x256xi32, #tpu.memory_space<vmem>>, vector<1x256xi32>
    %42 = tpu.iota {dimensions = array<i32: 0>} : vector<32x256xi32>
    %43 = vector.broadcast %41 : vector<1x256xi32> to vector<32x256xi32>
    %44 = arith.cmpi eq, %42, %43 : vector<32x256xi32>
    %45 = arith.extui %44 : vector<32x256xi1> to vector<32x256xi32>
    %46 = arith.sitofp %45 : vector<32x256xi32> to vector<32x256xf32>
    %c0_13 = arith.constant 0 : index
    %c1_14 = arith.constant 1 : index
    %47 = vector.load %arg2[%c0_13, %c1_14] : memref<256x8xi32, #tpu.memory_space<vmem>>, vector<256x1xi32>
    %48 = tpu.iota {dimensions = array<i32: 1>} : vector<256x32xi32>
    %49 = vector.broadcast %47 : vector<256x1xi32> to vector<256x32xi32>
    %50 = arith.cmpi eq, %48, %49 : vector<256x32xi32>
    %51 = arith.extui %50 : vector<256x32xi1> to vector<256x32xi32>
    %52 = arith.sitofp %51 : vector<256x32xi32> to vector<256x32xf32>
    %c0_15 = arith.constant 0 : index
    %c5 = arith.constant 5 : index
    %53 = vector.load %arg2[%c0_15, %c5] : memref<256x8xi32, #tpu.memory_space<vmem>>, vector<256x1xi32>
    %54 = tpu.iota {dimensions = array<i32: 1>} : vector<256x32xi32>
    %55 = vector.broadcast %53 : vector<256x1xi32> to vector<256x32xi32>
    %56 = arith.cmpi eq, %54, %55 : vector<256x32xi32>
    %57 = arith.extui %56 : vector<256x32xi1> to vector<256x32xi32>
    %58 = arith.sitofp %57 : vector<256x32xi32> to vector<256x32xf32>
    %cst_16 = arith.constant dense<0.000000e+00> : vector<32xf32>
    %59 = vector.multi_reduction <add>, %46, %cst_16 [1] : vector<32x256xf32> to vector<32xf32>
    %60 = vector.shape_cast %59 : vector<32xf32> to vector<32x1xf32>
    %cst_17 = arith.constant dense<0.000000e+00> : vector<32xf32>
    %61 = vector.multi_reduction <add>, %58, %cst_17 [0] : vector<256x32xf32> to vector<32xf32>
    %62 = vector.shape_cast %61 : vector<32xf32> to vector<1x32xf32>
    %cst_18 = arith.constant 0.000000e+00 : f32
    %63 = vector.broadcast %cst_18 : f32 to vector<32x1xf32>
    %64 = arith.cmpf ogt, %60, %63 : vector<32x1xf32>
    %cst_19 = arith.constant 9.99999996E-13 : f32
    %65 = vector.broadcast %cst_19 : f32 to vector<32x1xf32>
    %66 = arith.maximumf %60, %65 : vector<32x1xf32>
    %67 = math.rsqrt %66 : vector<32x1xf32>
    %cst_20 = arith.constant 0.000000e+00 : f32
    %68 = vector.broadcast %cst_20 : f32 to vector<32x1xf32>
    %69 = arith.select %64, %67, %68 : vector<32x1xi1>, vector<32x1xf32>
    %cst_21 = arith.constant 0.000000e+00 : f32
    %70 = vector.broadcast %cst_21 : f32 to vector<1x32xf32>
    %71 = arith.cmpf ogt, %62, %70 : vector<1x32xf32>
    %cst_22 = arith.constant 9.99999996E-13 : f32
    %72 = vector.broadcast %cst_22 : f32 to vector<1x32xf32>
    %73 = arith.maximumf %62, %72 : vector<1x32xf32>
    %74 = math.rsqrt %73 : vector<1x32xf32>
    %cst_23 = arith.constant 0.000000e+00 : f32
    %75 = vector.broadcast %cst_23 : f32 to vector<1x32xf32>
    %76 = arith.select %71, %74, %75 : vector<1x32xi1>, vector<1x32xf32>
    %cst_24 = arith.constant dense<0.000000e+00> : vector<32x32xf32>
    %77 = tpu.matmul %46, %52, %cst_24 {dimension_numbers = #tpu.dot_dimension_numbers<[1], [0], [0], [1], [0, 0, 1, 1], [], []>} : vector<32x256xf32>, vector<256x32xf32>, vector<32x32xf32> -> vector<32x32xf32>
    %78 = vector.broadcast %69 : vector<32x1xf32> to vector<32x32xf32>
    %79 = arith.mulf %77, %78 : vector<32x32xf32>
    %80 = vector.broadcast %76 : vector<1x32xf32> to vector<32x32xf32>
    %81 = arith.mulf %79, %80 : vector<32x32xf32>
    %c2 = arith.constant 2 : index
    %c0_25 = arith.constant 0 : index
    %82 = vector.load %arg1[%c2, %c0_25] : memref<8x256xi32, #tpu.memory_space<vmem>>, vector<1x256xi32>
    %83 = tpu.iota {dimensions = array<i32: 0>} : vector<32x256xi32>
    %84 = vector.broadcast %82 : vector<1x256xi32> to vector<32x256xi32>
    %85 = arith.cmpi eq, %83, %84 : vector<32x256xi32>
    %86 = arith.extui %85 : vector<32x256xi1> to vector<32x256xi32>
    %87 = arith.sitofp %86 : vector<32x256xi32> to vector<32x256xf32>
    %c0_26 = arith.constant 0 : index
    %c0_27 = arith.constant 0 : index
    %88 = vector.load %arg3[%c0_26, %c0_27] : memref<1x256xf32, #tpu.memory_space<vmem>>, vector<1x256xf32>
    %89 = vector.broadcast %88 : vector<1x256xf32> to vector<32x256xf32>
    %90 = arith.mulf %87, %89 : vector<32x256xf32>
    %c0_28 = arith.constant 0 : index
    %c2_29 = arith.constant 2 : index
    %91 = vector.load %arg2[%c0_28, %c2_29] : memref<256x8xi32, #tpu.memory_space<vmem>>, vector<256x1xi32>
    %92 = tpu.iota {dimensions = array<i32: 1>} : vector<256x64xi32>
    %93 = vector.broadcast %91 : vector<256x1xi32> to vector<256x64xi32>
    %94 = arith.cmpi eq, %92, %93 : vector<256x64xi32>
    %95 = arith.extui %94 : vector<256x64xi1> to vector<256x64xi32>
    %96 = arith.sitofp %95 : vector<256x64xi32> to vector<256x64xf32>
    %cst_30 = arith.constant dense<0.000000e+00> : vector<32x64xf32>
    %97 = tpu.matmul %90, %96, %cst_30 {dimension_numbers = #tpu.dot_dimension_numbers<[1], [0], [0], [1], [0, 0, 1, 1], [], []>} : vector<32x256xf32>, vector<256x64xf32>, vector<32x64xf32> -> vector<32x64xf32>
    %c3 = arith.constant 3 : index
    %c0_31 = arith.constant 0 : index
    %98 = vector.load %arg1[%c3, %c0_31] : memref<8x256xi32, #tpu.memory_space<vmem>>, vector<1x256xi32>
    %99 = tpu.iota {dimensions = array<i32: 0>} : vector<32x256xi32>
    %100 = vector.broadcast %98 : vector<1x256xi32> to vector<32x256xi32>
    %101 = arith.cmpi eq, %99, %100 : vector<32x256xi32>
    %102 = arith.extui %101 : vector<32x256xi1> to vector<32x256xi32>
    %103 = arith.sitofp %102 : vector<32x256xi32> to vector<32x256xf32>
    %c0_32 = arith.constant 0 : index
    %c3_33 = arith.constant 3 : index
    %104 = vector.load %arg2[%c0_32, %c3_33] : memref<256x8xi32, #tpu.memory_space<vmem>>, vector<256x1xi32>
    %105 = tpu.iota {dimensions = array<i32: 1>} : vector<256x64xi32>
    %106 = vector.broadcast %104 : vector<256x1xi32> to vector<256x64xi32>
    %107 = arith.cmpi eq, %105, %106 : vector<256x64xi32>
    %108 = arith.extui %107 : vector<256x64xi1> to vector<256x64xi32>
    %109 = arith.sitofp %108 : vector<256x64xi32> to vector<256x64xf32>
    %cst_34 = arith.constant dense<0.000000e+00> : vector<32x64xf32>
    %110 = tpu.matmul %103, %109, %cst_34 {dimension_numbers = #tpu.dot_dimension_numbers<[1], [0], [0], [1], [0, 0, 1, 1], [], []>} : vector<32x256xf32>, vector<256x64xf32>, vector<32x64xf32> -> vector<32x64xf32>
    %cst_35 = arith.constant dense<0.000000e+00> : vector<32xf32>
    %111 = vector.multi_reduction <add>, %103, %cst_35 [1] : vector<32x256xf32> to vector<32xf32>
    %112 = vector.shape_cast %111 : vector<32xf32> to vector<32x1xf32>
    %cst_36 = arith.constant 1.000000e+00 : f32
    %113 = vector.broadcast %cst_36 : f32 to vector<32x1xf32>
    %114 = arith.maximumf %112, %113 : vector<32x1xf32>
    %cst_37 = arith.constant 1.000000e+00 : f32
    %115 = vector.broadcast %cst_37 : f32 to vector<32x1xf32>
    %116 = arith.divf %115, %114 : vector<32x1xf32>
    %117 = vector.broadcast %116 : vector<32x1xf32> to vector<32x64xf32>
    %118 = arith.mulf %110, %117 : vector<32x64xf32>
    %c0_38 = arith.constant 0 : index
    %c0_39 = arith.constant 0 : index
    %119 = vector.load %arg4[%c0_38, %c0_39] : memref<64x32xf32, #tpu.memory_space<vmem>>, vector<64x32xf32>
    %c0_40 = arith.constant 0 : index
    %c0_41 = arith.constant 0 : index
    %120 = vector.load %arg7[%c0_40, %c0_41] : memref<8x128xf32, #tpu.memory_space<vmem>>, vector<1x128xf32>
    %c0_42 = arith.constant 0 : index
    %c0_43 = arith.constant 0 : index
    %121 = vector.load %arg6[%c0_42, %c0_43] : memref<512x128xbf16, #tpu.memory_space<vmem>>, vector<32x128xbf16>
    %122 = arith.truncf %119 : vector<64x32xf32> to vector<64x32xbf16>
    %cst_44 = arith.constant dense<0.000000e+00> : vector<64x128xf32>
    %123 = tpu.matmul %122, %121, %cst_44 {dimension_numbers = #tpu.dot_dimension_numbers<[1], [0], [0], [1], [0, 0, 1, 1], [], []>} : vector<64x32xbf16>, vector<32x128xbf16>, vector<64x128xf32> -> vector<64x128xf32>
    %cst_45 = arith.constant dense<0.000000e+00> : vector<64x32xf32>
    %124 = tpu.matmul %40, %119, %cst_45 {dimension_numbers = #tpu.dot_dimension_numbers<[1], [0], [0], [1], [0, 0, 1, 1], [], []>} : vector<64x64xf32>, vector<64x32xf32>, vector<64x32xf32> -> vector<64x32xf32>
    %c32 = arith.constant 32 : index
    %c0_46 = arith.constant 0 : index
    %125 = vector.load %arg6[%c32, %c0_46] : memref<512x128xbf16, #tpu.memory_space<vmem>>, vector<32x128xbf16>
    %126 = arith.truncf %124 : vector<64x32xf32> to vector<64x32xbf16>
    %cst_47 = arith.constant dense<0.000000e+00> : vector<64x128xf32>
    %127 = tpu.matmul %126, %125, %cst_47 {dimension_numbers = #tpu.dot_dimension_numbers<[1], [0], [0], [1], [0, 0, 1, 1], [], []>} : vector<64x32xbf16>, vector<32x128xbf16>, vector<64x128xf32> -> vector<64x128xf32>
    %128 = arith.addf %123, %127 : vector<64x128xf32>
    %cst_48 = arith.constant dense<0.000000e+00> : vector<64x32xf32>
    %129 = tpu.matmul %40, %124, %cst_48 {dimension_numbers = #tpu.dot_dimension_numbers<[1], [0], [0], [1], [0, 0, 1, 1], [], []>} : vector<64x64xf32>, vector<64x32xf32>, vector<64x32xf32> -> vector<64x32xf32>
    %c64 = arith.constant 64 : index
    %c0_49 = arith.constant 0 : index
    %130 = vector.load %arg6[%c64, %c0_49] : memref<512x128xbf16, #tpu.memory_space<vmem>>, vector<32x128xbf16>
    %131 = arith.truncf %129 : vector<64x32xf32> to vector<64x32xbf16>
    %cst_50 = arith.constant dense<0.000000e+00> : vector<64x128xf32>
    %132 = tpu.matmul %131, %130, %cst_50 {dimension_numbers = #tpu.dot_dimension_numbers<[1], [0], [0], [1], [0, 0, 1, 1], [], []>} : vector<64x32xbf16>, vector<32x128xbf16>, vector<64x128xf32> -> vector<64x128xf32>
    %133 = arith.addf %128, %132 : vector<64x128xf32>
    %134 = vector.broadcast %120 : vector<1x128xf32> to vector<64x128xf32>
    %135 = arith.addf %133, %134 : vector<64x128xf32>
    %cst_51 = arith.constant 0.000000e+00 : f32
    %136 = vector.broadcast %cst_51 : f32 to vector<64x128xf32>
    %137 = arith.maximumf %135, %136 : vector<64x128xf32>
    %c0_52 = arith.constant 0 : index
    %c0_53 = arith.constant 0 : index
    %138 = vector.load %arg5[%c0_52, %c0_53] : memref<32x32xf32, #tpu.memory_space<vmem>>, vector<32x32xf32>
    %c1_54 = arith.constant 1 : index
    %c0_55 = arith.constant 0 : index
    %139 = vector.load %arg7[%c1_54, %c0_55] : memref<8x128xf32, #tpu.memory_space<vmem>>, vector<1x128xf32>
    %c96 = arith.constant 96 : index
    %c0_56 = arith.constant 0 : index
    %140 = vector.load %arg6[%c96, %c0_56] : memref<512x128xbf16, #tpu.memory_space<vmem>>, vector<32x128xbf16>
    %141 = arith.truncf %138 : vector<32x32xf32> to vector<32x32xbf16>
    %cst_57 = arith.constant dense<0.000000e+00> : vector<32x128xf32>
    %142 = tpu.matmul %141, %140, %cst_57 {dimension_numbers = #tpu.dot_dimension_numbers<[1], [0], [0], [1], [0, 0, 1, 1], [], []>} : vector<32x32xbf16>, vector<32x128xbf16>, vector<32x128xf32> -> vector<32x128xf32>
    %cst_58 = arith.constant dense<0.000000e+00> : vector<32x32xf32>
    %143 = tpu.matmul %81, %138, %cst_58 {dimension_numbers = #tpu.dot_dimension_numbers<[1], [0], [0], [1], [0, 0, 1, 1], [], []>} : vector<32x32xf32>, vector<32x32xf32>, vector<32x32xf32> -> vector<32x32xf32>
    %c128 = arith.constant 128 : index
    %c0_59 = arith.constant 0 : index
    %144 = vector.load %arg6[%c128, %c0_59] : memref<512x128xbf16, #tpu.memory_space<vmem>>, vector<32x128xbf16>
    %145 = arith.truncf %143 : vector<32x32xf32> to vector<32x32xbf16>
    %cst_60 = arith.constant dense<0.000000e+00> : vector<32x128xf32>
    %146 = tpu.matmul %145, %144, %cst_60 {dimension_numbers = #tpu.dot_dimension_numbers<[1], [0], [0], [1], [0, 0, 1, 1], [], []>} : vector<32x32xbf16>, vector<32x128xbf16>, vector<32x128xf32> -> vector<32x128xf32>
    %147 = arith.addf %142, %146 : vector<32x128xf32>
    %cst_61 = arith.constant dense<0.000000e+00> : vector<32x32xf32>
    %148 = tpu.matmul %81, %143, %cst_61 {dimension_numbers = #tpu.dot_dimension_numbers<[1], [0], [0], [1], [0, 0, 1, 1], [], []>} : vector<32x32xf32>, vector<32x32xf32>, vector<32x32xf32> -> vector<32x32xf32>
    %c160 = arith.constant 160 : index
    %c0_62 = arith.constant 0 : index
    %149 = vector.load %arg6[%c160, %c0_62] : memref<512x128xbf16, #tpu.memory_space<vmem>>, vector<32x128xbf16>
    %150 = arith.truncf %148 : vector<32x32xf32> to vector<32x32xbf16>
    %cst_63 = arith.constant dense<0.000000e+00> : vector<32x128xf32>
    %151 = tpu.matmul %150, %149, %cst_63 {dimension_numbers = #tpu.dot_dimension_numbers<[1], [0], [0], [1], [0, 0, 1, 1], [], []>} : vector<32x32xbf16>, vector<32x128xbf16>, vector<32x128xf32> -> vector<32x128xf32>
    %152 = arith.addf %147, %151 : vector<32x128xf32>
    %cst_64 = arith.constant dense<0.000000e+00> : vector<32x32xf32>
    %153 = tpu.matmul %81, %148, %cst_64 {dimension_numbers = #tpu.dot_dimension_numbers<[1], [0], [0], [1], [0, 0, 1, 1], [], []>} : vector<32x32xf32>, vector<32x32xf32>, vector<32x32xf32> -> vector<32x32xf32>
    %c192 = arith.constant 192 : index
    %c0_65 = arith.constant 0 : index
    %154 = vector.load %arg6[%c192, %c0_65] : memref<512x128xbf16, #tpu.memory_space<vmem>>, vector<32x128xbf16>
    %155 = arith.truncf %153 : vector<32x32xf32> to vector<32x32xbf16>
    %cst_66 = arith.constant dense<0.000000e+00> : vector<32x128xf32>
    %156 = tpu.matmul %155, %154, %cst_66 {dimension_numbers = #tpu.dot_dimension_numbers<[1], [0], [0], [1], [0, 0, 1, 1], [], []>} : vector<32x32xbf16>, vector<32x128xbf16>, vector<32x128xf32> -> vector<32x128xf32>
    %157 = arith.addf %152, %156 : vector<32x128xf32>
    %158 = vector.broadcast %139 : vector<1x128xf32> to vector<32x128xf32>
    %159 = arith.addf %157, %158 : vector<32x128xf32>
    %cst_67 = arith.constant 0.000000e+00 : f32
    %160 = vector.broadcast %cst_67 : f32 to vector<32x128xf32>
    %161 = arith.maximumf %159, %160 : vector<32x128xf32>
    %162 = vector.extract_strided_slice %137 {offsets = [0, 0], sizes = [64, 32], strides = [1, 1]} : vector<64x128xf32> to vector<64x32xf32>
    %cst_68 = arith.constant dense<0.000000e+00> : vector<32x32xf32>
    %163 = tpu.matmul %97, %162, %cst_68 {dimension_numbers = #tpu.dot_dimension_numbers<[1], [0], [0], [1], [0, 0, 1, 1], [], []>} : vector<32x64xf32>, vector<64x32xf32>, vector<32x32xf32> -> vector<32x32xf32>
    %cst_69 = arith.constant dense<0.000000e+00> : vector<32x32xf32>
    %164 = tpu.matmul %118, %162, %cst_69 {dimension_numbers = #tpu.dot_dimension_numbers<[1], [0], [0], [1], [0, 0, 1, 1], [], []>} : vector<32x64xf32>, vector<64x32xf32>, vector<32x32xf32> -> vector<32x32xf32>
    %165 = vector.extract_strided_slice %161 {offsets = [0, 0], sizes = [32, 32], strides = [1, 1]} : vector<32x128xf32> to vector<32x32xf32>
    %c2_70 = arith.constant 2 : index
    %c0_71 = arith.constant 0 : index
    %166 = vector.load %arg7[%c2_70, %c0_71] : memref<8x128xf32, #tpu.memory_space<vmem>>, vector<1x128xf32>
    %c224 = arith.constant 224 : index
    %c0_72 = arith.constant 0 : index
    %167 = vector.load %arg6[%c224, %c0_72] : memref<512x128xbf16, #tpu.memory_space<vmem>>, vector<32x128xbf16>
    %168 = arith.truncf %163 : vector<32x32xf32> to vector<32x32xbf16>
    %cst_73 = arith.constant dense<0.000000e+00> : vector<32x128xf32>
    %169 = tpu.matmul %168, %167, %cst_73 {dimension_numbers = #tpu.dot_dimension_numbers<[1], [0], [0], [1], [0, 0, 1, 1], [], []>} : vector<32x32xbf16>, vector<32x128xbf16>, vector<32x128xf32> -> vector<32x128xf32>
    %c256 = arith.constant 256 : index
    %c0_74 = arith.constant 0 : index
    %170 = vector.load %arg6[%c256, %c0_74] : memref<512x128xbf16, #tpu.memory_space<vmem>>, vector<32x128xbf16>
    %171 = arith.truncf %165 : vector<32x32xf32> to vector<32x32xbf16>
    %cst_75 = arith.constant dense<0.000000e+00> : vector<32x128xf32>
    %172 = tpu.matmul %171, %170, %cst_75 {dimension_numbers = #tpu.dot_dimension_numbers<[1], [0], [0], [1], [0, 0, 1, 1], [], []>} : vector<32x32xbf16>, vector<32x128xbf16>, vector<32x128xf32> -> vector<32x128xf32>
    %173 = arith.addf %169, %172 : vector<32x128xf32>
    %174 = vector.broadcast %166 : vector<1x128xf32> to vector<32x128xf32>
    %175 = arith.addf %173, %174 : vector<32x128xf32>
    %cst_76 = arith.constant 0.000000e+00 : f32
    %176 = vector.broadcast %cst_76 : f32 to vector<32x128xf32>
    %177 = arith.maximumf %175, %176 : vector<32x128xf32>
    %178 = vector.extract_strided_slice %177 {offsets = [0, 0], sizes = [32, 32], strides = [1, 1]} : vector<32x128xf32> to vector<32x32xf32>
    %c3_77 = arith.constant 3 : index
    %c0_78 = arith.constant 0 : index
    %179 = vector.load %arg7[%c3_77, %c0_78] : memref<8x128xf32, #tpu.memory_space<vmem>>, vector<1x128xf32>
    %c288 = arith.constant 288 : index
    %c0_79 = arith.constant 0 : index
    %180 = vector.load %arg6[%c288, %c0_79] : memref<512x128xbf16, #tpu.memory_space<vmem>>, vector<32x128xbf16>
    %181 = arith.truncf %163 : vector<32x32xf32> to vector<32x32xbf16>
    %cst_80 = arith.constant dense<0.000000e+00> : vector<32x128xf32>
    %182 = tpu.matmul %181, %180, %cst_80 {dimension_numbers = #tpu.dot_dimension_numbers<[1], [0], [0], [1], [0, 0, 1, 1], [], []>} : vector<32x32xbf16>, vector<32x128xbf16>, vector<32x128xf32> -> vector<32x128xf32>
    %c320 = arith.constant 320 : index
    %c0_81 = arith.constant 0 : index
    %183 = vector.load %arg6[%c320, %c0_81] : memref<512x128xbf16, #tpu.memory_space<vmem>>, vector<32x128xbf16>
    %184 = arith.truncf %178 : vector<32x32xf32> to vector<32x32xbf16>
    %cst_82 = arith.constant dense<0.000000e+00> : vector<32x128xf32>
    %185 = tpu.matmul %184, %183, %cst_82 {dimension_numbers = #tpu.dot_dimension_numbers<[1], [0], [0], [1], [0, 0, 1, 1], [], []>} : vector<32x32xbf16>, vector<32x128xbf16>, vector<32x128xf32> -> vector<32x128xf32>
    %186 = arith.addf %182, %185 : vector<32x128xf32>
    %187 = vector.broadcast %179 : vector<1x128xf32> to vector<32x128xf32>
    %188 = arith.addf %186, %187 : vector<32x128xf32>
    %cst_83 = arith.constant 0.000000e+00 : f32
    %189 = vector.broadcast %cst_83 : f32 to vector<32x128xf32>
    %190 = arith.maximumf %188, %189 : vector<32x128xf32>
    %191 = vector.extract_strided_slice %190 {offsets = [0, 0], sizes = [32, 32], strides = [1, 1]} : vector<32x128xf32> to vector<32x32xf32>
    %c4_84 = arith.constant 4 : index
    %c0_85 = arith.constant 0 : index
    %192 = vector.load %arg7[%c4_84, %c0_85] : memref<8x128xf32, #tpu.memory_space<vmem>>, vector<1x128xf32>
    %c352 = arith.constant 352 : index
    %c0_86 = arith.constant 0 : index
    %193 = vector.load %arg6[%c352, %c0_86] : memref<512x128xbf16, #tpu.memory_space<vmem>>, vector<32x128xbf16>
    %194 = arith.truncf %164 : vector<32x32xf32> to vector<32x32xbf16>
    %cst_87 = arith.constant dense<0.000000e+00> : vector<32x128xf32>
    %195 = tpu.matmul %194, %193, %cst_87 {dimension_numbers = #tpu.dot_dimension_numbers<[1], [0], [0], [1], [0, 0, 1, 1], [], []>} : vector<32x32xbf16>, vector<32x128xbf16>, vector<32x128xf32> -> vector<32x128xf32>
    %c384 = arith.constant 384 : index
    %c0_88 = arith.constant 0 : index
    %196 = vector.load %arg6[%c384, %c0_88] : memref<512x128xbf16, #tpu.memory_space<vmem>>, vector<32x128xbf16>
    %197 = arith.truncf %191 : vector<32x32xf32> to vector<32x32xbf16>
    %cst_89 = arith.constant dense<0.000000e+00> : vector<32x128xf32>
    %198 = tpu.matmul %197, %196, %cst_89 {dimension_numbers = #tpu.dot_dimension_numbers<[1], [0], [0], [1], [0, 0, 1, 1], [], []>} : vector<32x32xbf16>, vector<32x128xbf16>, vector<32x128xf32> -> vector<32x128xf32>
    %199 = arith.addf %195, %198 : vector<32x128xf32>
    %200 = vector.broadcast %192 : vector<1x128xf32> to vector<32x128xf32>
    %201 = arith.addf %199, %200 : vector<32x128xf32>
    %cst_90 = arith.constant 0.000000e+00 : f32
    %202 = vector.broadcast %cst_90 : f32 to vector<32x128xf32>
    %203 = arith.maximumf %201, %202 : vector<32x128xf32>
    %204 = vector.extract_strided_slice %203 {offsets = [0, 0], sizes = [32, 32], strides = [1, 1]} : vector<32x128xf32> to vector<32x32xf32>
    %c5_91 = arith.constant 5 : index
    %c0_92 = arith.constant 0 : index
    %205 = vector.load %arg7[%c5_91, %c0_92] : memref<8x128xf32, #tpu.memory_space<vmem>>, vector<1x128xf32>
    %c416 = arith.constant 416 : index
    %c0_93 = arith.constant 0 : index
    %206 = vector.load %arg6[%c416, %c0_93] : memref<512x128xbf16, #tpu.memory_space<vmem>>, vector<32x128xbf16>
    %207 = arith.truncf %164 : vector<32x32xf32> to vector<32x32xbf16>
    %cst_94 = arith.constant dense<0.000000e+00> : vector<32x128xf32>
    %208 = tpu.matmul %207, %206, %cst_94 {dimension_numbers = #tpu.dot_dimension_numbers<[1], [0], [0], [1], [0, 0, 1, 1], [], []>} : vector<32x32xbf16>, vector<32x128xbf16>, vector<32x128xf32> -> vector<32x128xf32>
    %c448 = arith.constant 448 : index
    %c0_95 = arith.constant 0 : index
    %209 = vector.load %arg6[%c448, %c0_95] : memref<512x128xbf16, #tpu.memory_space<vmem>>, vector<32x128xbf16>
    %210 = arith.truncf %204 : vector<32x32xf32> to vector<32x32xbf16>
    %cst_96 = arith.constant dense<0.000000e+00> : vector<32x128xf32>
    %211 = tpu.matmul %210, %209, %cst_96 {dimension_numbers = #tpu.dot_dimension_numbers<[1], [0], [0], [1], [0, 0, 1, 1], [], []>} : vector<32x32xbf16>, vector<32x128xbf16>, vector<32x128xf32> -> vector<32x128xf32>
    %212 = arith.addf %208, %211 : vector<32x128xf32>
    %213 = vector.broadcast %205 : vector<1x128xf32> to vector<32x128xf32>
    %214 = arith.addf %212, %213 : vector<32x128xf32>
    %cst_97 = arith.constant 0.000000e+00 : f32
    %215 = vector.broadcast %cst_97 : f32 to vector<32x128xf32>
    %216 = arith.maximumf %214, %215 : vector<32x128xf32>
    %217 = vector.extract_strided_slice %216 {offsets = [0, 0], sizes = [32, 32], strides = [1, 1]} : vector<32x128xf32> to vector<32x32xf32>
    %c480 = arith.constant 480 : index
    %c0_98 = arith.constant 0 : index
    %218 = vector.load %arg6[%c480, %c0_98] : memref<512x128xbf16, #tpu.memory_space<vmem>>, vector<32x128xbf16>
    %219 = arith.truncf %217 : vector<32x32xf32> to vector<32x32xbf16>
    %cst_99 = arith.constant dense<0.000000e+00> : vector<32x128xf32>
    %220 = tpu.matmul %219, %218, %cst_99 {dimension_numbers = #tpu.dot_dimension_numbers<[1], [0], [0], [1], [0, 0, 1, 1], [], []>} : vector<32x32xbf16>, vector<32x128xbf16>, vector<32x128xf32> -> vector<32x128xf32>
    %c6 = arith.constant 6 : index
    %c0_100 = arith.constant 0 : index
    %221 = vector.load %arg7[%c6, %c0_100] : memref<8x128xf32, #tpu.memory_space<vmem>>, vector<1x128xf32>
    %222 = vector.broadcast %221 : vector<1x128xf32> to vector<32x128xf32>
    %223 = arith.addf %220, %222 : vector<32x128xf32>
    %c0_101 = arith.constant 0 : index
    %c0_102 = arith.constant 0 : index
    %224 = vector.load %arg8[%c0_101, %c0_102] : memref<32x128xf32, #tpu.memory_space<vmem>>, vector<32x128xf32>
    tpu.vector_store %arg8[%c0_101, %c0_102], %223 {strides = array<i32>} : memref<32x128xf32, #tpu.memory_space<vmem>>, vector<32x128xf32>,
    return
  }
  func.func @transform_0(%arg0: i32) -> (i32, i32) {
    %c0_i32 = arith.constant 0 : i32
    %c0_i32_0 = arith.constant 0 : i32
    %c0_i32_1 = arith.constant 0 : i32
    return %c0_i32, %c0_i32_0 : i32, i32
  }
  func.func @transform_1(%arg0: i32) -> (i32, i32) {
    %c0_i32 = arith.constant 0 : i32
    %c0_i32_0 = arith.constant 0 : i32
    %c0_i32_1 = arith.constant 0 : i32
    return %c0_i32, %c0_i32_0 : i32, i32
  }
  func.func @transform_2(%arg0: i32) -> (i32, i32) {
    %c0_i32 = arith.constant 0 : i32
    %c0_i32_0 = arith.constant 0 : i32
    %c0_i32_1 = arith.constant 0 : i32
    return %c0_i32, %c0_i32_0 : i32, i32
  }
  func.func @transform_3(%arg0: i32) -> (i32, i32) {
    %c0_i32 = arith.constant 0 : i32
    %c0_i32_0 = arith.constant 0 : i32
    %c0_i32_1 = arith.constant 0 : i32
    return %c0_i32, %c0_i32_0 : i32, i32
  }
  func.func @transform_4(%arg0: i32) -> (i32, i32) {
    %c0_i32 = arith.constant 0 : i32
    %c0_i32_0 = arith.constant 0 : i32
    %c0_i32_1 = arith.constant 0 : i32
    return %c0_i32, %c0_i32_0 : i32, i32
  }
  func.func @transform_5(%arg0: i32) -> (i32, i32) {
    %c0_i32 = arith.constant 0 : i32
    %c0_i32_0 = arith.constant 0 : i32
    %c0_i32_1 = arith.constant 0 : i32
    return %c0_i32, %c0_i32_0 : i32, i32
  }
  func.func @transform_6(%arg0: i32) -> (i32, i32) {
    %c0_i32 = arith.constant 0 : i32
    %c0_i32_0 = arith.constant 0 : i32
    %c0_i32_1 = arith.constant 0 : i32
    return %c0_i32, %c0_i32_0 : i32, i32
  }
  func.func @transform_7(%arg0: i32) -> (i32, i32) {
    %c0_i32 = arith.constant 0 : i32
    %c0_i32_0 = arith.constant 0 : i32
    %c0_i32_1 = arith.constant 0 : i32
    return %c0_i32, %c0_i32_0 : i32, i32
  }
}

</mosaic_0001>

<bundles_post_ra>
// kernel: state_model_encoder.1
= control target key start
LH: loop header
LB: loop body
LE: loop exit
PB: predicated region body
PF: predicated region fallthrough
CT: control target
= control target key end

     0   :  { %v5600_v0 = vmov 0   ;;  %v28_v29 = vlaneseq  ;;  %v5601_v38 = vmov 4   ;;  %v7551_v39 = vmov 1.0   ;;  %s7543_s1 = inlined_call_operand.vmem [shape: s32[256,8], index: 1, kind: input, shape index: {}]   ;;  %s7544_s0 = inlined_call_operand.vmem [shape: s32[8,256], index: 0, kind: input, shape index: {}]   ;;  %s7545_s2 = inlined_call_operand.vmem [shape: f32[1,256], index: 2, kind: input, shape index: {}]   ;;  %s7546_s3 = inlined_call_operand.vmem [shape: f32[64,32], index: 3, kind: input, shape index: {}]   ;;  %s7547_s5 = inlined_call_operand.vmem [shape: bf16[512,128], index: 5, kind: input, shape index: {}]   ;;  %s7548_s4 = inlined_call_operand.vmem [shape: f32[32,32], index: 4, kind: input, shape index: {}]   ;;  %s7549_s6 = inlined_call_operand.vmem [shape: f32[8,128], index: 6, kind: input, shape index: {}]   ;;  %s7550_s7 = inlined_call_operand.vmem [shape: f32[32,128], index: 7, kind: output, shape index: {}]  }
   0x1   :  { %5489 = vset.pattern.permute.xlu1 %v5600_v0  ;;  %5488 = vset.pattern.permute.xlu0 %v5600_v0  ;;  %v5652_v1 = vld [vmem:[%s7543_s1 + $0x80] sm:$0xff]  ;;  %v5664_v3 = vld [vmem:[%s7543_s1 + $0x88] sm:$0xff]  ;;  %v5676_v5 = vld [vmem:[%s7543_s1 + $0x90] sm:$0xff]  ;;  %v5603_v43 = vmov 2   ;;  %v7553_v46 = vmov 1.0|1.0  }
   0x2   :  { %v5657_v2 = vld [vmem:[%s7543_s1] sm:$0xff]  ;;  %176 = vperm.xlu0 %5488, %v5652_v1   ;;  %v5669_v4 = vld [vmem:[%s7543_s1 + $0x8] sm:$0xff]  ;;  %v5681_v6 = vld [vmem:[%s7543_s1 + $0x98] sm:$0xff]  ;;  %v5827_v32 = vshrl.u32 %v28_v29, 7  ;;  %v5893_v42 = vand.u32 127, %v28_v29  ;;  %v7557_v59 = vmov 0.0  }
   0x3   :  { %128 = vperm.xlu1 %5489, %v5657_v2   ;;  %v5688_v7 = vld [vmem:[%s7543_s1 + $0x10] sm:$0xff]  ;;  %v5693_v8 = vld [vmem:[%s7543_s1 + $0x18] sm:$0xff]  ;;  %v5700_v9 = vld [vmem:[%s7543_s1 + $0xa0] sm:$0xff] }
   0x4   :  { %v5705_v10 = vld [vmem:[%s7543_s1 + $0xa8] sm:$0xff]  ;;  %v5712_v11 = vld [vmem:[%s7543_s1 + $0x20] sm:$0xff]  ;;  %v5724_v13 = vld [vmem:[%s7543_s1 + $0xb0] sm:$0xff]  ;;  %v5842_v35 = vsub.s32 1, %v5827_v32  ;;  %v5905_v49 = vsub.s32 0, %v5827_v32  ;;  %v5920_v55 = vadd.s32 16, %v5827_v32 }
   0x5   :  { %v5717_v12 = vld [vmem:[%s7543_s1 + $0x28] sm:$0xff]  ;;  %v5729_v14 = vld [vmem:[%s7543_s1 + $0xb8] sm:$0xff]  ;;  %v5736_v15 = vld [vmem:[%s7543_s1 + $0x30] sm:$0xff]  ;;  %v5923_v58 = vadd.s32 8, %v5827_v32  ;;  %v5945_v0 = vadd.s32 24, %v5827_v32 }
   0x6   :  { %179 = vperm.xlu0 %5488, %v5664_v3   ;;  %v5741_v16 = vld [vmem:[%s7543_s1 + $0x38] sm:$0xff]  ;;  %v5748_v17 = vld [vmem:[%s7543_s1 + $0xc0] sm:$0xff]  ;;  %v5753_v18 = vld [vmem:[%s7543_s1 + $0xc8] sm:$0xff]  ;;  %7583 = vst [vmem:[#allocation4_spill] sm:$0xff] %v5842_v35 }
   0x7   :  { %131 = vperm.xlu1 %5489, %v5669_v4   ;;  %v5760_v19 = vld [vmem:[%s7543_s1 + $0x40] sm:$0xff]  ;;  %v5765_v20 = vld [vmem:[%s7543_s1 + $0x48] sm:$0xff]  ;;  %v5772_v21 = vld [vmem:[%s7543_s1 + $0xd0] sm:$0xff]  ;;  %7584 = vst [vmem:[#allocation5_spill] sm:$0xff] %v5905_v49 }
   0x8   :  { %v5777_v22 = vld [vmem:[%s7543_s1 + $0xd8] sm:$0xff]  ;;  %v5784_v23 = vld [vmem:[%s7543_s1 + $0x50] sm:$0xff]  ;;  %v5796_v25 = vld [vmem:[%s7543_s1 + $0xe0] sm:$0xff] }
   0x9   :  { %v5789_v24 = vld [vmem:[%s7543_s1 + $0x58] sm:$0xff]  ;;  %v5801_v26 = vld [vmem:[%s7543_s1 + $0xe8] sm:$0xff]  ;;  %v5808_v27 = vld [vmem:[%s7543_s1 + $0x60] sm:$0xff] }
   0xa   :  { %182 = vperm.xlu0 %5488, %v5676_v5   ;;  %v5813_v28 = vld [vmem:[%s7543_s1 + $0x68] sm:$0xff]  ;;  %v5820_v30 = vld [vmem:[%s7543_s1 + $0xf0] sm:$0xff]  ;;  %v5825_v31 = vld [vmem:[%s7543_s1 + $0xf8] sm:$0xff] }
   0xb   :  { %185 = vperm.xlu1 %5489, %v5681_v6   ;;  %7581 = vst [vmem:[#allocation2_spill] sm:$0xff] %v5825_v31  ;;  %v5834_v33 = vld [vmem:[%s7543_s1 + $0x70] sm:$0xff]  ;;  %v5839_v34 = vld [vmem:[%s7543_s1 + $0x78] sm:$0xff]  ;;  %v5847_v36 = vld [vmem:[%s7544_s0] ss:$8 sm:$0x3] }
   0xc   :  { %7582 = vst [vmem:[#allocation3_spill] sm:$0xff] %v5839_v34  ;;  %v5853_v37 = vrot.slane %v5847_v36, %v5842_v35  ;;  %v5912_v52 = vrot.slane %v5847_v36, %v5905_v49 }
   0xe   :  { %134 = vperm.xlu0 %5488, %v5688_v7   ;;  %vm46_vm0 = vcmp.eq.s32.totalorder %v5827_v32, %v5853_v37 }
   0xf   :  { %137 = vperm.xlu1 %5489, %v5693_v8   ;;  %4203 = vmatprep.mubr.msk.f32.mxu0 %vm46_vm0, %v7551_v39  ;;  %v4092_v61 = vsel %vm46_vm0, 1.0, %v7557_v59 }
  0x12   :  { %188 = vperm.xlu0 %5488, %v5700_v9  }
  0x13   :  { %191 = vperm.xlu1 %5489, %v5705_v10  }
  0x16   :  { %140 = vperm.xlu0 %5488, %v5712_v11  }
  0x17   :  { %143 = vperm.xlu1 %5489, %v5717_v12  }
  0x1a   :  { %194 = vperm.xlu0 %5488, %v5724_v13  }
  0x1b   :  { %197 = vperm.xlu1 %5489, %v5729_v14  }
  0x1e   :  { %146 = vperm.xlu0 %5488, %v5736_v15  }
  0x1f   :  { %149 = vperm.xlu1 %5489, %v5741_v16  }
  0x22   :  { %200 = vperm.xlu0 %5488, %v5748_v17  }
  0x23   :  { %203 = vperm.xlu1 %5489, %v5753_v18  }
  0x26   :  { %152 = vperm.xlu0 %5488, %v5760_v19  }
  0x27   :  { %155 = vperm.xlu1 %5489, %v5765_v20  }
  0x2a   :  { %206 = vperm.xlu0 %5488, %v5772_v21  }
  0x2b   :  { %209 = vperm.xlu1 %5489, %v5777_v22  }
  0x2e   :  { %158 = vperm.xlu0 %5488, %v5784_v23  }
  0x2f   :  { %161 = vperm.xlu1 %5489, %v5789_v24  }
  0x32   :  { %212 = vperm.xlu0 %5488, %v5796_v25  }
  0x33   :  { %215 = vperm.xlu1 %5489, %v5801_v26  }
  0x36   :  { %164 = vperm.xlu0 %5488, %v5808_v27  }
  0x37   :  { %167 = vperm.xlu1 %5489, %v5813_v28  }
  0x3a   :  { %218 = vperm.xlu0 %5488, %v5820_v30  }
  0x3b   :  { %221 = vperm.xlu1 %5489, %v5825_v31  }
  0x3e   :  { %170 = vperm.xlu0 %5488, %v5834_v33  }
  0x3f   :  { %173 = vperm.xlu1 %5489, %v5839_v34  }
  0x42   :  { %5490 = vset.pattern.permute.xlu0 %v5601_v38 }
  0x43   :  { %5491 = vset.pattern.permute.xlu1 %v5601_v38  ;;  %320 = vperm.xlu0 %5490, %v5657_v2  }
  0x44   :  { %323 = vperm.xlu1 %5491, %v5669_v4  }
  0x47   :  { %329 = vperm.xlu0 %5490, %v5693_v8  }
  0x48   :  { %326 = vperm.xlu1 %5491, %v5688_v7  }
  0x4b   :  { %335 = vperm.xlu0 %5490, %v5717_v12  }
  0x4c   :  { %332 = vperm.xlu1 %5491, %v5712_v11  }
  0x4f   :  { %341 = vperm.xlu0 %5490, %v5741_v16  }
  0x50   :  { %338 = vperm.xlu1 %5491, %v5736_v15  }
  0x53   :  { %347 = vperm.xlu0 %5490, %v5765_v20  }
  0x54   :  { %344 = vperm.xlu1 %5491, %v5760_v19  }
  0x57   :  { %353 = vperm.xlu0 %5490, %v5789_v24  }
  0x58   :  { %350 = vperm.xlu1 %5491, %v5784_v23  }
  0x5b   :  { %359 = vperm.xlu0 %5490, %v5813_v28  }
  0x5c   :  { %356 = vperm.xlu1 %5491, %v5808_v27  }
  0x5f   :  { %365 = vperm.xlu0 %5490, %v5839_v34  }
  0x60   :  { %362 = vperm.xlu1 %5491, %v5834_v33  }
  0x63   :  { %371 = vperm.xlu0 %5490, %v5664_v3  }
  0x64   :  { %368 = vperm.xlu1 %5491, %v5652_v1  }
  0x67   :  { %377 = vperm.xlu0 %5490, %v5681_v6  }
  0x68   :  { %374 = vperm.xlu1 %5491, %v5676_v5  }
  0x6b   :  { %383 = vperm.xlu0 %5490, %v5705_v10  }
  0x6c   :  { %380 = vperm.xlu1 %5491, %v5700_v9  }
  0x6f   :  { %389 = vperm.xlu0 %5490, %v5729_v14  }
  0x70   :  { %386 = vperm.xlu1 %5491, %v5724_v13  }
  0x73   :  { %392 = vperm.xlu0 %5490, %v5748_v17  }
  0x74   :  { %395 = vperm.xlu1 %5491, %v5753_v18  }
  0x77   :  { %398 = vperm.xlu0 %5490, %v5772_v21  }
  0x78   :  { %401 = vperm.xlu1 %5491, %v5777_v22  }
  0x7b   :  { %404 = vperm.xlu0 %5490, %v5796_v25  }
  0x7c   :  { %407 = vperm.xlu1 %5491, %v5801_v26  }
  0x7f   :  { %410 = vperm.xlu0 %5490, %v5820_v30  }
  0x80   :  { %413 = vperm.xlu1 %5491, %v5825_v31  }
  0x81   :  { %v177_v40 = vpop.permute.xlu0 %176 }
  0x82   :  { %v129_v41 = vpop.permute.xlu1 %128  ;;  %vm239_vm1 = vcmp.eq.s32.totalorder %v5893_v42, %v177_v40 }
  0x83   :  { %5492 = vset.pattern.permute.xlu0 %v5603_v43  ;;  %vm223_vm4 = vcmp.eq.s32.totalorder %v5893_v42, %v129_v41 }
  0x84   :  { %5493 = vset.pattern.permute.xlu1 %v5603_v43 }
  0x85   :  { %v180_v44 = vpop.permute.xlu0 %179 }
  0x86   :  { %v132_v45 = vpop.permute.xlu1 %131  ;;  %vm240_vm3 = vcmp.eq.s32.totalorder %v5893_v42, %v180_v44 }
  0x87   :  { %vm224_vm2 = vcmp.eq.s32.totalorder %v5893_v42, %v132_v45  ;;  %vm5219_vm5 = vmpackc.low %vm240_vm3, %vm239_vm1  ;;  %vm45_vm1 = vcmp.eq.s32.totalorder %v5827_v32, %v5912_v52 }
  0x88   :  { %5220 = vmatprep.subr.msk.bf16.mxu0 %vm5219_vm5, %v7553_v46  ;;  %vm5221_vm6 = vmpackc.low %vm224_vm2, %vm223_vm4  ;;  %v4091_v60 = vsel %vm45_vm1, 1.0, %v7557_v59  ;;  %vm49_vm5 = vcmp.eq.s32.totalorder %v5920_v55, %v5912_v52 }
  0x89   :  { %v183_v47 = vpop.permute.xlu0 %182  ;;  %5222 = vmatpush3.bf16.msk.msra.mxu0 %vm5221_vm6, %v7553_v46  ;;  %vm50_vm6 = vcmp.eq.s32.totalorder %v5920_v55, %v5853_v37  ;;  %v511_v29 = vadd.f32 %v4092_v61, %v4091_v60  ;;  %v4095_v36 = vsel %vm49_vm5, 1.0, %v7557_v59 }
  0x8a   :  { %v186_v48 = vpop.permute.xlu1 %185  ;;  %vm241_vm7 = vcmp.eq.s32.totalorder %v5893_v42, %v183_v47  ;;  %v4096_v38 = vsel %vm50_vm6, 1.0, %v7557_v59 }
  0x8b   :  { %vm242_vm8 = vcmp.eq.s32.totalorder %v5893_v42, %v186_v48  ;;  %v517_v45 = vadd.f32 %v4096_v38, %v4095_v36 }
  0x8c   :  { %vm5223_vm9 = vmpackc.low %vm242_vm8, %vm241_vm7  ;;  %vm47_vm7 = vcmp.eq.s32.totalorder %v5923_v58, %v5912_v52  ;;  %vm48_vm8 = vcmp.eq.s32.totalorder %v5923_v58, %v5853_v37 }
  0x8d   :  { %5224 = vmatprep.subr.msk.bf16.mxu0 %vm5223_vm9, %v7553_v46  ;;  %v135_v50 = vpop.permute.xlu0 %134  ;;  %v4093_v40 = vsel %vm47_vm7, 1.0, %v7557_v59  ;;  %v4094_v41 = vsel %vm48_vm8, 1.0, %v7557_v59 }
  0x8e   :  { %v138_v51 = vpop.permute.xlu1 %137  ;;  %vm225_vm10 = vcmp.eq.s32.totalorder %v5893_v42, %v135_v50  ;;  %v514_v47 = vadd.f32 %v4094_v41, %v4093_v40 }
  0x8f   :  { %vm226_vm11 = vcmp.eq.s32.totalorder %v5893_v42, %v138_v51 }
  0x90   :  { %vm5225_vm12 = vmpackc.low %vm226_vm11, %vm225_vm10  ;;  %vm51_vm11 = vcmp.eq.s32.totalorder %v5945_v0, %v5912_v52 }
  0x91   :  { %5226 = vmatpush3.bf16.msk.msra.mxu0 %vm5225_vm12, %v7553_v46  ;;  %v189_v53 = vpop.permute.xlu0 %188  ;;  %vm52_vm12 = vcmp.eq.s32.totalorder %v5945_v0, %v5853_v37  ;;  %v4097_v48 = vsel %vm51_vm11, 1.0, %v7557_v59 }
  0x92   :  { %v192_v54 = vpop.permute.xlu1 %191  ;;  %vm243_vm13 = vcmp.eq.s32.totalorder %v5893_v42, %v189_v53  ;;  %v4098_v50 = vsel %vm52_vm12, 1.0, %v7557_v59 }
  0x93   :  { %vm244_vm14 = vcmp.eq.s32.totalorder %v5893_v42, %v192_v54  ;;  %v520_v54 = vadd.f32 %v4098_v50, %v4097_v48  ;;  %v6044_v48 = vadd.s32 40, %v5827_v32 }
  0x94   :  { %vm5227_vm15 = vmpackc.low %vm244_vm14, %vm243_vm13 }
  0x95   :  { %5228 = vmatprep.subr.msk.bf16.mxu0 %vm5227_vm15, %v7553_v46  ;;  %v141_v56 = vpop.permute.xlu0 %140 }
  0x96   :  { %v144_v57 = vpop.permute.xlu1 %143  ;;  %vm227_vm2 = vcmp.eq.s32.totalorder %v5893_v42, %v141_v56 }
  0x97   :  { %vm228_vm3 = vcmp.eq.s32.totalorder %v5893_v42, %v144_v57 }
  0x98   :  { %vm5229_vm4 = vmpackc.low %vm228_vm3, %vm227_vm2 }
  0x99   :  { %5230 = vmatpush3.bf16.msk.msra.mxu0 %vm5229_vm4, %v7553_v46  ;;  %v195_v62 = vpop.permute.xlu0 %194 }
  0x9a   :  { %v198_v63 = vpop.permute.xlu1 %197  ;;  %vm245_vm0 = vcmp.eq.s32.totalorder %v5893_v42, %v195_v62 }
  0x9b   :  { %vm246_vm9 = vcmp.eq.s32.totalorder %v5893_v42, %v198_v63 }
  0x9c   :  { %vm5231_vm10 = vmpackc.low %vm246_vm9, %vm245_vm0 }
  0x9d   :  { %5232 = vmatprep.subr.msk.bf16.mxu0 %vm5231_vm10, %v7553_v46  ;;  %v147_v43 = vpop.permute.xlu0 %146 }
  0x9e   :  { %v150_v44 = vpop.permute.xlu1 %149  ;;  %vm229_vm13 = vcmp.eq.s32.totalorder %v5893_v42, %v147_v43  ;;  %512 = vadd.xlane.f32.xlu0 %v511_v29 }
  0x9f   :  { %vm230_vm14 = vcmp.eq.s32.totalorder %v5893_v42, %v150_v44 }
  0xa0   :  { %vm5233_vm15 = vmpackc.low %vm230_vm14, %vm229_vm13 }
  0xa1   :  { %5234 = vmatpush3.bf16.msk.msra.mxu0 %vm5233_vm15, %v7553_v46  ;;  %v201_v51 = vpop.permute.xlu0 %200 }
  0xa2   :  { %v204_v53 = vpop.permute.xlu1 %203  ;;  %vm247_vm2 = vcmp.eq.s32.totalorder %v5893_v42, %v201_v51  ;;  %518 = vadd.xlane.f32.xlu0 %v517_v45 }
  0xa3   :  { %vm248_vm3 = vcmp.eq.s32.totalorder %v5893_v42, %v204_v53 }
  0xa4   :  { %vm5235_vm4 = vmpackc.low %vm248_vm3, %vm247_vm2  ;;  %515 = vadd.xlane.f32.xlu1 %v514_v47  ;;  %v33_v47 = vadd.s32 32, %v5827_v32 }
  0xa5   :  { %5236 = vmatprep.subr.msk.bf16.mxu0 %vm5235_vm4, %v7553_v46  ;;  %v153_v56 = vpop.permute.xlu0 %152 }
  0xa6   :  { %v156_v57 = vpop.permute.xlu1 %155  ;;  %vm231_vm0 = vcmp.eq.s32.totalorder %v5893_v42, %v153_v56  ;;  %v5606_v56 = vmov 1  }
  0xa7   :  { %vm232_vm9 = vcmp.eq.s32.totalorder %v5893_v42, %v156_v57 }
  0xa8   :  { %vm5237_vm10 = vmpackc.low %vm232_vm9, %vm231_vm0  ;;  %521 = vadd.xlane.f32.xlu1 %v520_v54 }
  0xa9   :  { %5238 = vmatpush3.bf16.msk.msra.mxu0 %vm5237_vm10, %v7553_v46  ;;  %v207_v60 = vpop.permute.xlu0 %206 }
  0xaa   :  { %v210_v61 = vpop.permute.xlu1 %209  ;;  %vm249_vm13 = vcmp.eq.s32.totalorder %v5893_v42, %v207_v60 }
  0xab   :  { %vm250_vm14 = vcmp.eq.s32.totalorder %v5893_v42, %v210_v61 }
  0xac   :  { %vm5239_vm15 = vmpackc.low %vm250_vm14, %vm249_vm13 }
  0xad   :  { %5240 = vmatprep.subr.msk.bf16.mxu0 %vm5239_vm15, %v7553_v46  ;;  %v159_v62 = vpop.permute.xlu0 %158 }
  0xae   :  { %v162_v63 = vpop.permute.xlu1 %161  ;;  %vm233_vm2 = vcmp.eq.s32.totalorder %v5893_v42, %v159_v62 }
  0xaf   :  { %vm234_vm3 = vcmp.eq.s32.totalorder %v5893_v42, %v162_v63 }
  0xb0   :  { %vm5241_vm4 = vmpackc.low %vm234_vm3, %vm233_vm2 }
  0xb1   :  { %5242 = vmatpush3.bf16.msk.msra.mxu0 %vm5241_vm4, %v7553_v46  ;;  %v213_v29 = vpop.permute.xlu0 %212 }
  0xb2   :  { %v216_v36 = vpop.permute.xlu1 %215  ;;  %vm251_vm0 = vcmp.eq.s32.totalorder %v5893_v42, %v213_v29 }
  0xb3   :  { %vm252_vm9 = vcmp.eq.s32.totalorder %v5893_v42, %v216_v36 }
  0xb4   :  { %vm5243_vm10 = vmpackc.low %vm252_vm9, %vm251_vm0 }
  0xb5   :  { %5244 = vmatprep.subr.msk.bf16.mxu0 %vm5243_vm10, %v7553_v46  ;;  %v165_v38 = vpop.permute.xlu0 %164 }
  0xb6   :  { %v168_v40 = vpop.permute.xlu1 %167  ;;  %vm235_vm13 = vcmp.eq.s32.totalorder %v5893_v42, %v165_v38 }
  0xb7   :  { %vm236_vm14 = vcmp.eq.s32.totalorder %v5893_v42, %v168_v40 }
  0xb8   :  { %vm5245_vm15 = vmpackc.low %vm236_vm14, %vm235_vm13  ;;  %1481 = vperm.xlu0 %5492, %v5664_v3  }
  0xb9   :  { %5246 = vmatpush3.bf16.msk.msra.mxu0 %vm5245_vm15, %v7553_v46  ;;  %1478 = vperm.xlu1 %5493, %v5652_v1   ;;  %v219_v41 = vpop.permute.xlu0 %218 }
  0xba   :  { %v222_v43 = vpop.permute.xlu1 %221  ;;  %vm253_vm2 = vcmp.eq.s32.totalorder %v5893_v42, %v219_v41 }
  0xbb   :  { %vm254_vm3 = vcmp.eq.s32.totalorder %v5893_v42, %v222_v43 }
  0xbc   :  { %vm5247_vm4 = vmpackc.low %vm254_vm3, %vm253_vm2  ;;  %1487 = vperm.xlu0 %5492, %v5681_v6   ;;  %vm535_vm3 = vcmask 523264  }
  0xbd   :  { %5248 = vmatprep.subr.msk.bf16.mxu0 %vm5247_vm4, %v7553_v46  ;;  %1430 = vperm.xlu1 %5493, %v5657_v2   ;;  %v171_v44 = vpop.permute.xlu0 %170 }
  0xbe   :  { %v174_v45 = vpop.permute.xlu1 %173  ;;  %vm237_vm0 = vcmp.eq.s32.totalorder %v5893_v42, %v171_v44 }
  0xbf   :  { %vm238_vm9 = vcmp.eq.s32.totalorder %v5893_v42, %v174_v45 }
  0xc0   :  { %vm5249_vm10 = vmpackc.low %vm238_vm9, %vm237_vm0  ;;  %1493 = vperm.xlu0 %5492, %v5705_v10  }
  0xc1   :  { %5250 = vmatpush3.bf16.msk.msra.mxu0 %vm5249_vm10, %v7553_v46  ;;  %1433 = vperm.xlu1 %5493, %v5669_v4  }
  0xc2   :  { %v321_v50 = vpop.permute.xlu0 %320 }
  0xc3   :  { %v324_v51 = vpop.permute.xlu1 %323  ;;  %vm415_vm14 = vcmp.eq.s32.totalorder %v5893_v42, %v321_v50 }
  0xc4   :  { %4204 = vmatmul.mubr.msk.f32.vlgmr.msra.gmra.mrb[0].mxu0 %vm45_vm1, %v7551_v39  ;;  %1499 = vperm.xlu0 %5492, %v5729_v14   ;;  %vm54_vm1 = vcmp.eq.s32.totalorder %v33_v47, %v5853_v37  ;;  %vm416_vm15 = vcmp.eq.s32.totalorder %v5893_v42, %v324_v51  ;;  %v4139_v45 = vsel %vm415_vm14, 1.0, %v7557_v59 }
  0xc5   :  { %1484 = vperm.xlu1 %5493, %v5676_v5   ;;  %4205 = vmatprep.mubr.msk.f32.mxu0 %vm48_vm8, %v7551_v39  ;;  %v4100_v38 = vsel %vm54_vm1, 1.0, %v7557_v59 }
  0xc6   :  { %v330_v53 = vpop.permute.xlu0 %329 }
  0xc7   :  { %v327_v54 = vpop.permute.xlu1 %326  ;;  %vm418_vm4 = vcmp.eq.s32.totalorder %v5893_v42, %v330_v53 }
  0xc8   :  { %4206 = vmatmul.mubr.msk.f32.gmra.mrb[2].mxu0 %vm47_vm7, %v7551_v39  ;;  %1505 = vperm.xlu0 %5492, %v5753_v18   ;;  %vm55_vm7 = vcmp.eq.s32.totalorder %v6044_v48, %v5912_v52  ;;  %vm417_vm2 = vcmp.eq.s32.totalorder %v5893_v42, %v327_v54 }
  0xc9   :  { %1436 = vperm.xlu1 %5493, %v5688_v7   ;;  %4207 = vmatprep.mubr.msk.f32.mxu0 %vm50_vm6, %v7551_v39  ;;  %vm56_vm6 = vcmp.eq.s32.totalorder %v6044_v48, %v5853_v37 }
  0xcc   :  { %4208 = vmatmul.mubr.msk.f32.gmra.mrb[4].mxu0 %vm49_vm5, %v7551_v39  ;;  %1508 = vperm.xlu0 %5492, %v5772_v21   ;;  %vm53_vm5 = vcmp.eq.s32.totalorder %v33_v47, %v5912_v52  ;;  %v35_v21 = vadd.s32 48, %v5827_v32  ;;  %v4140_v47 = vsel %vm416_vm15, 1.0, %v7557_v59 }
  0xcd   :  { %1439 = vperm.xlu1 %5493, %v5693_v8   ;;  %4209 = vmatprep.mubr.msk.f32.mxu0 %vm52_vm12, %v7551_v39  ;;  %v4099_v36 = vsel %vm53_vm5, 1.0, %v7557_v59 }
  0xce   :  { %vm58_vm8 = vcmp.eq.s32.totalorder %v35_v21, %v5853_v37 }
  0xcf   :  { %v4104_v43 = vsel %vm58_vm8, 1.0, %v7557_v59 }
  0xd0   :  { %4210 = vmatmul.mubr.msk.f32.gmra.mrb[6].mxu0 %vm51_vm11, %v7551_v39  ;;  %1460 = vperm.xlu0 %5492, %v5784_v23   ;;  %v6072_v23 = vadd.s32 56, %v5827_v32  ;;  %vm57_vm11 = vcmp.eq.s32.totalorder %v35_v21, %v5912_v52  ;;  %v536_v21 = vsel %vm535_vm3, %v4139_v45, 0.0 }
  0xd1   :  { %1490 = vperm.xlu1 %5493, %v5700_v9   ;;  %4211 = vmatprep.mubr.msk.f32.mxu0 %vm54_vm1, %v7551_v39  ;;  %v4103_v41 = vsel %vm57_vm11, 1.0, %v7557_v59 }
  0xd2   :  { %vm60_vm12 = vcmp.eq.s32.totalorder %v6072_v23, %v5853_v37  ;;  %vm59_vm13 = vcmp.eq.s32.totalorder %v6072_v23, %v5912_v52  ;;  %v529_v51 = vadd.f32 %v4104_v43, %v4103_v41 }
  0xd3   :  { %v4105_v48 = vsel %vm59_vm13, 1.0, %v7557_v59 }
  0xd4   :  { %4212 = vmatmul.mubr.msk.f32.gmra.mrb[8].mxu0 %vm53_vm5, %v7551_v39  ;;  %1466 = vperm.xlu0 %5492, %v5808_v27   ;;  %v336_v27 = vpop.permute.xlu0 %335 }
  0xd5   :  { %1442 = vperm.xlu1 %5493, %v5712_v11   ;;  %4213 = vmatprep.mubr.msk.f32.mxu0 %vm56_vm6, %v7551_v39  ;;  %vm420_vm9 = vcmp.eq.s32.totalorder %v5893_v42, %v336_v27 }
  0xd8   :  { %4214 = vmatmul.mubr.msk.f32.gmra.mrb[10].mxu0 %vm55_vm7, %v7551_v39  ;;  %1472 = vperm.xlu0 %5492, %v5834_v33   ;;  %v333_v33 = vpop.permute.xlu1 %332  ;;  %v6101_v57 = vpop.permute.xlu0 %341 }
  0xd9   :  { %1445 = vperm.xlu1 %5493, %v5717_v12   ;;  %4215 = vmatprep.mubr.msk.f32.mxu0 %vm58_vm8, %v7551_v39  ;;  %vm419_vm0 = vcmp.eq.s32.totalorder %v5893_v42, %v333_v33  ;;  %v4144_v33 = vsel %vm420_vm9, 1.0, %v7557_v59  ;;  %vm422_vm1 = vcmp.eq.s32.totalorder %v5893_v42, %v6101_v57 }
  0xda   :  { %v4143_v53 = vsel %vm419_vm0, 1.0, %v7557_v59 }
  0xdc   :  { %4216 = vmatmul.mubr.msk.f32.gmra.mrb[12].mxu0 %vm57_vm11, %v7551_v39  ;;  %5494 = vset.pattern.permute.xlu0 %v5606_v56  ;;  %v339_v60 = vpop.permute.xlu1 %338  ;;  %v6105_v61 = vpop.permute.xlu0 %347 }
  0xdd   :  { %1496 = vperm.xlu1 %5493, %v5724_v13   ;;  %4217 = vmatprep.mubr.msk.f32.mxu0 %vm60_vm12, %v7551_v39  ;;  %vm421_vm10 = vcmp.eq.s32.totalorder %v5893_v42, %v339_v60  ;;  %v4146_v60 = vsel %vm422_vm1, 1.0, %v7557_v59  ;;  %vm424_vm8 = vcmp.eq.s32.totalorder %v5893_v42, %v6105_v61 }
  0xde   :  { %v4145_v27 = vsel %vm421_vm10, 1.0, %v7557_v59  ;;  %v549_v57 = vsel %vm535_vm3, %v4146_v60, 0.0 }
  0xe0   :  { %4218 = vmatmul.mubr.msk.f32.gmra.mrb[14].mxu0 %vm59_vm13, %v7551_v39  ;;  %v6108_v62 = vpop.permute.xlu1 %344  ;;  %v6110_v63 = vpop.permute.xlu0 %353 }
  0xe1   :  { %1448 = vperm.xlu1 %5493, %v5736_v15   ;;  %vm423_vm5 = vcmp.eq.s32.totalorder %v5893_v42, %v6108_v62  ;;  %v1409_v62 = vld [vmem:[%s7545_s2] sm:$0x3]  ;;  %vm426_vm10 = vcmp.eq.s32.totalorder %v5893_v42, %v6110_v63 }
  0xe4   :  { %v6113_v29 = vpop.permute.xlu1 %350  ;;  %v6122_v40 = vpop.permute.xlu0 %359 }
  0xe5   :  { %1451 = vperm.xlu1 %5493, %v5741_v16   ;;  %vm425_vm15 = vcmp.eq.s32.totalorder %v5893_v42, %v6113_v29 }
  0xe6   :  { %v4149_v29 = vsel %vm425_vm15, 1.0, %v7557_v59 }
  0xe8   :  { %v6134_v44 = vpop.permute.xlu1 %356  ;;  %v6138_v50 = vpop.permute.xlu0 %365 }
  0xe9   :  { %1502 = vperm.xlu1 %5493, %v5748_v17   ;;  %vm427_vm1 = vcmp.eq.s32.totalorder %v5893_v42, %v6134_v44  ;;  %vm430_vm15 = vcmp.eq.s32.totalorder %v5893_v42, %v6138_v50 }
  0xea   :  { %v4154_v50 = vsel %vm430_vm15, 1.0, %v7557_v59 }
  0xec   :  { %v6146_v39 = vpop.permute.xlu1 %362  ;;  %v6151_v41 = vpop.permute.xlu0 %371 }
  0xed   :  { %1454 = vperm.xlu1 %5493, %v5760_v19   ;;  %v523_v19 = vadd.f32 %v4100_v38, %v4099_v36  ;;  %v4141_v36 = vsel %vm417_vm2, 1.0, %v7557_v59  ;;  %v537_v38 = vsel %vm535_vm3, %v4140_v47, 0.0 }
  0xee   :  { %v539_v54 = vsel %vm535_vm3, %v4141_v36, 0.0  ;;  %v538_v46 = vadd.f32 %v537_v38, %v536_v21  ;;  %v545_v21 = vsel %vm535_vm3, %v4144_v33, 0.0  ;;  %v4147_v33 = vsel %vm423_vm5, 1.0, %v7557_v59 }
  0xef   :  { %v551_v60 = vsel %vm535_vm3, %v4147_v33, 0.0 }
  0xf0   :  { %v540_v43 = vadd.f32 %v539_v54, %v538_v46  ;;  %v6157_v47 = vpop.permute.xlu1 %368  ;;  %v6160_v36 = vpop.permute.xlu0 %377 }
  0xf1   :  { %1457 = vperm.xlu1 %5493, %v5765_v20  }
  0xf4   :  { %v6166_v38 = vpop.permute.xlu1 %374  ;;  %v6172_v54 = vpop.permute.xlu0 %383 }
  0xf5   :  { %1511 = vperm.xlu1 %5493, %v5777_v22  }
  0xf7   :  { %524 = vadd.xlane.f32.xlu0 %v523_v19  ;;  %v4142_v19 = vsel %vm418_vm4, 1.0, %v7557_v59 }
  0xf8   :  { %v541_v45 = vsel %vm535_vm3, %v4142_v19, 0.0 }
  0xf9   :  { %1463 = vperm.xlu1 %5493, %v5789_v24  }
  0xfb   :  { %530 = vadd.xlane.f32.xlu0 %v529_v51  ;;  %v542_v51 = vadd.f32 %v541_v45, %v540_v43  ;;  %v547_v43 = vsel %vm535_vm3, %v4145_v27, 0.0  ;;  %v6179_v45 = vpop.permute.xlu1 %380 }
  0xfd   :  { %1514 = vperm.xlu1 %5493, %v5796_v25   ;;  %v543_v25 = vsel %vm535_vm3, %v4143_v53, 0.0  ;;  %v4332_v53 = vld [vmem:[%s7544_s0 + $0x2] ss:$8 sm:$0x3] }
  0xfe   :  { %v544_v46 = vadd.f32 %v543_v25, %v542_v51  ;;  %v6185_v51 = vpop.permute.xlu0 %389  ;;  %v1384_v25 = vrot.slane %v4332_v53, %v5842_v35 }
 0x100   :  { %v546_v19 = vadd.f32 %v545_v21, %v544_v46  ;;  %v1380_v46 = vrot.slane %v4332_v53, %v5905_v49  ;;  %vm1386_vm11 = vcmp.eq.s32.totalorder %v5827_v32, %v1384_v25  ;;  %v1418_v21 = vrot.slane %v1409_v62, %v5842_v35  ;;  %v6203_v53 = vpop.permute.xlu1 %386 }
 0x101   :  { %1517 = vperm.xlu1 %5493, %v5801_v26   ;;  %vm1388_vm2 = vcmp.eq.s32.totalorder %v5923_v58, %v1384_v25  ;;  %vm1390_vm0 = vcmp.eq.s32.totalorder %v5920_v55, %v1384_v25  ;;  %vm1392_vm5 = vcmp.eq.s32.totalorder %v5945_v0, %v1384_v25  ;;  %vm437_vm15 = vcmp.eq.s32.totalorder %v5893_v42, %v6203_v53 }
 0x102   :  { %vm1385_vm14 = vcmp.eq.s32.totalorder %v5827_v32, %v1380_v46  ;;  %vm1387_vm4 = vcmp.eq.s32.totalorder %v5923_v58, %v1380_v46  ;;  %vm1389_vm9 = vcmp.eq.s32.totalorder %v5920_v55, %v1380_v46 }
 0x105   :  { %1469 = vperm.xlu1 %5493, %v5813_v28  }
 0x109   :  { %1520 = vperm.xlu1 %5493, %v5820_v30   ;;  %v548_v30 = vadd.f32 %v547_v43, %v546_v19  ;;  %v4334_v19 = vsel %vm1386_vm11, 1.0, %v7557_v59  ;;  %v1414_v43 = vrot.slane %v1409_v62, %v5905_v49  ;;  %vm428_vm11 = vcmp.eq.s32.totalorder %v5893_v42, %v6122_v40 }
 0x10a   :  { %v1422_v61 = vmul.f32 %v4334_v19, %v1418_v21  ;;  %v4335_v19 = vsel %vm1387_vm4, 1.0, %v7557_v59 }
 0x10b   :  { %v550_v27 = vadd.f32 %v549_v57, %v548_v30  ;;  %v6212_v30 = vpop.permute.xlu0 %392 }
 0x10c   :  { %1685 = vmatprep.mubr.f32.mxu0 %v1422_v61 }
 0x10d   :  { %1523 = vperm.xlu1 %5493, %v5825_v31   ;;  %v552_v57 = vadd.f32 %v551_v60, %v550_v27  ;;  %v4338_v27 = vsel %vm1390_vm0, 1.0, %v7557_v59  ;;  %vm434_vm0 = vcmp.eq.s32.totalorder %v5893_v42, %v6160_v36 }
 0x10e   :  { %v6236_v61 = vmul.f32 %v4338_v27, %v1418_v21 }
 0x10f   :  { %v6234_v60 = vpop.permute.xlu0 %398 }
 0x111   :  { %1475 = vperm.xlu1 %5493, %v5839_v34   ;;  %845 = vperm.xlu0 %5494, %v5652_v1   ;;  %v4333_v1 = vsel %vm1385_vm14, 1.0, %v7557_v59  ;;  %v4148_v34 = vsel %vm424_vm8, 1.0, %v7557_v59  ;;  %vm1391_vm8 = vcmp.eq.s32.totalorder %v5945_v0, %v1380_v46  ;;  %vm429_vm14 = vcmp.eq.s32.totalorder %v5893_v42, %v6146_v39 }
 0x112   :  { %v6208_v31 = vmul.f32 %v4333_v1, %v1414_v43  ;;  %v553_v33 = vsel %vm535_vm3, %v4148_v34, 0.0  ;;  %v6223_v1 = vmul.f32 %v4335_v19, %v1414_v43  ;;  %v555_v34 = vsel %vm535_vm3, %v4149_v29, 0.0 }
 0x113   :  { %v4339_v27 = vsel %vm1391_vm8, 1.0, %v7557_v59  ;;  %v6257_v25 = vpop.permute.xlu0 %404 }
 0x114   :  { %7585 = vst [vmem:[#allocation6_spill] sm:$0xff] %v6208_v31  ;;  %v6225_v31 = vpop.permute.xlu1 %395  ;;  %v6254_v44 = vmul.f32 %v4339_v27, %v1414_v43  ;;  %v4102_v27 = vsel %vm56_vm6, 1.0, %v7557_v59  ;;  %vm432_vm6 = vcmp.eq.s32.totalorder %v5893_v42, %v6151_v41 }
 0x115   :  { %5495 = vset.pattern.permute.xlu1 %v5606_v56  ;;  %797 = vperm.xlu0 %5494, %v5657_v2   ;;  %v4336_v56 = vsel %vm1388_vm2, 1.0, %v7557_v59  ;;  %v554_v2 = vadd.f32 %v553_v33, %v552_v57  ;;  %v4340_v57 = vsel %vm1392_vm5, 1.0, %v7557_v59  ;;  %vm431_vm2 = vcmp.eq.s32.totalorder %v5893_v42, %v6157_v47 }
 0x116   :  { %v6219_v62 = vmul.f32 %v4336_v56, %v1418_v21  ;;  %v4337_v56 = vsel %vm1389_vm9, 1.0, %v7557_v59  ;;  %v6250_v29 = vmul.f32 %v4340_v57, %v1418_v21  ;;  %v4156_v52 = vsel %vm432_vm6, 1.0, %v7557_v59 }
 0x117   :  { %v6239_v19 = vmul.f32 %v4337_v56, %v1414_v43  ;;  %v556_v63 = vadd.f32 %v555_v34, %v554_v2  ;;  %v4151_v56 = vsel %vm427_vm1, 1.0, %v7557_v59  ;;  %v4152_v43 = vsel %vm428_vm11, 1.0, %v7557_v59 }
 0x118   :  { %v6248_v33 = vpop.permute.xlu1 %401  ;;  %v559_v46 = vsel %vm535_vm3, %v4151_v56, 0.0  ;;  %v569_v41 = vsel %vm535_vm3, %v4156_v52, 0.0  ;;  %vm435_vm9 = vcmp.eq.s32.totalorder %v5893_v42, %v6179_v45  ;;  %vm436_vm11 = vcmp.eq.s32.totalorder %v5893_v42, %v6172_v54 }
 0x119   :  { %800 = vperm.xlu0 %5494, %v5669_v4   ;;  %v4150_v4 = vsel %vm426_vm10, 1.0, %v7557_v59  ;;  %vm438_vm6 = vcmp.eq.s32.totalorder %v5893_v42, %v6185_v51 }
 0x11c   :  { %v6265_v21 = vpop.permute.xlu1 %407 }
 0x11d   :  { %851 = vperm.xlu0 %5494, %v5676_v5   ;;  %v557_v5 = vsel %vm535_vm3, %v4150_v4, 0.0  ;;  %v6269_v4 = vpop.permute.xlu0 %410 }
 0x11e   :  { %v558_v2 = vadd.f32 %v557_v5, %v556_v63  ;;  %v561_v63 = vsel %vm535_vm3, %v4152_v43, 0.0  ;;  %v4106_v43 = vsel %vm60_vm12, 1.0, %v7557_v59 }
 0x120   :  { %v560_v34 = vadd.f32 %v559_v46, %v558_v2  ;;  %v6277_v57 = vpop.permute.xlu1 %413  ;;  %v4155_v46 = vsel %vm431_vm2, 1.0, %v7557_v59 }
 0x121   :  { %854 = vperm.xlu0 %5494, %v5681_v6   ;;  %v4153_v6 = vsel %vm429_vm14, 1.0, %v7557_v59 }
 0x122   :  { %v562_v40 = vadd.f32 %v561_v63, %v560_v34  ;;  %v563_v39 = vsel %vm535_vm3, %v4153_v6, 0.0  ;;  %v567_v6 = vsel %vm535_vm3, %v4155_v46, 0.0  ;;  %v532_v63 = vadd.f32 %v4106_v43, %v4105_v48 }
 0x124   :  { %v564_v56 = vadd.f32 %v563_v39, %v562_v40 }
 0x125   :  { %803 = vperm.xlu0 %5494, %v5688_v7  }
 0x129   :  { %806 = vperm.xlu0 %5494, %v5693_v8   ;;  %v4101_v8 = vsel %vm55_vm7, 1.0, %v7557_v59  ;;  %vm433_vm7 = vcmp.eq.s32.totalorder %v5893_v42, %v6166_v38 }
 0x12a   :  { %v526_v2 = vadd.f32 %v4102_v27, %v4101_v8  ;;  %v4157_v39 = vsel %vm433_vm7, 1.0, %v7557_v59  ;;  %v7586_v27 = vmov 1.0|1.0  }
 0x12b   :  { %v6279_v7 = vpop.xlane.xlu0 %512 }
 0x12d   :  { %857 = vperm.xlu0 %5494, %v5700_v9   ;;  %v565_v9 = vsel %vm535_vm3, %v4154_v50, 0.0  ;;  %v4158_v50 = vsel %vm434_vm0, 1.0, %v7557_v59 }
 0x12e   :  { %v566_v34 = vadd.f32 %v565_v9, %v564_v56  ;;  %v573_v36 = vsel %vm535_vm3, %v4158_v50, 0.0 }
 0x12f   :  { %v6306_v47 = vpop.xlane.xlu0 %518 }
 0x131   :  { %v6293_v5 = vpop.xlane.xlu1 %515  ;;  %809 = vperm.xlu0 %5494, %v5712_v11   ;;  %v568_v11 = vadd.f32 %v567_v6, %v566_v34  ;;  %v4161_v34 = vsel %vm437_vm15, 1.0, %v7557_v59 }
 0x133   :  { %v570_v38 = vadd.f32 %v569_v41, %v568_v11  ;;  %v6403_v41 = vld [vmem:[%s7543_s1 + $0x40] sm:$0xff] }
 0x134   :  { %7587 = vst [vmem:[#allocation7_spill] sm:$0xff] %v6403_v41 }
 0x135   :  { %527 = vadd.xlane.f32.xlu1 %v526_v2  ;;  %v6311_v37 = vpop.xlane.xlu1 %521  ;;  %812 = vperm.xlu0 %5494, %v5717_v12   ;;  %v571_v12 = vsel %vm535_vm3, %v4157_v39, 0.0 }
 0x136   :  { %v572_v56 = vadd.f32 %v571_v12, %v570_v38 }
 0x137   :  { %v1482_v23 = vpop.permute.xlu0 %1481 }
 0x138   :  { %vm1542_vm12 = vcmp.eq.s32.totalorder %v5893_v42, %v1482_v23  ;;  %v574_v43 = vadd.f32 %v573_v36, %v572_v56  ;;  %v4219_v23 = vld [vmem:[%s7544_s0 + $0x1] ss:$8 sm:$0x3] }
 0x139   :  { %533 = vadd.xlane.f32.xlu1 %v532_v63  ;;  %v1479_v40 = vpop.permute.xlu1 %1478  ;;  %863 = vperm.xlu0 %5494, %v5724_v13   ;;  %v4159_v13 = vsel %vm435_vm9, 1.0, %v7557_v59 }
 0x13a   :  { %vm1541_vm13 = vcmp.eq.s32.totalorder %v5893_v42, %v1479_v40 }
 0x13b   :  { %vm5283_vm4 = vmpackc.low %vm1542_vm12, %vm1541_vm13  ;;  %v1488_v46 = vpop.permute.xlu0 %1487  ;;  %vm439_vm13 = vcmp.eq.s32.totalorder %v5893_v42, %v6212_v30 }
 0x13c   :  { %5284 = vmatprep.subr.msk.bf16.mxu0 %vm5283_vm4, %v7586_v27  ;;  %vm1544_vm8 = vcmp.eq.s32.totalorder %v5893_v42, %v1488_v46  ;;  %v4163_v52 = vsel %vm439_vm13, 1.0, %v7557_v59  ;;  %vm443_vm13 = vcmp.eq.s32.totalorder %v5893_v42, %v6257_v25 }
 0x13d   :  { %v1431_v8 = vpop.permute.xlu1 %1430  ;;  %866 = vperm.xlu0 %5494, %v5729_v14   ;;  %v575_v14 = vsel %vm535_vm3, %v4159_v13, 0.0  ;;  %v583_v30 = vsel %vm535_vm3, %v4163_v52, 0.0  ;;  %v6419_v13 = vld [vmem:[%s7543_s1 + $0xd0] sm:$0xff]  ;;  %v6469_v52 = vld [vmem:[%s7543_s1 + $0x8] sm:$0xff] }
 0x13e   :  { %vm1525_vm10 = vcmp.eq.s32.totalorder %v5893_v42, %v1431_v8  ;;  %v576_v48 = vadd.f32 %v575_v14, %v574_v43  ;;  %7588 = vst [vmem:[#allocation8_spill] sm:$0xff] %v6419_v13  ;;  %v4167_v43 = vsel %vm443_vm13, 1.0, %v7557_v59  ;;  %v6431_v14 = vld [vmem:[%s7543_s1 + $0x50] sm:$0xff] }
 0x13f   :  { %v1494_v51 = vpop.permute.xlu0 %1493 }
 0x140   :  { %vm1546_vm0 = vcmp.eq.s32.totalorder %v5893_v42, %v1494_v51 }
 0x141   :  { %v1434_v2 = vpop.permute.xlu1 %1433  ;;  %818 = vperm.xlu0 %5494, %v5741_v16   ;;  %v4160_v16 = vsel %vm436_vm11, 1.0, %v7557_v59 }
 0x142   :  { %vm1526_vm1 = vcmp.eq.s32.totalorder %v5893_v42, %v1434_v2  ;;  %v577_v54 = vsel %vm535_vm3, %v4160_v16, 0.0 }
 0x143   :  { %vm5285_vm5 = vmpackc.low %vm1526_vm1, %vm1525_vm10  ;;  %v578_v6 = vadd.f32 %v577_v54, %v576_v48  ;;  %vm440_vm1 = vcmp.eq.s32.totalorder %v5893_v42, %v6225_v31  ;;  %v1500_v56 = vpop.permute.xlu0 %1499  ;;  %v591_v48 = vsel %vm535_vm3, %v4167_v43, 0.0 }
 0x144   :  { %5286 = vmatpush3.bf16.msk.msra.mxu0 %vm5285_vm5, %v7586_v27  ;;  %vm441_vm5 = vcmp.eq.s32.totalorder %v5893_v42, %v6234_v60  ;;  %v4164_v31 = vsel %vm440_vm1, 1.0, %v7557_v59 }
 0x145   :  { %v1485_v45 = vpop.permute.xlu1 %1484  ;;  %872 = vperm.xlu0 %5494, %v5753_v18   ;;  %v579_v18 = vsel %vm535_vm3, %v4161_v34, 0.0  ;;  %v4165_v60 = vsel %vm441_vm5, 1.0, %v7557_v59  ;;  %v585_v12 = vsel %vm535_vm3, %v4164_v31, 0.0  ;;  %v6500_v31 = vld [vmem:[%s7543_s1 + $0x20] sm:$0xff] }
 0x146   :  { %vm1543_vm14 = vcmp.eq.s32.totalorder %v5893_v42, %v1485_v45  ;;  %v587_v50 = vsel %vm535_vm3, %v4165_v60, 0.0  ;;  %v7591_v45 = vld [vmem:[#allocation3_spill] sm:$0xff] }
 0x147   :  { %vm5287_vm2 = vmpackc.low %vm1544_vm8, %vm1543_vm14 }
 0x148   :  { %5288 = vmatprep.subr.msk.bf16.mxu0 %vm5287_vm2, %v7586_v27 }
 0x149   :  { %v1437_v9 = vpop.permute.xlu1 %1436  ;;  %824 = vperm.xlu0 %5494, %v5765_v20   ;;  %v580_v20 = vadd.f32 %v579_v18, %v578_v6  ;;  %v7592_v6 = vmov 1.0   ;;  %v6454_v18 = vld [vmem:[%s7543_s1 + $0xe0] sm:$0xff] }
 0x14a   :  { %848 = vperm.xlu1 %5495, %v5664_v3   ;;  %vm1527_vm7 = vcmp.eq.s32.totalorder %v5893_v42, %v1437_v9  ;;  %v4162_v3 = vsel %vm438_vm6, 1.0, %v7557_v59  ;;  %vm442_vm6 = vcmp.eq.s32.totalorder %v5893_v42, %v6248_v33  ;;  %7593 = vst [vmem:[#allocation3_spill] sm:$0xff] %v6454_v18 }
 0x14b   :  { %v4166_v36 = vsel %vm442_vm6, 1.0, %v7557_v59 }
 0x14c   :  { %v589_v25 = vsel %vm535_vm3, %v4166_v36, 0.0 }
 0x14d   :  { %v1440_v53 = vpop.permute.xlu1 %1439  ;;  %878 = vperm.xlu0 %5494, %v5777_v22  }
 0x14e   :  { %vm1528_vm12 = vcmp.eq.s32.totalorder %v5893_v42, %v1440_v53  ;;  %860 = vperm.xlu1 %5495, %v5705_v10   ;;  %v581_v10 = vsel %vm535_vm3, %v4162_v3, 0.0  ;;  %v1506_v3 = vpop.permute.xlu0 %1505 }
 0x14f   :  { %vm5289_vm4 = vmpackc.low %vm1528_vm12, %vm1527_vm7  ;;  %v582_v22 = vadd.f32 %v581_v10, %v580_v20  ;;  %vm1548_vm7 = vcmp.eq.s32.totalorder %v5893_v42, %v1500_v56  ;;  %v5607_v20 = vmov 5  }
 0x150   :  { %5290 = vmatpush3.bf16.msk.msra.mxu0 %vm5289_vm4, %v7586_v27 }
 0x151   :  { %v1491_v63 = vpop.permute.xlu1 %1490  ;;  %830 = vperm.xlu0 %5494, %v5789_v24   ;;  %v6379_v24 = vrot.slane %v4219_v23, %v5842_v35  ;;  %v584_v40 = vadd.f32 %v583_v30, %v582_v22  ;;  %v6490_v30 = vld [vmem:[%s7543_s1 + $0x60] sm:$0xff] }
 0x152   :  { %vm1545_vm9 = vcmp.eq.s32.totalorder %v5893_v42, %v1491_v63  ;;  %815 = vperm.xlu1 %5495, %v5736_v15   ;;  %v6376_v15 = vrot.slane %v4219_v23, %v5905_v49  ;;  %7594 = vst [vmem:[#allocation9_spill] sm:$0xff] %v6490_v30  ;;  %v1509_v56 = vpop.permute.xlu0 %1508 }
 0x153   :  { %vm5291_vm10 = vmpackc.low %vm1546_vm0, %vm1545_vm9  ;;  %vm775_vm11 = vcmp.eq.s32.totalorder %v5923_v58, %v6379_v24  ;;  %v586_v8 = vadd.f32 %v585_v12, %v584_v40  ;;  %vm773_vm9 = vcmp.eq.s32.totalorder %v5827_v32, %v6379_v24  ;;  %vm7579_vm6 = vcmp.eq.s32.totalorder %v5920_v55, %v6379_v24  ;;  %v6521_v12 = vld [vmem:[%s7543_s1 + $0xf0] sm:$0xff] }
 0x154   :  { %5292 = vmatprep.subr.msk.bf16.mxu0 %vm5291_vm10, %v7586_v27  ;;  %vm7580_vm8 = vcmp.eq.s32.totalorder %v5923_v58, %v6376_v15  ;;  %vm772_vm0 = vcmp.eq.s32.totalorder %v5827_v32, %v6376_v15  ;;  %vm444_vm10 = vcmp.eq.s32.totalorder %v5893_v42, %v6265_v21  ;;  %v4221_v54 = vsel %vm773_vm9, 1.0, %v7557_v59  ;;  %4324 = vmatprep.mubr.msk.f32.mxu1 %vm773_vm9, %v7592_v6 }
 0x155   :  { %v1443_v11 = vpop.permute.xlu1 %1442  ;;  %884 = vperm.xlu0 %5494, %v5801_v26   ;;  %v4222_v39 = vsel %vm7580_vm8, 1.0, %v7557_v59  ;;  %v4223_v26 = vsel %vm775_vm11, 1.0, %v7557_v59  ;;  %v588_v33 = vadd.f32 %v587_v50, %v586_v8  ;;  %v4220_v34 = vsel %vm772_vm0, 1.0, %v7557_v59  ;;  %7595 = vst [vmem:[#allocation10_spill] sm:$0xff] %v6521_v12 }
 0x156   :  { %869 = vperm.xlu1 %5495, %v5748_v17   ;;  %vm1529_vm14 = vcmp.eq.s32.totalorder %v5893_v42, %v1443_v11  ;;  %v6406_v38 = vadd.f32 %v4223_v26, %v4222_v39  ;;  %v6457_v53 = vadd.f32 %v4221_v54, %v4220_v34  ;;  %v4168_v63 = vsel %vm444_vm10, 1.0, %v7557_v59 }
 0x157   :  { %v590_v16 = vadd.f32 %v589_v25, %v588_v33  ;;  %v4225_v10 = vsel %vm7579_vm6, 1.0, %v7557_v59  ;;  %v593_v23 = vsel %vm535_vm3, %v4168_v63, 0.0  ;;  %vm7577_vm9 = vcmp.eq.s32.totalorder %v5945_v0, %v6379_v24  ;;  %v6538_v33 = vld [vmem:[%s7543_s1 + $0x70] sm:$0xff]  ;;  %v1461_v25 = vpop.permute.xlu0 %1460 }
 0x158   :  { %vm446_vm10 = vcmp.eq.s32.totalorder %v5893_v42, %v6277_v57  ;;  %v4227_v60 = vsel %vm7577_vm9, 1.0, %v7557_v59  ;;  %7596 = vst [vmem:[#allocation11_spill] sm:$0xff] %v6538_v33 }
 0x159   :  { %v1446_v17 = vpop.permute.xlu1 %1445  ;;  %836 = vperm.xlu0 %5494, %v5813_v28   ;;  %v7589_v28 = vld [vmem:[#allocation2_spill] sm:$0xff]  ;;  %v592_v51 = vadd.f32 %v591_v48, %v590_v16  ;;  %v4170_v50 = vsel %vm446_vm10, 1.0, %v7557_v59 }
 0x15a   :  { %vm1530_vm15 = vcmp.eq.s32.totalorder %v5893_v42, %v1446_v17  ;;  %821 = vperm.xlu1 %5495, %v6403_v41   ;;  %7590 = vst [vmem:[#allocation2_spill] sm:$0xff] %v6431_v14  ;;  %v597_v36 = vsel %vm535_vm3, %v4170_v50, 0.0 }
 0x15b   :  { %vm5293_vm2 = vmpackc.low %vm1530_vm15, %vm1529_vm14  ;;  %vm445_vm14 = vcmp.eq.s32.totalorder %v5893_v42, %v6269_v4  ;;  %v594_v40 = vadd.f32 %v593_v23, %v592_v51  ;;  %v1467_v54 = vpop.permute.xlu0 %1466 }
 0x15c   :  { %5294 = vmatpush3.bf16.msk.msra.mxu0 %vm5293_vm2, %v7586_v27  ;;  %vm7578_vm2 = vcmp.eq.s32.totalorder %v5920_v55, %v6376_v15  ;;  %v4169_v22 = vsel %vm445_vm14, 1.0, %v7557_v59 }
 0x15d   :  { %v1497_v2 = vpop.permute.xlu1 %1496  ;;  %890 = vperm.xlu0 %5494, %v7589_v28   ;;  %v4224_v21 = vsel %vm7578_vm2, 1.0, %v7557_v59  ;;  %v595_v17 = vsel %vm535_vm3, %v4169_v22, 0.0  ;;  %v6583_v22 = vld [vmem:[%s7543_s1 + $0x80] sm:$0xff] }
 0x15e   :  { %vm1547_vm12 = vcmp.eq.s32.totalorder %v5893_v42, %v1497_v2  ;;  %875 = vperm.xlu1 %5495, %v6419_v13   ;;  %v6493_v11 = vadd.f32 %v4225_v10, %v4224_v21  ;;  %v596_v57 = vadd.f32 %v595_v17, %v594_v40  ;;  %v6530_v2 = vld [vmem:[%s7543_s1 + $0x30] sm:$0xff]  ;;  %v6576_v21 = vld [vmem:[%s7543_s1 + $0x28] sm:$0xff]  ;;  %v6593_v17 = vld [vmem:[%s7543_s1 + $0x38] sm:$0xff] }
 0x15f   :  { %vm5295_vm4 = vmpackc.low %vm1548_vm7, %vm1547_vm12  ;;  %vm1550_vm7 = vcmp.eq.s32.totalorder %v5893_v42, %v1506_v3 }
 0x160   :  { %5296 = vmatprep.subr.msk.bf16.mxu0 %vm5295_vm4, %v7586_v27  ;;  %vm7576_vm4 = vcmp.eq.s32.totalorder %v5945_v0, %v6376_v15 }
 0x161   :  { %v1449_v46 = vpop.permute.xlu1 %1448  ;;  %842 = vperm.xlu0 %5494, %v7591_v45   ;;  %v4226_v26 = vsel %vm7576_vm4, 1.0, %v7557_v59  ;;  %v6549_v45 = vld [vmem:[%s7543_s1] sm:$0xff] }
 0x162   :  { %827 = vperm.xlu1 %5495, %v6431_v14   ;;  %vm1531_vm1 = vcmp.eq.s32.totalorder %v5893_v42, %v1449_v46  ;;  %v6524_v8 = vadd.f32 %v4227_v60, %v4226_v26  ;;  %v598_v46 = vadd.f32 %v597_v36, %v596_v57  ;;  %v6600_v26 = vld [vmem:[%s7543_s1 + $0x90] sm:$0xff]  ;;  %v6606_v57 = vld [vmem:[%s7543_s1 + $0x48] sm:$0xff]  ;;  %v6617_v36 = vld [vmem:[%s7543_s1 + $0xa0] sm:$0xff] }
 0x164   :  { %v599_v16 = vrot.slane %v598_v46, 4 }
 0x165   :  { %v1452_v9 = vpop.permute.xlu1 %1451  ;;  %5497 = vset.pattern.permute.xlu0 %v5607_v20 }
 0x166   :  { %vm1532_vm5 = vcmp.eq.s32.totalorder %v5893_v42, %v1452_v9  ;;  %881 = vperm.xlu1 %5495, %v6454_v18   ;;  %992 = vperm.xlu0 %5497, %v6469_v52   ;;  %v6559_v9 = vld [vmem:[%s7543_s1 + $0x10] sm:$0xff]  ;;  %v600_v34 = vadd.f32 %v599_v16, %v598_v46  ;;  %v614_v16 = vmax.f32 %v6293_v5, 1e-12 }
 0x167   :  { %vm5297_vm15 = vmpackc.low %vm1532_vm5, %vm1531_vm1 }
 0x168   :  { %5298 = vmatpush3.bf16.msk.msra.mxu0 %vm5297_vm15, %v7586_v27  ;;  %vm1551_vm15 = vcmp.eq.s32.totalorder %v5893_v42, %v1509_v56  ;;  %v601_v51 = vrot.slane %v600_v34, 2  ;;  %v613_v56 = vmax.f32 %v6279_v7, 1e-12 }
 0x169   :  { %v1503_v4 = vpop.permute.xlu1 %1502 }
 0x16a   :  { %vm1549_vm12 = vcmp.eq.s32.totalorder %v5893_v42, %v1503_v4  ;;  %833 = vperm.xlu1 %5495, %v6490_v30   ;;  %1001 = vperm.xlu0 %5497, %v6500_v31   ;;  %v1473_v4 = vpop.permute.xlu0 %1472  ;;  %v602_v10 = vadd.f32 %v601_v51, %v600_v34  ;;  %5532 = vrsqrt.f32 %v613_v56  ;;  %v616_v56 = vmax.f32 %v6311_v37, 1e-12 }
 0x16b   :  { %vm5299_vm13 = vmpackc.low %vm1550_vm7, %vm1549_vm12  ;;  %5534 = vrsqrt.f32 %v614_v16  ;;  %v2050_v16 = vld [vmem:[%s7546_s3 + $0x28] sm:$0xff] }
 0x16c   :  { %5300 = vmatprep.subr.msk.bf16.mxu0 %vm5299_vm13, %v7586_v27  ;;  %vm1535_vm13 = vcmp.eq.s32.totalorder %v5893_v42, %v1461_v25  ;;  %v2046_v25 = vld [vmem:[%s7546_s3 + $0x8] sm:$0xff] }
 0x16d   :  { %v1455_v39 = vpop.permute.xlu1 %1454 }
 0x16e   :  { %887 = vperm.xlu1 %5495, %v6521_v12   ;;  %1007 = vperm.xlu0 %5497, %v6530_v2   ;;  %vm1533_vm1 = vcmp.eq.s32.totalorder %v5893_v42, %v1455_v39  ;;  %v603_v39 = vrot.slane %v602_v10, 1 }
 0x170   :  { %v6609_v50 = vadd.f32 %v603_v39, %v602_v10  ;;  %v2048_v39 = vld [vmem:[%s7546_s3 + $0x18] sm:$0xff] }
 0x171   :  { %v1458_v28 = vpop.permute.xlu1 %1457 }
 0x172   :  { %vm1534_vm5 = vcmp.eq.s32.totalorder %v5893_v42, %v1458_v28  ;;  %839 = vperm.xlu1 %5495, %v6538_v33   ;;  %1013 = vperm.xlu0 %5497, %v6403_v41   ;;  %v638_v34 = vmax.f32 %v6609_v50, 1e-12 }
 0x173   :  { %vm5301_vm14 = vmpackc.low %vm1534_vm5, %vm1533_vm1 }
 0x174   :  { %5302 = vmatpush3.bf16.msk.msra.mxu0 %vm5301_vm14, %v7586_v27  ;;  %5536 = vrsqrt.f32 %v638_v34  ;;  %v6684_v34 = vld [vmem:[%s7543_s1 + $0x78] sm:$0xff]  ;;  %v5533_v35 = vpop.eup %5532 }
 0x175   :  { %v1512_v43 = vpop.permute.xlu1 %1511 }
 0x176   :  { %vm1552_vm7 = vcmp.eq.s32.totalorder %v5893_v42, %v1512_v43  ;;  %5496 = vset.pattern.permute.xlu1 %v5607_v20  ;;  %1019 = vperm.xlu0 %5497, %v6431_v14   ;;  %v6567_v20 = vld [vmem:[%s7543_s1 + $0x18] sm:$0xff]  ;;  %v2045_v43 = vld [vmem:[%s7546_s3] sm:$0xff] }
 0x177   :  { %vm5303_vm12 = vmpackc.low %vm1552_vm7, %vm1551_vm15  ;;  %989 = vperm.xlu1 %5496, %v6549_v45   ;;  %vm1537_vm7 = vcmp.eq.s32.totalorder %v5893_v42, %v1467_v54  ;;  %v6640_v54 = vld [vmem:[%s7543_s1 + $0xb0] sm:$0xff] }
 0x178   :  { %5304 = vmatprep.subr.msk.bf16.mxu0 %vm5303_vm12, %v7586_v27 }
 0x179   :  { %v1464_v48 = vpop.permute.xlu1 %1463 }
 0x17a   :  { %vm1536_vm10 = vcmp.eq.s32.totalorder %v5893_v42, %v1464_v48  ;;  %1025 = vperm.xlu0 %5497, %v6490_v30   ;;  %v6632_v48 = vld [vmem:[%s7543_s1 + $0x58] sm:$0xff] }
 0x17b   :  { %vm5305_vm1 = vmpackc.low %vm1536_vm10, %vm1535_vm13  ;;  %995 = vperm.xlu1 %5496, %v6559_v9  }
 0x17c   :  { %5306 = vmatpush3.bf16.msk.msra.mxu0 %vm5305_vm1, %v7586_v27 }
 0x17d   :  { %v1515_v3 = vpop.permute.xlu1 %1514 }
 0x17e   :  { %1031 = vperm.xlu0 %5497, %v6538_v33   ;;  %vm1553_vm5 = vcmp.eq.s32.totalorder %v5893_v42, %v1515_v3  ;;  %v615_v3 = vmax.f32 %v6306_v47, 1e-12 }
 0x17f   :  { %998 = vperm.xlu1 %5496, %v6567_v20  }
 0x180   :  { %5538 = vrsqrt.f32 %v615_v3 }
 0x181   :  { %v1518_v63 = vpop.permute.xlu1 %1517  ;;  %5540 = vrsqrt.f32 %v616_v56  ;;  %v6707_v56 = vld [vmem:[%s7543_s1 + $0x88] sm:$0xff] }
 0x182   :  { %vm1554_vm14 = vcmp.eq.s32.totalorder %v5893_v42, %v1518_v63  ;;  %1037 = vperm.xlu0 %5497, %v6583_v22   ;;  %v6644_v63 = vpack.c.bf16 %v2046_v25, %v2045_v43  ;;  %v2049_v25 = vld [vmem:[%s7546_s3 + $0x20] sm:$0xff] }
 0x183   :  { %vm5307_vm15 = vmpackc.low %vm1554_vm14, %vm1553_vm5  ;;  %1004 = vperm.xlu1 %5496, %v6576_v21   ;;  %vm1539_vm14 = vcmp.eq.s32.totalorder %v5893_v42, %v1473_v4  ;;  %v6666_v4 = vld [vmem:[%s7543_s1 + $0xc0] sm:$0xff]  ;;  %v6692_v49 = vpack.c.bf16 %v2050_v16, %v2049_v25  ;;  %v5535_v16 = vpop.eup %5534 }
 0x184   :  { %5308 = vmatprep.subr.msk.bf16.mxu0 %vm5307_vm15, %v7586_v27  ;;  %v6588_v40 = vpop.xlane.xlu0 %524  ;;  %7597 = vst [vmem:[#allocation12_spill] sm:$0xff] %v6644_v63  ;;  %v5537_v30 = vpop.eup %5536 }
 0x185   :  { %v1470_v23 = vpop.permute.xlu1 %1469 }
 0x186   :  { %vm1538_vm12 = vcmp.eq.s32.totalorder %v5893_v42, %v1470_v23  ;;  %1043 = vperm.xlu0 %5497, %v6600_v26   ;;  %v2047_v23 = vld [vmem:[%s7546_s3 + $0x10] sm:$0xff] }
 0x187   :  { %vm5309_vm13 = vmpackc.low %vm1538_vm12, %vm1537_vm7  ;;  %1010 = vperm.xlu1 %5496, %v6593_v17   ;;  %vm605_vm12 = vcmp.gt.f32.partialorder %v6279_v7, 0.0 }
 0x188   :  { %5310 = vmatpush3.bf16.msk.msra.mxu0 %vm5309_vm13, %v7586_v27  ;;  %v6612_v28 = vpop.xlane.xlu0 %530  ;;  %vm606_vm13 = vcmp.gt.f32.partialorder %v6293_v5, 0.0 }
 0x189   :  { %v1521_v60 = vpop.permute.xlu1 %1520 }
 0x18a   :  { %1049 = vperm.xlu0 %5497, %v6617_v36   ;;  %vm1555_vm10 = vcmp.eq.s32.totalorder %v5893_v42, %v1521_v60  ;;  %v6659_v60 = vld [vmem:[%s7543_s1 + $0x68] sm:$0xff] }
 0x18b   :  { %1016 = vperm.xlu1 %5496, %v6606_v57  }
 0x18d   :  { %v1524_v46 = vpop.permute.xlu1 %1523 }
 0x18e   :  { %vm1556_vm1 = vcmp.eq.s32.totalorder %v5893_v42, %v1524_v46  ;;  %1055 = vperm.xlu0 %5497, %v6640_v54   ;;  %v6671_v46 = vpack.c.bf16 %v2048_v39, %v2047_v23  ;;  %v617_v39 = vmax.f32 %v6588_v40, 1e-12 }
 0x18f   :  { %vm5311_vm5 = vmpackc.low %vm1556_vm1, %vm1555_vm10  ;;  %1022 = vperm.xlu1 %5496, %v6632_v48   ;;  %vm607_vm10 = vcmp.gt.f32.partialorder %v6306_v47, 0.0  ;;  %vm637_vm1 = vcmp.gt.f32.partialorder %v6609_v50, 0.0 }
 0x190   :  { %5312 = vmatprep.subr.msk.bf16.mxu0 %vm5311_vm5, %v7586_v27  ;;  %v6648_v10 = vpop.permute.xlu0 %845  ;;  %7598 = vst [vmem:[#allocation13_spill] sm:$0xff] %v6671_v46  ;;  %5542 = vrsqrt.f32 %v617_v39  ;;  %v6731_v5 = vsel %vm637_vm1, %v5537_v30, 0.0  ;;  %vm608_vm5 = vcmp.gt.f32.partialorder %v6311_v37, 0.0  ;;  %v6765_v37 = vld [vmem:[%s7543_s1 + $0xb8] sm:$0xff] }
 0x191   :  { %v1476_v51 = vpop.permute.xlu1 %1475 }
 0x192   :  { %vm1540_vm15 = vcmp.eq.s32.totalorder %v5893_v42, %v1476_v51  ;;  %1061 = vperm.xlu0 %5497, %v6666_v4   ;;  %v7599_v51 = vld [vmem:[#allocation6_spill] sm:$0xff] }
 0x193   :  { %vm5313_vm7 = vmpackc.low %vm1540_vm15, %vm1539_vm14  ;;  %1028 = vperm.xlu1 %5496, %v6659_v60   ;;  %7600 = vst [vmem:[#allocation6_spill] sm:$0xff] %v6692_v49  ;;  %vm609_vm14 = vcmp.gt.f32.partialorder %v6588_v40, 0.0 }
 0x194   :  { %5314 = vmatpush3.bf16.msk.msra.mxu0 %vm5313_vm7, %v7586_v27  ;;  %v6673_v43 = vpop.permute.xlu0 %797 }
 0x195   :  { %5348 = vmatprep.subr.bf16.mxu0 %v6644_v63  ;;  %vm892_vm15 = vcmp.eq.s32.totalorder %v5893_v42, %v6673_v43 }
 0x196   :  { %1067 = vperm.xlu0 %5497, %v6419_v13  }
 0x197   :  { %1034 = vperm.xlu1 %5496, %v6684_v34   ;;  %v4631_v3 = vpop.f32.mrb[0].mxu0  ;;  %1686 = vmatmul.mubr.f32.vlgmr.msra.gmra.mrb[16].mxu0 %v7599_v51  ;;  %v2051_v51 = vld [vmem:[%s7546_s3 + $0x30] sm:$0xff] }
 0x198   :  { %v4632_v23 = vpop.f32.mrb[1].mxu0  ;;  %5350 = vmatpush3.bf16.msra.mxu0 %v6644_v63  ;;  %1690 = vmatprep.mubr.f32.mxu0 %v6219_v62  ;;  %v6696_v33 = vpop.permute.xlu0 %800  ;;  %v2052_v62 = vld [vmem:[%s7546_s3 + $0x38] sm:$0xff] }
 0x199   :  { %v4633_v59 = vadd.f32 %v4632_v23, %v4631_v3  ;;  %5352 = vmatprep.subr.bf16.mxu0 %v6671_v46  ;;  %v629_v3 = vsel %vm605_vm12, %v5533_v35, 0.0  ;;  %v6714_v63 = vpack.c.bf16 %v2052_v62, %v2051_v51  ;;  %v6724_v35 = vld [vmem:[%s7543_s1 + $0x98] sm:$0xff]  ;;  %vm893_vm7 = vcmp.eq.s32.totalorder %v5893_v42, %v6696_v33 }
 0x19a   :  { %1073 = vperm.xlu0 %5497, %v6454_v18   ;;  %vm5253_vm4 = vmpackc.low %vm893_vm7, %vm892_vm15 }
 0x19b   :  { %1040 = vperm.xlu1 %5496, %v6707_v56   ;;  %v4634_v25 = vpop.f32.mrb[2].mxu0  ;;  %1691 = vmatmul.mubr.f32.gmra.mrb[18].mxu0 %v6223_v1  ;;  %7601 = vst [vmem:[#allocation14_spill] sm:$0xff] %v6714_v63  ;;  %v746_v14 = vmul.f32 %v4633_v59, %v629_v3  ;;  %v5539_v1 = vpop.eup %5538  ;;  %v630_v59 = vsel %vm606_vm13, %v5535_v16, 0.0 }
 0x19c   :  { %v4635_v7 = vpop.f32.mrb[3].mxu0  ;;  %5354 = vmatpush3.bf16.msra.mxu0 %v6671_v46  ;;  %1695 = vmatprep.mubr.f32.mxu0 %v6236_v61  ;;  %v6717_v13 = vpop.permute.xlu0 %851 }
 0x19d   :  { %v4636_v23 = vadd.f32 %v4635_v7, %v4634_v25  ;;  %5356 = vmatprep.subr.bf16.mxu0 %v6692_v49  ;;  %v6736_v25 = vmul.f32 %v746_v14, %v6731_v5  ;;  %v5541_v7 = vpop.eup %5540  ;;  %vm910_vm12 = vcmp.eq.s32.totalorder %v5893_v42, %v6717_v13 }
 0x19e   :  { %1079 = vperm.xlu0 %5497, %v6521_v12  }
 0x19f   :  { %1046 = vperm.xlu1 %5496, %v6724_v35   ;;  %v4637_v61 = vpop.f32.mrb[4].mxu0  ;;  %1696 = vmatmul.mubr.f32.gmra.mrb[20].mxu0 %v6239_v19  ;;  %v747_v51 = vmul.f32 %v4636_v23, %v630_v59  ;;  %v631_v19 = vsel %vm607_vm10, %v5539_v1, 0.0  ;;  %v5608_v1 = vmov 3   ;;  %vm908_vm10 = vcmp.eq.s32.totalorder %v5893_v42, %v6648_v10 }
 0x1a0   :  { %v4638_v39 = vpop.f32.mrb[5].mxu0  ;;  %5358 = vmatpush3.bf16.msra.mxu0 %v6692_v49  ;;  %1700 = vmatprep.mubr.f32.mxu0 %v6250_v29  ;;  %v6740_v50 = vpop.permute.xlu0 %854  ;;  %v6745_v29 = vld [vmem:[%s7543_s1 + $0xa8] sm:$0xff] }
 0x1a1   :  { %v4639_v62 = vadd.f32 %v4638_v39, %v4637_v61  ;;  %5360 = vmatprep.subr.bf16.mxu0 %v6714_v63  ;;  %v6754_v47 = vmul.f32 %v747_v51, %v6731_v5  ;;  %v632_v61 = vsel %vm608_vm5, %v5541_v7, 0.0  ;;  %vm911_vm13 = vcmp.eq.s32.totalorder %v5893_v42, %v6740_v50 }
 0x1a2   :  { %5498 = vset.pattern.permute.xlu0 %v5608_v1  ;;  %vm611_vm5 = vcmp.gt.f32.partialorder %v6612_v28, 0.0  ;;  %vm5255_vm9 = vmpackc.low %vm911_vm13, %vm910_vm12 }
 0x1a3   :  { %v748_v16 = vmul.f32 %v4639_v62, %v631_v19  ;;  %1052 = vperm.xlu1 %5496, %v6745_v29   ;;  %v4640_v30 = vpop.f32.mrb[6].mxu0  ;;  %1701 = vmatmul.mubr.f32.gmra.mrb[22].mxu0 %v6254_v44  ;;  %7602 = vst [vmem:[#allocation15_spill] sm:$0xff] %v6754_v47  ;;  %v5543_v44 = vpop.eup %5542 }
 0x1a4   :  { %v4641_v3 = vpop.f32.mrb[7].mxu0  ;;  %5362 = vmatpush3.bf16.msra.mxu0 %v6714_v63  ;;  %4953 = vmatprep.mubr.msk.f32.mxu0 %vm535_vm3, %v6736_v25  ;;  %v6759_v59 = vpop.permute.xlu0 %803  ;;  %v633_v7 = vsel %vm609_vm14, %v5543_v44, 0.0 }
 0x1a5   :  { %v6757_v14 = vmul.f32 %v748_v16, %v6731_v5  ;;  %v4642_v23 = vadd.f32 %v4641_v3, %v4640_v30  ;;  %v6780_v3 = vld [vmem:[%s7543_s1 + $0xc8] sm:$0xff] }
 0x1a7   :  { %7603 = vst [vmem:[#allocation16_spill] sm:$0xff] %v6757_v14  ;;  %v749_v39 = vmul.f32 %v4642_v23, %v632_v61  ;;  %1058 = vperm.xlu1 %5496, %v6765_v37   ;;  %v4643_v51 = vpop.f32.mrb[8].mxu0  ;;  %4954 = vmatmul.mubr.msk.f32.vlgmr.msra.gmra.mrb[24].mxu0 %vm535_vm3, %v6754_v47 }
 0x1a8   :  { %v4644_v62 = vpop.f32.mrb[9].mxu0  ;;  %4956 = vmatprep.mubr.msk.f32.mxu0 %vm535_vm3, %v6757_v14  ;;  %v6775_v16 = vpop.permute.xlu0 %806 }
 0x1a9   :  { %v6773_v19 = vmul.f32 %v749_v39, %v6731_v5  ;;  %v4645_v40 = vadd.f32 %v4644_v62, %v4643_v51  ;;  %v6791_v62 = vld [vmem:[%s7543_s1 + $0xd8] sm:$0xff]  ;;  %vm895_vm2 = vcmp.eq.s32.totalorder %v5893_v42, %v6775_v16 }
 0x1ab   :  { %7604 = vst [vmem:[#allocation17_spill] sm:$0xff] %v6773_v19  ;;  %v750_v30 = vmul.f32 %v4645_v40, %v633_v7  ;;  %1064 = vperm.xlu1 %5496, %v6780_v3   ;;  %4957 = vmatmul.mubr.msk.f32.gmra.mrb[26].mxu0 %vm535_vm3, %v6773_v19  ;;  %v4646_v23 = vpop.f32.mrb[10].mxu0 }
 0x1ac   :  { %v4647_v61 = vpop.f32.mrb[11].mxu0  ;;  %v858_v44 = vpop.permute.xlu0 %857 }
 0x1ad   :  { %v6786_v39 = vmul.f32 %v750_v30, %v6731_v5  ;;  %v4648_v51 = vadd.f32 %v4647_v61, %v4646_v23  ;;  %v6801_v30 = vld [vmem:[%s7543_s1 + $0xe8] sm:$0xff]  ;;  %vm912_vm7 = vcmp.eq.s32.totalorder %v5893_v42, %v858_v44 }
 0x1af   :  { %7605 = vst [vmem:[#allocation18_spill] sm:$0xff] %v6786_v39  ;;  %1070 = vperm.xlu1 %5496, %v6791_v62   ;;  %v4649_v40 = vpop.f32.mrb[12].mxu0  ;;  %4959 = vmatprep.mubr.msk.f32.mxu0 %vm535_vm3, %v6786_v39  ;;  %v6809_v39 = vld [vmem:[%s7543_s1 + $0xf8] sm:$0xff] }
 0x1b0   :  { %v4650_v7 = vpop.f32.mrb[13].mxu0  ;;  %v6796_v49 = vpop.permute.xlu0 %809 }
 0x1b1   :  { %v4651_v63 = vadd.f32 %v4650_v7, %v4649_v40  ;;  %v619_v7 = vmax.f32 %v6612_v28, 1e-12 }
 0x1b3   :  { %1076 = vperm.xlu1 %5496, %v6801_v30   ;;  %v4652_v23 = vpop.f32.mrb[14].mxu0  ;;  %5544 = vrsqrt.f32 %v619_v7 }
 0x1b4   :  { %v4653_v61 = vpop.f32.mrb[15].mxu0  ;;  %v813_v19 = vpop.permute.xlu0 %812 }
 0x1b5   :  { %v6804_v46 = vadd.f32 %v4653_v61, %v4652_v23  ;;  %vm897_vm12 = vcmp.eq.s32.totalorder %v5893_v42, %v813_v19 }
 0x1b7   :  { %1082 = vperm.xlu1 %5496, %v6809_v39  }
 0x1b8   :  { %v864_v40 = vpop.permute.xlu0 %863 }
 0x1bb   :  { %5499 = vset.pattern.permute.xlu1 %v5608_v1 }
 0x1bc   :  { %v867_v14 = vpop.permute.xlu0 %866 }
 0x1bd   :  { %1181 = vadd.xlane.f32.xlu0 %v6457_v53 }
 0x1c0   :  { %v6814_v47 = vpop.permute.xlu0 %818 }
 0x1c1   :  { %1187 = vadd.xlane.f32.xlu0 %v6493_v11 }
 0x1c2   :  { %v528_v23 = vpop.xlane.xlu1 %527 }
 0x1c3   :  { %v618_v61 = vmax.f32 %v528_v23, 1e-12  ;;  %vm610_vm6 = vcmp.gt.f32.partialorder %v528_v23, 0.0 }
 0x1c4   :  { %v6817_v12 = vpop.permute.xlu0 %872 }
 0x1c5   :  { %5546 = vrsqrt.f32 %v618_v61  ;;  %1190 = vadd.xlane.f32.xlu0 %v6524_v8 }
 0x1c6   :  { %v534_v18 = vpop.xlane.xlu1 %533 }
 0x1c7   :  { %v620_v41 = vmax.f32 %v534_v18, 1e-12 }
 0x1c8   :  { %v6824_v53 = vpop.permute.xlu0 %824 }
 0x1c9   :  { %5548 = vrsqrt.f32 %v620_v41  ;;  %v5545_v41 = vpop.eup %5544 }
 0x1ca   :  { %v849_v1 = vpop.permute.xlu1 %848  ;;  %v635_v33 = vsel %vm611_vm5, %v5545_v41, 0.0 }
 0x1cb   :  { %vm909_vm1 = vcmp.eq.s32.totalorder %v5893_v42, %v849_v1  ;;  %v752_v28 = vmul.f32 %v4651_v63, %v635_v33 }
 0x1cc   :  { %vm5251_vm14 = vmpackc.low %vm909_vm1, %vm908_vm10  ;;  %v879_v13 = vpop.permute.xlu0 %878  ;;  %vm894_vm10 = vcmp.eq.s32.totalorder %v5893_v42, %v6759_v59 }
 0x1cd   :  { %5252 = vmatprep.subr.msk.bf16.mxu1 %vm5251_vm14, %v7586_v27  ;;  %vm5257_vm15 = vmpackc.low %vm895_vm2, %vm894_vm10  ;;  %v6851_v59 = vmul.f32 %v752_v28, %v6731_v5  ;;  %vm896_vm2 = vcmp.eq.s32.totalorder %v5893_v42, %v6796_v49  ;;  %vm899_vm10 = vcmp.eq.s32.totalorder %v5893_v42, %v6814_v47 }
 0x1ce   :  { %v861_v11 = vpop.permute.xlu1 %860  ;;  %5254 = vmatpush3.bf16.msk.msra.mxu1 %vm5253_vm4, %v7586_v27  ;;  %vm915_vm4 = vcmp.eq.s32.totalorder %v5893_v42, %v867_v14 }
 0x1cf   :  { %v5547_v8 = vpop.eup %5546  ;;  %vm913_vm8 = vcmp.eq.s32.totalorder %v5893_v42, %v861_v11  ;;  %5256 = vmatprep.subr.msk.bf16.mxu1 %vm5255_vm9, %v7586_v27  ;;  %vm612_vm9 = vcmp.gt.f32.partialorder %v534_v18, 0.0 }
 0x1d0   :  { %v634_v10 = vsel %vm610_vm6, %v5547_v8, 0.0  ;;  %vm5259_vm13 = vmpackc.low %vm913_vm8, %vm912_vm7  ;;  %v831_v50 = vpop.permute.xlu0 %830  ;;  %vm914_vm6 = vcmp.eq.s32.totalorder %v5893_v42, %v864_v40 }
 0x1d1   :  { %v751_v43 = vmul.f32 %v4648_v51, %v634_v10  ;;  %vm5261_vm8 = vmpackc.low %vm897_vm12, %vm896_vm2  ;;  %vm919_vm2 = vcmp.eq.s32.totalorder %v5893_v42, %v879_v13 }
 0x1d2   :  { %v816_v16 = vpop.permute.xlu1 %815  ;;  %5258 = vmatpush3.bf16.msk.msra.mxu1 %vm5257_vm15, %v7586_v27  ;;  %vm5263_vm1 = vmpackc.low %vm915_vm4, %vm914_vm6  ;;  %vm917_vm15 = vcmp.eq.s32.totalorder %v5893_v42, %v6817_v12 }
 0x1d3   :  { %v5549_v7 = vpop.eup %5548  ;;  %5260 = vmatprep.subr.msk.bf16.mxu1 %vm5259_vm13, %v7586_v27  ;;  %v6848_v63 = vmul.f32 %v751_v43, %v6731_v5  ;;  %vm898_vm5 = vcmp.eq.s32.totalorder %v5893_v42, %v816_v16  ;;  %vm901_vm13 = vcmp.eq.s32.totalorder %v5893_v42, %v6824_v53 }
 0x1d4   :  { %v636_v19 = vsel %vm612_vm9, %v5549_v7, 0.0  ;;  %v885_v18 = vpop.permute.xlu0 %884  ;;  %vm5265_vm7 = vmpackc.low %vm899_vm10, %vm898_vm5 }
 0x1d5   :  { %v753_v51 = vmul.f32 %v6804_v46, %v636_v19  ;;  %4960 = vmatmul.mubr.msk.f32.gmra.mrb[28].mxu0 %vm535_vm3, %v6848_v63  ;;  %vm921_vm10 = vcmp.eq.s32.totalorder %v5893_v42, %v885_v18 }
 0x1d6   :  { %v870_v14 = vpop.permute.xlu1 %869  ;;  %5262 = vmatpush3.bf16.msk.msra.mxu1 %vm5261_vm8, %v7586_v27  ;;  %4962 = vmatprep.mubr.msk.f32.mxu0 %vm535_vm3, %v6851_v59 }
 0x1d7   :  { %v6864_v49 = vmul.f32 %v753_v51, %v6731_v5  ;;  %vm916_vm14 = vcmp.eq.s32.totalorder %v5893_v42, %v870_v14  ;;  %5264 = vmatprep.subr.msk.bf16.mxu1 %vm5263_vm1, %v7586_v27  ;;  %vm903_vm1 = vcmp.eq.s32.totalorder %v5893_v42, %v831_v50 }
 0x1d8   :  { %vm5267_vm12 = vmpackc.low %vm917_vm15, %vm916_vm14  ;;  %v837_v46 = vpop.permute.xlu0 %836 }
 0x1d9   :  { %4963 = vmatmul.mubr.msk.f32.gmra.mrb[30].mxu0 %vm535_vm3, %v6864_v49 }
 0x1da   :  { %v822_v44 = vpop.permute.xlu1 %821  ;;  %5266 = vmatpush3.bf16.msk.msra.mxu1 %vm5265_vm7, %v7586_v27  ;;  %5005 = vmatprep.mubr.msk.f32.mxu0 %vm535_vm3, %v6736_v25 }
 0x1db   :  { %vm900_vm4 = vcmp.eq.s32.totalorder %v5893_v42, %v822_v44  ;;  %1184 = vadd.xlane.f32.xlu1 %v6406_v38  ;;  %5268 = vmatprep.subr.msk.bf16.mxu1 %vm5267_vm12, %v7586_v27  ;;  %vm905_vm12 = vcmp.eq.s32.totalorder %v5893_v42, %v837_v46 }
 0x1dc   :  { %vm5269_vm9 = vmpackc.low %vm901_vm13, %vm900_vm4  ;;  %v891_v12 = vpop.permute.xlu0 %890  ;;  %1789 = vperm.xlu0 %5498, %v6583_v22  }
 0x1de   :  { %v876_v5 = vpop.permute.xlu1 %875  ;;  %5270 = vmatpush3.bf16.msk.msra.mxu1 %vm5269_vm9, %v7586_v27  ;;  %vm923_vm9 = vcmp.eq.s32.totalorder %v5893_v42, %v891_v12 }
 0x1df   :  { %vm918_vm8 = vcmp.eq.s32.totalorder %v5893_v42, %v876_v5 }
 0x1e0   :  { %vm5271_vm6 = vmpackc.low %vm919_vm2, %vm918_vm8  ;;  %1804 = vperm.xlu0 %5498, %v6745_v29   ;;  %v843_v38 = vpop.permute.xlu0 %842 }
 0x1e1   :  { %5272 = vmatprep.subr.msk.bf16.mxu1 %vm5271_vm6, %v7586_v27 }
 0x1e2   :  { %v828_v25 = vpop.permute.xlu1 %827 }
 0x1e3   :  { %vm902_vm5 = vcmp.eq.s32.totalorder %v5893_v42, %v828_v25 }
 0x1e4   :  { %vm5273_vm14 = vmpackc.low %vm903_vm1, %vm902_vm5  ;;  %1756 = vperm.xlu0 %5498, %v6576_v21   ;;  %vm907_vm1 = vcmp.eq.s32.totalorder %v5893_v42, %v843_v38 }
 0x1e5   :  { %5274 = vmatpush3.bf16.msk.msra.mxu1 %vm5273_vm14, %v7586_v27  ;;  %v993_v22 = vpop.permute.xlu0 %992 }
 0x1e6   :  { %v882_v47 = vpop.permute.xlu1 %881  ;;  %vm1085_vm6 = vcmp.eq.s32.totalorder %v5893_v42, %v993_v22 }
 0x1e7   :  { %vm920_vm15 = vcmp.eq.s32.totalorder %v5893_v42, %v882_v47 }
 0x1e8   :  { %vm5275_vm7 = vmpackc.low %vm921_vm10, %vm920_vm15  ;;  %1810 = vperm.xlu0 %5498, %v6765_v37   ;;  %vm1192_vm10 = vcmask 261120  }
 0x1e9   :  { %5276 = vmatprep.subr.msk.bf16.mxu1 %vm5275_vm7, %v7586_v27  ;;  %v1002_v40 = vpop.permute.xlu0 %1001 }
 0x1ea   :  { %v834_v29 = vpop.permute.xlu1 %833 }
 0x1eb   :  { %vm904_vm13 = vcmp.eq.s32.totalorder %v5893_v42, %v834_v29 }
 0x1ec   :  { %vm5277_vm4 = vmpackc.low %vm905_vm12, %vm904_vm13  ;;  %1792 = vperm.xlu1 %5499, %v6707_v56   ;;  %1762 = vperm.xlu0 %5498, %v6593_v17   ;;  %v7606_v56 = vmov 0.0   ;;  %vm1088_vm12 = vcmp.eq.s32.totalorder %v5893_v42, %v1002_v40 }
 0x1ed   :  { %5278 = vmatpush3.bf16.msk.msra.mxu1 %vm5277_vm4, %v7586_v27  ;;  %v1008_v23 = vpop.permute.xlu0 %1007  ;;  %v4261_v61 = vsel %vm1085_vm6, 1.0, %v7606_v56  ;;  %v4264_v33 = vsel %vm1088_vm12, 1.0, %v7606_v56 }
 0x1ee   :  { %v888_v21 = vpop.permute.xlu1 %887  ;;  %vm1090_vm4 = vcmp.eq.s32.totalorder %v5893_v42, %v1008_v23  ;;  %v1200_v10 = vsel %vm1192_vm10, %v4264_v33, 0.0 }
 0x1ef   :  { %vm922_vm2 = vcmp.eq.s32.totalorder %v5893_v42, %v888_v21  ;;  %v4266_v16 = vsel %vm1090_vm4, 1.0, %v7606_v56 }
 0x1f0   :  { %vm5279_vm8 = vmpackc.low %vm923_vm9, %vm922_vm2  ;;  %1741 = vperm.xlu1 %5499, %v6549_v45   ;;  %1816 = vperm.xlu0 %5498, %v6780_v3   ;;  %v1194_v3 = vsel %vm1192_vm10, %v4261_v61, 0.0  ;;  %vm7609_vm9 = vcmp.eq.s32.totalorder %v5920_v55, %v6376_v15  ;;  %vm7610_vm2 = vcmp.eq.s32.totalorder %v5945_v0, %v6379_v24  ;;  %v1204_v51 = vsel %vm1192_vm10, %v4266_v16, 0.0 }
 0x1f1   :  { %5280 = vmatprep.subr.msk.bf16.mxu1 %vm5279_vm8, %v7586_v27  ;;  %v1014_v17 = vpop.permute.xlu0 %1013 }
 0x1f2   :  { %v840_v37 = vpop.permute.xlu1 %839  ;;  %vm1092_vm6 = vcmp.eq.s32.totalorder %v5893_v42, %v1014_v17 }
 0x1f3   :  { %vm906_vm5 = vcmp.eq.s32.totalorder %v5893_v42, %v840_v37  ;;  %v4268_v14 = vsel %vm1092_vm6, 1.0, %v7606_v56 }
 0x1f4   :  { %vm5281_vm14 = vmpackc.low %vm907_vm1, %vm906_vm5  ;;  %1744 = vperm.xlu1 %5499, %v6469_v52   ;;  %1768 = vperm.xlu0 %5498, %v6606_v57   ;;  %vm7611_vm1 = vcmp.eq.s32.totalorder %v5945_v0, %v6376_v15  ;;  %v1208_v12 = vsel %vm1192_vm10, %v4268_v14, 0.0 }
 0x1f5   :  { %5282 = vmatpush3.bf16.msk.msra.mxu1 %vm5281_vm14, %v7586_v27  ;;  %v1020_v53 = vpop.permute.xlu0 %1019 }
 0x1f6   :  { %v990_v45 = vpop.permute.xlu1 %989  ;;  %vm1094_vm14 = vcmp.eq.s32.totalorder %v5893_v42, %v1020_v53 }
 0x1f7   :  { %vm1084_vm15 = vcmp.eq.s32.totalorder %v5893_v42, %v990_v45  ;;  %v4270_v38 = vsel %vm1094_vm14, 1.0, %v7606_v56 }
 0x1f8   :  { %4325 = vmatmul.mubr.msk.f32.vlgmr.msra.gmra.mrb[0].mxu1 %vm772_vm0, %v7592_v6  ;;  %1795 = vperm.xlu1 %5499, %v6600_v26   ;;  %v4260_v52 = vsel %vm1084_vm15, 1.0, %v7606_v56  ;;  %vm7607_vm0 = vcmp.eq.s32.totalorder %v5923_v58, %v6376_v15  ;;  %v1212_v22 = vsel %vm1192_vm10, %v4270_v38, 0.0 }
 0x1f9   :  { %4326 = vmatprep.mubr.msk.f32.mxu1 %vm775_vm11, %v7592_v6  ;;  %v1193_v57 = vsel %vm1192_vm10, %v4260_v52, 0.0  ;;  %1822 = vperm.xlu0 %5498, %v6791_v62   ;;  %v1026_v13 = vpop.permute.xlu0 %1025  ;;  %vm7608_vm11 = vcmp.eq.s32.totalorder %v5920_v55, %v6379_v24 }
 0x1fa   :  { %v996_v1 = vpop.permute.xlu1 %995  ;;  %v1195_v41 = vadd.f32 %v1194_v3, %v1193_v57 }
 0x1fb   :  { %vm1086_vm7 = vcmp.eq.s32.totalorder %v5893_v42, %v996_v1 }
 0x1fc   :  { %4327 = vmatmul.mubr.msk.f32.gmra.mrb[2].mxu1 %vm7607_vm0, %v7592_v6  ;;  %1798 = vperm.xlu1 %5499, %v6724_v35   ;;  %v4262_v26 = vsel %vm1086_vm7, 1.0, %v7606_v56  ;;  %vm1096_vm7 = vcmp.eq.s32.totalorder %v5893_v42, %v1026_v13 }
 0x1fd   :  { %4328 = vmatprep.mubr.msk.f32.mxu1 %vm7608_vm11, %v7592_v6  ;;  %v1196_v62 = vsel %vm1192_vm10, %v4262_v26, 0.0  ;;  %1774 = vperm.xlu0 %5498, %v6632_v48   ;;  %v1032_v35 = vpop.permute.xlu0 %1031  ;;  %v4272_v21 = vsel %vm1096_vm7, 1.0, %v7606_v56 }
 0x1fe   :  { %v999_v11 = vpop.permute.xlu1 %998  ;;  %v1197_v8 = vadd.f32 %v1196_v62, %v1195_v41  ;;  %vm1098_vm0 = vcmp.eq.s32.totalorder %v5893_v42, %v1032_v35  ;;  %v1216_v17 = vsel %vm1192_vm10, %v4272_v21, 0.0 }
 0x1ff   :  { %vm1087_vm13 = vcmp.eq.s32.totalorder %v5893_v42, %v999_v11  ;;  %v4274_v3 = vsel %vm1098_vm0, 1.0, %v7606_v56 }
 0x200   :  { %4329 = vmatmul.mubr.msk.f32.gmra.mrb[4].mxu1 %vm7609_vm9, %v7592_v6  ;;  %1747 = vperm.xlu1 %5499, %v6559_v9   ;;  %v4263_v28 = vsel %vm1087_vm13, 1.0, %v7606_v56  ;;  %v1220_v57 = vsel %vm1192_vm10, %v4274_v3, 0.0 }
 0x201   :  { %4330 = vmatprep.mubr.msk.f32.mxu1 %vm7610_vm2, %v7592_v6  ;;  %v1198_v48 = vsel %vm1192_vm10, %v4263_v28, 0.0  ;;  %1828 = vperm.xlu0 %5498, %v6801_v30   ;;  %v1038_v9 = vpop.permute.xlu0 %1037 }
 0x202   :  { %v1199_v43 = vadd.f32 %v1198_v48, %v1197_v8  ;;  %v1005_v50 = vpop.permute.xlu1 %1004  ;;  %vm1100_vm13 = vcmp.eq.s32.totalorder %v5893_v42, %v1038_v9  ;;  %v7612_v48 = vld [vmem:[#allocation7_spill] sm:$0xff] }
 0x203   :  { %vm1089_vm8 = vcmp.eq.s32.totalorder %v5893_v42, %v1005_v50  ;;  %v4276_v13 = vsel %vm1100_vm13, 1.0, %v7606_v56 }
 0x204   :  { %4331 = vmatmul.mubr.msk.f32.gmra.mrb[6].mxu1 %vm7611_vm1, %v7592_v6  ;;  %1750 = vperm.xlu1 %5499, %v6567_v20   ;;  %v1201_v24 = vadd.f32 %v1200_v10, %v1199_v43  ;;  %v4265_v7 = vsel %vm1089_vm8, 1.0, %v7606_v56  ;;  %v1224_v11 = vsel %vm1192_vm10, %v4276_v13, 0.0 }
 0x205   :  { %v1202_v19 = vsel %vm1192_vm10, %v4265_v7, 0.0  ;;  %1780 = vperm.xlu0 %5498, %v6659_v60   ;;  %v1044_v46 = vpop.permute.xlu0 %1043  ;;  %v7613_v7 = vld [vmem:[#allocation8_spill] sm:$0xff] }
 0x206   :  { %v1203_v30 = vadd.f32 %v1202_v19, %v1201_v24  ;;  %v1011_v18 = vpop.permute.xlu1 %1010  ;;  %vm1102_vm9 = vcmp.eq.s32.totalorder %v5893_v42, %v1044_v46 }
 0x207   :  { %vm1091_vm5 = vcmp.eq.s32.totalorder %v5893_v42, %v1011_v18  ;;  %v4278_v35 = vsel %vm1102_vm9, 1.0, %v7606_v56 }
 0x208   :  { %1801 = vperm.xlu1 %5499, %v6617_v36   ;;  %v1205_v15 = vadd.f32 %v1204_v51, %v1203_v30  ;;  %v4267_v20 = vsel %vm1091_vm5, 1.0, %v7606_v56  ;;  %v1228_v50 = vsel %vm1192_vm10, %v4278_v35, 0.0  ;;  %v7618_v35 = vld [vmem:[#allocation11_spill] sm:$0xff] }
 0x209   :  { %v1206_v44 = vsel %vm1192_vm10, %v4267_v20, 0.0  ;;  %1834 = vperm.xlu0 %5498, %v6809_v39   ;;  %v1050_v23 = vpop.permute.xlu0 %1049 }
 0x20a   :  { %v1207_v5 = vadd.f32 %v1206_v44, %v1205_v15  ;;  %v1017_v25 = vpop.permute.xlu1 %1016  ;;  %vm1104_vm8 = vcmp.eq.s32.totalorder %v5893_v42, %v1050_v23  ;;  %v7614_v44 = vld [vmem:[#allocation2_spill] sm:$0xff] }
 0x20b   :  { %vm1093_vm15 = vcmp.eq.s32.totalorder %v5893_v42, %v1017_v25  ;;  %v4280_v24 = vsel %vm1104_vm8, 1.0, %v7606_v56 }
 0x20c   :  { %1753 = vperm.xlu1 %5499, %v6500_v31   ;;  %v1209_v36 = vadd.f32 %v1208_v12, %v1207_v5  ;;  %v4269_v60 = vsel %vm1093_vm15, 1.0, %v7606_v56  ;;  %v1232_v14 = vsel %vm1192_vm10, %v4280_v24, 0.0 }
 0x20d   :  { %v1210_v47 = vsel %vm1192_vm10, %v4269_v60, 0.0  ;;  %1786 = vperm.xlu0 %5498, %v6684_v34   ;;  %v1056_v53 = vpop.permute.xlu0 %1055 }
 0x20e   :  { %v1211_v29 = vadd.f32 %v1210_v47, %v1209_v36  ;;  %v1023_v40 = vpop.permute.xlu1 %1022  ;;  %vm1106_vm1 = vcmp.eq.s32.totalorder %v5893_v42, %v1056_v53 }
 0x20f   :  { %vm1095_vm12 = vcmp.eq.s32.totalorder %v5893_v42, %v1023_v40  ;;  %v4282_v46 = vsel %vm1106_vm1, 1.0, %v7606_v56 }
 0x210   :  { %1807 = vperm.xlu1 %5499, %v6640_v54   ;;  %v1213_v31 = vadd.f32 %v1212_v22, %v1211_v29  ;;  %v4271_v39 = vsel %vm1095_vm12, 1.0, %v7606_v56  ;;  %v1236_v38 = vsel %vm1192_vm10, %v4282_v46, 0.0  ;;  %v7615_v29 = vld [vmem:[#allocation3_spill] sm:$0xff] }
 0x211   :  { %v1214_v37 = vsel %vm1192_vm10, %v4271_v39, 0.0  ;;  %v1062_v28 = vpop.permute.xlu0 %1061 }
 0x212   :  { %v1215_v61 = vadd.f32 %v1214_v37, %v1213_v31  ;;  %v1029_v45 = vpop.permute.xlu1 %1028  ;;  %vm1108_vm14 = vcmp.eq.s32.totalorder %v5893_v42, %v1062_v28 }
 0x213   :  { %vm1097_vm11 = vcmp.eq.s32.totalorder %v5893_v42, %v1029_v45  ;;  %v4284_v47 = vsel %vm1108_vm14, 1.0, %v7606_v56 }
 0x214   :  { %1759 = vperm.xlu1 %5499, %v6530_v2   ;;  %v1217_v34 = vadd.f32 %v1216_v17, %v1215_v61  ;;  %v4273_v54 = vsel %vm1097_vm11, 1.0, %v7606_v56  ;;  %v1240_v31 = vsel %vm1192_vm10, %v4284_v47, 0.0  ;;  %v7616_v61 = vld [vmem:[#allocation9_spill] sm:$0xff] }
 0x215   :  { %v1218_v52 = vsel %vm1192_vm10, %v4273_v54, 0.0  ;;  %v1068_v30 = vpop.permute.xlu0 %1067 }
 0x216   :  { %v1219_v1 = vadd.f32 %v1218_v52, %v1217_v34  ;;  %v1035_v41 = vpop.permute.xlu1 %1034  ;;  %vm1110_vm7 = vcmp.eq.s32.totalorder %v5893_v42, %v1068_v30 }
 0x217   :  { %vm1099_vm4 = vcmp.eq.s32.totalorder %v5893_v42, %v1035_v41  ;;  %v4286_v17 = vsel %vm1110_vm7, 1.0, %v7606_v56  ;;  %v7617_v41 = vld [vmem:[#allocation10_spill] sm:$0xff] }
 0x218   :  { %1813 = vperm.xlu1 %5499, %v6666_v4   ;;  %v1221_v26 = vadd.f32 %v1220_v57, %v1219_v1  ;;  %v4275_v2 = vsel %vm1099_vm4, 1.0, %v7606_v56  ;;  %v1244_v53 = vsel %vm1192_vm10, %v4286_v17, 0.0 }
 0x219   :  { %v1222_v62 = vsel %vm1192_vm10, %v4275_v2, 0.0  ;;  %v1074_v22 = vpop.permute.xlu0 %1073 }
 0x21a   :  { %v1223_v8 = vadd.f32 %v1222_v62, %v1221_v26  ;;  %v1041_v33 = vpop.permute.xlu1 %1040  ;;  %vm1112_vm0 = vcmp.eq.s32.totalorder %v5893_v42, %v1074_v22 }
 0x21b   :  { %vm1101_vm2 = vcmp.eq.s32.totalorder %v5893_v42, %v1041_v33  ;;  %v4288_v1 = vsel %vm1112_vm0, 1.0, %v7606_v56 }
 0x21c   :  { %1765 = vperm.xlu1 %5499, %v7612_v48   ;;  %v1225_v10 = vadd.f32 %v1224_v11, %v1223_v8  ;;  %v4277_v4 = vsel %vm1101_vm2, 1.0, %v7606_v56  ;;  %v1248_v62 = vsel %vm1192_vm10, %v4288_v1, 0.0 }
 0x21d   :  { %v1226_v43 = vsel %vm1192_vm10, %v4277_v4, 0.0  ;;  %v1080_v34 = vpop.permute.xlu0 %1079 }
 0x21e   :  { %v1227_v16 = vadd.f32 %v1226_v43, %v1225_v10  ;;  %v1047_v9 = vpop.permute.xlu1 %1046  ;;  %vm1114_vm13 = vcmp.eq.s32.totalorder %v5893_v42, %v1080_v34 }
 0x21f   :  { %vm1103_vm6 = vcmp.eq.s32.totalorder %v5893_v42, %v1047_v9  ;;  %v4290_v33 = vsel %vm1114_vm13, 1.0, %v7606_v56  ;;  %v7619_v9 = vld [vmem:[#allocation4_spill] sm:$0xff] }
 0x220   :  { %1819 = vperm.xlu1 %5499, %v7613_v7   ;;  %v1229_v19 = vadd.f32 %v1228_v50, %v1227_v16  ;;  %v4279_v51 = vsel %vm1103_vm6, 1.0, %v7606_v56  ;;  %v1252_v4 = vsel %vm1192_vm10, %v4290_v33, 0.0  ;;  %v7057_v16 = vld [vmem:[%s7544_s0 + $0x3] ss:$8 sm:$0x3] }
 0x221   :  { %v1230_v18 = vsel %vm1192_vm10, %v4279_v51, 0.0  ;;  %v7062_v24 = vrot.slane %v7057_v16, %v7619_v9 }
 0x222   :  { %v1231_v15 = vadd.f32 %v1230_v18, %v1229_v19  ;;  %v1053_v20 = vpop.permute.xlu1 %1052 }
 0x223   :  { %vm1105_vm5 = vcmp.eq.s32.totalorder %v5893_v42, %v1053_v20  ;;  %vm1717_vm2 = vcmp.eq.s32.totalorder %v5827_v32, %v7062_v24 }
 0x224   :  { %1771 = vperm.xlu1 %5499, %v7614_v44   ;;  %v1233_v12 = vadd.f32 %v1232_v14, %v1231_v15  ;;  %v4281_v5 = vsel %vm1105_vm5, 1.0, %v7606_v56  ;;  %4478 = vmatprep.mubr.msk.f32.mxu1 %vm1717_vm2, %v7592_v6 }
 0x225   :  { %v1234_v25 = vsel %vm1192_vm10, %v4281_v5, 0.0 }
 0x226   :  { %v1235_v36 = vadd.f32 %v1234_v25, %v1233_v12  ;;  %v1059_v60 = vpop.permute.xlu1 %1058 }
 0x227   :  { %vm1107_vm15 = vcmp.eq.s32.totalorder %v5893_v42, %v1059_v60 }
 0x228   :  { %1825 = vperm.xlu1 %5499, %v7615_v29   ;;  %v1237_v40 = vadd.f32 %v1236_v38, %v1235_v36  ;;  %v4283_v21 = vsel %vm1107_vm15, 1.0, %v7606_v56 }
 0x229   :  { %v1238_v23 = vsel %vm1192_vm10, %v4283_v21, 0.0 }
 0x22a   :  { %v1239_v39 = vadd.f32 %v1238_v23, %v1237_v40  ;;  %v1065_v37 = vpop.permute.xlu1 %1064 }
 0x22b   :  { %vm1109_vm12 = vcmp.eq.s32.totalorder %v5893_v42, %v1065_v37 }
 0x22c   :  { %1777 = vperm.xlu1 %5499, %v7616_v61   ;;  %v1241_v45 = vadd.f32 %v1240_v31, %v1239_v39  ;;  %v4285_v3 = vsel %vm1109_vm12, 1.0, %v7606_v56 }
 0x22d   :  { %v1242_v54 = vsel %vm1192_vm10, %v4285_v3, 0.0 }
 0x22e   :  { %v1243_v52 = vadd.f32 %v1242_v54, %v1241_v45  ;;  %v1071_v57 = vpop.permute.xlu1 %1070 }
 0x22f   :  { %vm1111_vm11 = vcmp.eq.s32.totalorder %v5893_v42, %v1071_v57 }
 0x230   :  { %1831 = vperm.xlu1 %5499, %v7617_v41   ;;  %v1245_v13 = vadd.f32 %v1244_v53, %v1243_v52  ;;  %v4287_v26 = vsel %vm1111_vm11, 1.0, %v7606_v56 }
 0x231   :  { %v1246_v2 = vsel %vm1192_vm10, %v4287_v26, 0.0 }
 0x232   :  { %v1247_v11 = vadd.f32 %v1246_v2, %v1245_v13  ;;  %v1077_v8 = vpop.permute.xlu1 %1076 }
 0x233   :  { %vm1113_vm4 = vcmp.eq.s32.totalorder %v5893_v42, %v1077_v8 }
 0x234   :  { %1783 = vperm.xlu1 %5499, %v7618_v35   ;;  %v1249_v28 = vadd.f32 %v1248_v62, %v1247_v11  ;;  %v4289_v48 = vsel %vm1113_vm4, 1.0, %v7606_v56 }
 0x235   :  { %v1250_v10 = vsel %vm1192_vm10, %v4289_v48, 0.0 }
 0x236   :  { %v1251_v43 = vadd.f32 %v1250_v10, %v1249_v28  ;;  %v1083_v50 = vpop.permute.xlu1 %1082 }
 0x237   :  { %vm1115_vm9 = vcmp.eq.s32.totalorder %v5893_v42, %v1083_v50 }
 0x238   :  { %v1253_v7 = vadd.f32 %v1252_v4, %v1251_v43  ;;  %v4291_v19 = vsel %vm1115_vm9, 1.0, %v7606_v56 }
 0x239   :  { %v1254_v51 = vsel %vm1192_vm10, %v4291_v19, 0.0 }
 0x23a   :  { %v7068_v30 = vadd.f32 %v1254_v51, %v1253_v7 }
 0x23c   :  { %v1256_v19 = vrot.slane %v7068_v30, 4 }
 0x24a   :  { %v7074_v18 = vpop.xlane.xlu0 %1181 }
 0x24e   :  { %v7076_v14 = vpop.xlane.xlu0 %1187 }
 0x252   :  { %v7078_v15 = vpop.xlane.xlu0 %1190 }
 0x25b   :  { %v1790_v46 = vpop.permute.xlu0 %1789 }
 0x25c   :  { %vm1852_vm8 = vcmp.eq.s32.totalorder %v5893_v42, %v1790_v46 }
 0x25f   :  { %v1805_v36 = vpop.permute.xlu0 %1804 }
 0x260   :  { %vm1857_vm9 = vcmp.eq.s32.totalorder %v5893_v42, %v1805_v36  ;;  %v2607_v36 = vld [vmem:[%s7548_s4] sm:$0xff] }
 0x263   :  { %v1757_v31 = vpop.permute.xlu0 %1756 }
 0x267   :  { %v1811_v3 = vpop.permute.xlu0 %1810 }
 0x268   :  { %v7080_v20 = vpop.xlane.xlu1 %1184 }
 0x26a   :  { %v4731_v44 = vpop.f32.mrb[16].mxu0 }
 0x26b   :  { %v4732_v12 = vpop.f32.mrb[17].mxu0  ;;  %v1763_v13 = vpop.permute.xlu0 %1762 }
 0x26c   :  { %v1793_v5 = vpop.permute.xlu1 %1792  ;;  %v7083_v25 = vadd.f32 %v4732_v12, %v4731_v44 }
 0x26d   :  { %vm1853_vm6 = vcmp.eq.s32.totalorder %v5893_v42, %v1793_v5 }
 0x26e   :  { %v4734_v38 = vpop.f32.mrb[18].mxu0  ;;  %vm5315_vm1 = vmpackc.low %vm1853_vm6, %vm1852_vm8 }
 0x26f   :  { %v4735_v60 = vpop.f32.mrb[19].mxu0  ;;  %5316 = vmatprep.subr.msk.bf16.mxu1 %vm5315_vm1, %v7586_v27  ;;  %v1817_v2 = vpop.permute.xlu0 %1816  ;;  %vm1841_vm1 = vcmp.eq.s32.totalorder %v5893_v42, %v1757_v31 }
 0x270   :  { %v1742_v47 = vpop.permute.xlu1 %1741  ;;  %v7087_v22 = vadd.f32 %v4735_v60, %v4734_v38  ;;  %v1257_v38 = vadd.f32 %v1256_v19, %v7068_v30  ;;  %v2608_v60 = vld [vmem:[%s7548_s4 + $0x8] sm:$0xff] }
 0x271   :  { %vm1836_vm5 = vcmp.eq.s32.totalorder %v5893_v42, %v1742_v47 }
 0x272   :  { %v4737_v29 = vpop.f32.mrb[20].mxu0  ;;  %v1258_v31 = vrot.slane %v1257_v38, 2 }
 0x273   :  { %v4738_v40 = vpop.f32.mrb[21].mxu0  ;;  %v1769_v8 = vpop.permute.xlu0 %1768 }
 0x274   :  { %v1745_v21 = vpop.permute.xlu1 %1744  ;;  %v7090_v23 = vadd.f32 %v4738_v40, %v4737_v29 }
 0x275   :  { %vm1837_vm14 = vcmp.eq.s32.totalorder %v5893_v42, %v1745_v21  ;;  %v7153_v21 = vpack.c.bf16 %v2608_v60, %v2607_v36 }
 0x276   :  { %vm5317_vm15 = vmpackc.low %vm1837_vm14, %vm1836_vm5  ;;  %v4740_v39 = vpop.f32.mrb[22].mxu0 }
 0x277   :  { %v4741_v37 = vpop.f32.mrb[23].mxu0  ;;  %5318 = vmatpush3.bf16.msk.msra.mxu1 %vm5317_vm15, %v7586_v27  ;;  %vm1859_vm15 = vcmp.eq.s32.totalorder %v5893_v42, %v1811_v3 }
 0x278   :  { %v1796_v17 = vpop.permute.xlu1 %1795  ;;  %v7094_v61 = vadd.f32 %v4741_v37, %v4740_v39  ;;  %v1823_v35 = vpop.permute.xlu0 %1822  ;;  %v2609_v39 = vld [vmem:[%s7548_s4 + $0x10] sm:$0xff]  ;;  %v2610_v37 = vld [vmem:[%s7548_s4 + $0x18] sm:$0xff] }
 0x279   :  { %vm1854_vm7 = vcmp.eq.s32.totalorder %v5893_v42, %v1796_v17  ;;  %v7167_v3 = vpack.c.bf16 %v2610_v37, %v2609_v39  ;;  %v7626_v37 = vld [vmem:[#allocation13_spill] sm:$0xff] }
 0x27a   :  { %v4955_v45 = vpop.f32.mrb[24].mxu0 }
 0x27b   :  { %v2152_v34 = vpop.f32.mrb[25].mxu0 }
 0x27c   :  { %v7097_v54 = vpack.c.bf16 %v4955_v45, %v2152_v34  ;;  %v1799_v53 = vpop.permute.xlu1 %1798  ;;  %v1775_v10 = vpop.permute.xlu0 %1774  ;;  %v1259_v34 = vadd.f32 %v1258_v31, %v1257_v38 }
 0x27d   :  { %vm1855_vm12 = vcmp.eq.s32.totalorder %v5893_v42, %v1799_v53  ;;  %v7620_v53 = vld [vmem:[#allocation5_spill] sm:$0xff] }
 0x27e   :  { %vm5319_vm0 = vmpackc.low %vm1855_vm12, %vm1854_vm7  ;;  %v4958_v52 = vpop.f32.mrb[26].mxu0  ;;  %5364 = vmatprep.subr.bf16.mxu0 %v7097_v54 }
 0x27f   :  { %v2162_v57 = vpop.f32.mrb[27].mxu0  ;;  %5366 = vmatpush3.bf16.msra.mxu0 %v7097_v54  ;;  %5320 = vmatprep.subr.msk.bf16.mxu1 %vm5319_vm0, %v7586_v27  ;;  %vm1843_vm0 = vcmp.eq.s32.totalorder %v5893_v42, %v1763_v13  ;;  %v5500_v13 = vld [vmem:[%s7547_s5 + $0x10] sm:$0xff]  }
 0x280   :  { %v7103_v1 = vpack.c.bf16 %v4958_v52, %v2162_v57  ;;  %v1748_v41 = vpop.permute.xlu1 %1747  ;;  %v1829_v43 = vpop.permute.xlu0 %1828  ;;  %v7173_v52 = vrot.slane %v7057_v16, %v7620_v53  ;;  %v1260_v16 = vrot.slane %v1259_v34, 1  ;;  %v5504_v53 = vld [vmem:[%s7547_s5 + $0x20] sm:$0xff]  }
 0x281   :  { %vm1838_vm11 = vcmp.eq.s32.totalorder %v5893_v42, %v1748_v41  ;;  %v7621_v41 = vld [vmem:[#allocation15_spill] sm:$0xff] }
 0x282   :  { %5368 = vmatprep.subr.bf16.mxu0 %v7103_v1 }
 0x283   :  { %5370 = vmatpush3.bf16.msra.mxu0 %v7103_v1 }
 0x284   :  { %v1751_v26 = vpop.permute.xlu1 %1750  ;;  %v1781_v7 = vpop.permute.xlu0 %1780 }
 0x285   :  { %vm1839_vm13 = vcmp.eq.s32.totalorder %v5893_v42, %v1751_v26  ;;  %v7622_v26 = vld [vmem:[#allocation16_spill] sm:$0xff] }
 0x286   :  { %vm5321_vm4 = vmpackc.low %vm1839_vm13, %vm1838_vm11 }
 0x287   :  { %5322 = vmatpush3.bf16.msk.msra.mxu1 %vm5321_vm4, %v7586_v27  ;;  %vm1861_vm4 = vcmp.eq.s32.totalorder %v5893_v42, %v1817_v2  ;;  %v7623_v2 = vld [vmem:[#allocation17_spill] sm:$0xff] }
 0x288   :  { %v1802_v62 = vpop.permute.xlu1 %1801  ;;  %v1835_v5 = vpop.permute.xlu0 %1834 }
 0x289   :  { %vm1856_vm8 = vcmp.eq.s32.totalorder %v5893_v42, %v1802_v62  ;;  %v7624_v62 = vld [vmem:[#allocation18_spill] sm:$0xff] }
 0x28a   :  { %vm5323_vm6 = vmpackc.low %vm1857_vm9, %vm1856_vm8 }
 0x28b   :  { %5324 = vmatprep.subr.msk.bf16.mxu1 %vm5323_vm6, %v7586_v27  ;;  %vm1845_vm6 = vcmp.eq.s32.totalorder %v5893_v42, %v1769_v8  ;;  %v1266_v8 = vmax.f32 %v7074_v18, 1e-12 }
 0x28c   :  { %v1754_v11 = vpop.permute.xlu1 %1753  ;;  %v1787_v45 = vpop.permute.xlu0 %1786 }
 0x28d   :  { %vm1840_vm5 = vcmp.eq.s32.totalorder %v5893_v42, %v1754_v11  ;;  %v5502_v11 = vld [vmem:[%s7547_s5] sm:$0xff]   ;;  %5550 = vrsqrt.f32 %v1266_v8 }
 0x28e   :  { %vm5325_vm14 = vmpackc.low %vm1841_vm1, %vm1840_vm5 }
 0x28f   :  { %5326 = vmatpush3.bf16.msk.msra.mxu1 %vm5325_vm14, %v7586_v27  ;;  %vm1863_vm14 = vcmp.eq.s32.totalorder %v5893_v42, %v1823_v35  ;;  %v1269_v35 = vmax.f32 %v7078_v15, 1e-12 }
 0x290   :  { %v1808_v33 = vpop.permute.xlu1 %1807 }
 0x291   :  { %vm1858_vm7 = vcmp.eq.s32.totalorder %v5893_v42, %v1808_v33 }
 0x292   :  { %vm5327_vm12 = vmpackc.low %vm1859_vm15, %vm1858_vm7 }
 0x293   :  { %5328 = vmatprep.subr.msk.bf16.mxu1 %vm5327_vm12, %v7586_v27  ;;  %vm1847_vm12 = vcmp.eq.s32.totalorder %v5893_v42, %v1775_v10 }
 0x294   :  { %v1760_v28 = vpop.permute.xlu1 %1759 }
 0x295   :  { %vm1842_vm11 = vcmp.eq.s32.totalorder %v5893_v42, %v1760_v28 }
 0x296   :  { %vm5329_vm13 = vmpackc.low %vm1843_vm0, %vm1842_vm11 }
 0x297   :  { %5330 = vmatpush3.bf16.msk.msra.mxu1 %vm5329_vm13, %v7586_v27  ;;  %vm1865_vm13 = vcmp.eq.s32.totalorder %v5893_v42, %v1829_v43  ;;  %v5551_v28 = vpop.eup %5550 }
 0x298   :  { %v1814_v48 = vpop.permute.xlu1 %1813 }
 0x299   :  { %vm1860_vm9 = vcmp.eq.s32.totalorder %v5893_v42, %v1814_v48 }
 0x29a   :  { %vm5331_vm8 = vmpackc.low %vm1861_vm4, %vm1860_vm9 }
 0x29b   :  { %5332 = vmatprep.subr.msk.bf16.mxu1 %vm5331_vm8, %v7586_v27  ;;  %vm1849_vm8 = vcmp.eq.s32.totalorder %v5893_v42, %v1781_v7 }
 0x29c   :  { %v1766_v4 = vpop.permute.xlu1 %1765 }
 0x29d   :  { %vm1844_vm1 = vcmp.eq.s32.totalorder %v5893_v42, %v1766_v4 }
 0x29e   :  { %vm5333_vm5 = vmpackc.low %vm1845_vm6, %vm1844_vm1 }
 0x29f   :  { %5334 = vmatpush3.bf16.msk.msra.mxu1 %vm5333_vm5, %v7586_v27  ;;  %vm1867_vm5 = vcmp.eq.s32.totalorder %v5893_v42, %v1835_v5 }
 0x2a0   :  { %v1820_v50 = vpop.permute.xlu1 %1819 }
 0x2a1   :  { %vm1862_vm15 = vcmp.eq.s32.totalorder %v5893_v42, %v1820_v50 }
 0x2a2   :  { %vm5335_vm7 = vmpackc.low %vm1863_vm14, %vm1862_vm15 }
 0x2a3   :  { %5336 = vmatprep.subr.msk.bf16.mxu1 %vm5335_vm7, %v7586_v27  ;;  %vm1851_vm7 = vcmp.eq.s32.totalorder %v5893_v42, %v1787_v45  ;;  %v7627_v45 = vld [vmem:[#allocation6_spill] sm:$0xff] }
 0x2a4   :  { %v1772_v9 = vpop.permute.xlu1 %1771 }
 0x2a5   :  { %vm1846_vm0 = vcmp.eq.s32.totalorder %v5893_v42, %v1772_v9 }
 0x2a6   :  { %vm5337_vm11 = vmpackc.low %vm1847_vm12, %vm1846_vm0 }
 0x2a7   :  { %5338 = vmatpush3.bf16.msk.msra.mxu1 %vm5337_vm11, %v7586_v27  ;;  %vm1716_vm11 = vcmp.eq.s32.totalorder %v5827_v32, %v7173_v52 }
 0x2a8   :  { %v1826_v51 = vpop.permute.xlu1 %1825  ;;  %v4961_v46 = vpop.f32.mrb[28].mxu0 }
 0x2a9   :  { %vm1864_vm4 = vcmp.eq.s32.totalorder %v5893_v42, %v1826_v51  ;;  %v2172_v44 = vpop.f32.mrb[29].mxu0 }
 0x2aa   :  { %vm5339_vm9 = vmpackc.low %vm1865_vm13, %vm1864_vm4  ;;  %v7137_v12 = vpack.c.bf16 %v4961_v46, %v2172_v44  ;;  %vm1719_vm13 = vcmp.eq.s32.totalorder %v5923_v58, %v7062_v24  ;;  %vm1718_vm4 = vcmp.eq.s32.totalorder %v5923_v58, %v7173_v52 }
 0x2ab   :  { %5340 = vmatprep.subr.msk.bf16.mxu1 %vm5339_vm9, %v7586_v27  ;;  %vm1721_vm9 = vcmp.eq.s32.totalorder %v5920_v55, %v7062_v24 }
 0x2ac   :  { %v1778_v47 = vpop.permute.xlu1 %1777  ;;  %v4964_v29 = vpop.f32.mrb[30].mxu0  ;;  %5372 = vmatprep.subr.bf16.mxu0 %v7137_v12  ;;  %v4411_v32 = vsel %vm1721_vm9, 1.0, %v7606_v56 }
 0x2ad   :  { %vm1848_vm6 = vcmp.eq.s32.totalorder %v5893_v42, %v1778_v47  ;;  %v2182_v40 = vpop.f32.mrb[31].mxu0  ;;  %5374 = vmatpush3.bf16.msra.mxu0 %v7137_v12 }
 0x2ae   :  { %vm5341_vm1 = vmpackc.low %vm1849_vm8, %vm1848_vm6  ;;  %v7151_v30 = vpack.c.bf16 %v4964_v29, %v2182_v40  ;;  %vm1720_vm8 = vcmp.eq.s32.totalorder %v5920_v55, %v7173_v52  ;;  %vm1723_vm6 = vcmp.eq.s32.totalorder %v5945_v0, %v7062_v24 }
 0x2af   :  { %5342 = vmatpush3.bf16.msk.msra.mxu1 %vm5341_vm1, %v7586_v27  ;;  %vm1722_vm1 = vcmp.eq.s32.totalorder %v5945_v0, %v7173_v52  ;;  %v4413_v8 = vsel %vm1723_vm6, 1.0, %v7606_v56 }
 0x2b0   :  { %v1832_v17 = vpop.permute.xlu1 %1831  ;;  %5376 = vmatprep.subr.bf16.mxu0 %v7151_v30  ;;  %v4412_v58 = vsel %vm1722_vm1, 1.0, %v7606_v56 }
 0x2b1   :  { %vm1866_vm14 = vcmp.eq.s32.totalorder %v5893_v42, %v1832_v17  ;;  %5378 = vmatpush3.bf16.msra.mxu0 %v7151_v30 }
 0x2b2   :  { %vm5343_vm15 = vmpackc.low %vm1867_vm5, %vm1866_vm14  ;;  %5380 = vmatprep.subr.bf16.mxu0 %v7153_v21  ;;  %vm1262_vm5 = vcmp.gt.f32.partialorder %v7074_v18, 0.0 }
 0x2b3   :  { %5344 = vmatprep.subr.msk.bf16.mxu1 %vm5343_vm15, %v7586_v27  ;;  %v1274_v4 = vsel %vm1262_vm5, %v5551_v28, 0.0  ;;  %vm1263_vm15 = vcmp.gt.f32.partialorder %v7080_v20, 0.0 }
 0x2b4   :  { %v1784_v57 = vpop.permute.xlu1 %1783  ;;  %5006 = vmatmul.mubr.msk.f32.vlgmr.msra.gmra.mrb[32].mxu0 %vm535_vm3, %v7621_v41  ;;  %v5506_v41 = vld [vmem:[%s7547_s5 + $0x40] sm:$0xff]  }
 0x2b5   :  { %vm1850_vm12 = vcmp.eq.s32.totalorder %v5893_v42, %v1784_v57  ;;  %5008 = vmatprep.mubr.msk.f32.mxu0 %vm535_vm3, %v7622_v26  ;;  %5382 = vmatpush3.bf16.msra.mxu0 %v7153_v21  ;;  %v5501_v42 = vld [vmem:[%s7547_s5 + $0x18] sm:$0xff]   ;;  %v5505_v57 = vld [vmem:[%s7547_s5 + $0x28] sm:$0xff]  }
 0x2b6   :  { %vm5345_vm0 = vmpackc.low %vm1851_vm7, %vm1850_vm12  ;;  %5384 = vmatprep.subr.bf16.mxu0 %v7167_v3  ;;  %vm1264_vm7 = vcmp.gt.f32.partialorder %v7076_v14, 0.0  ;;  %vm1265_vm12 = vcmp.gt.f32.partialorder %v7078_v15, 0.0  ;;  %v5507_v26 = vld [vmem:[%s7547_s5 + $0x48] sm:$0xff]  }
 0x2b7   :  { %5346 = vmatpush3.bf16.msk.msra.mxu1 %vm5345_vm0, %v7586_v27  ;;  %v1261_v27 = vadd.f32 %v1260_v16, %v1259_v34  ;;  %v7628_v34 = vld [vmem:[#allocation14_spill] sm:$0xff]  ;;  %v4406_v16 = vsel %vm1716_vm11, 1.0, %v7606_v56 }
 0x2b8   :  { %5009 = vmatmul.mubr.msk.f32.gmra.mrb[34].mxu0 %vm535_vm3, %v7623_v2  ;;  %4965 = vmatprep.subr.bf16.mxu1 %v5500_v13 }
 0x2b9   :  { %5011 = vmatprep.mubr.msk.f32.mxu0 %vm535_vm3, %v7624_v62  ;;  %5386 = vmatpush3.bf16.msra.mxu0 %v7167_v3  ;;  %v1279_v33 = vmax.f32 %v1261_v27, 1e-12  ;;  %vm1278_vm14 = vcmp.gt.f32.partialorder %v1261_v27, 0.0  ;;  %v4408_v62 = vsel %vm1718_vm4, 1.0, %v7606_v56 }
 0x2ba   :  { %4479 = vmatmul.mubr.msk.f32.vlgmr.msra.gmra.mrb[8].mxu1 %vm1716_vm11, %v7592_v6  ;;  %5043 = vmatprep.subr.bf16.mxu0 %v5506_v41 }
 0x2bb   :  { %4480 = vmatprep.mubr.msk.f32.mxu1 %vm1719_vm13, %v7592_v6  ;;  %4966 = vmatpush3.bf16.msra.mxu1 %v5500_v13  ;;  %5552 = vrsqrt.f32 %v1279_v33  ;;  %v4407_v13 = vsel %vm1717_vm2, 1.0, %v7606_v56 }
 0x2bc   :  { %5012 = vmatmul.mubr.msk.f32.gmra.mrb[36].mxu0 %vm535_vm3, %v6848_v63  ;;  %4967 = vmatprep.subr.bf16.mxu1 %v5501_v42  ;;  %v1267_v63 = vmax.f32 %v7080_v20, 1e-12  ;;  %v7625_v20 = vld [vmem:[#allocation12_spill] sm:$0xff]  ;;  %v2017_v2 = vadd.f32 %v4407_v13, %v4406_v16 }
 0x2bd   :  { %5014 = vmatprep.mubr.msk.f32.mxu0 %vm535_vm3, %v6851_v59  ;;  %v1268_v59 = vmax.f32 %v7076_v14, 1e-12 }
 0x2be   :  { %4481 = vmatmul.mubr.msk.f32.gmra.mrb[10].mxu1 %vm1718_vm4, %v7592_v6  ;;  %5554 = vrsqrt.f32 %v1267_v63  ;;  %2018 = vadd.xlane.f32.xlu1 %v2017_v2  ;;  %v2026_v63 = vadd.f32 %v4413_v8, %v4412_v58 }
 0x2bf   :  { %4482 = vmatprep.mubr.msk.f32.mxu1 %vm1721_vm9, %v7592_v6  ;;  %4968 = vmatpush3.bf16.msra.mxu1 %v5501_v42  ;;  %5556 = vrsqrt.f32 %v1268_v59  ;;  %v4409_v42 = vsel %vm1719_vm13, 1.0, %v7606_v56 }
 0x2c0   :  { %5015 = vmatmul.mubr.msk.f32.gmra.mrb[38].mxu0 %vm535_vm3, %v6864_v49  ;;  %4977 = vmatprep.subr.bf16.mxu1 %v5502_v11  ;;  %v5503_v49 = vld [vmem:[%s7547_s5 + $0x8] sm:$0xff]   ;;  %5558 = vrsqrt.f32 %v1269_v35  ;;  %v2020_v27 = vadd.f32 %v4409_v42, %v4408_v62 }
 0x2c2   :  { %4483 = vmatmul.mubr.msk.f32.gmra.mrb[12].mxu1 %vm1720_vm8, %v7592_v6  ;;  %2021 = vadd.xlane.f32.xlu0 %v2020_v27 }
 0x2c3   :  { %4484 = vmatprep.mubr.msk.f32.mxu1 %vm1723_vm6, %v7592_v6  ;;  %2027 = vadd.xlane.f32.xlu1 %v2026_v63 }
 0x2c6   :  { %4485 = vmatmul.mubr.msk.f32.gmra.mrb[14].mxu1 %vm1722_vm1, %v7592_v6 }
 0x2c7   :  { %4969 = vmatprep.mubr.msk.bf16.mxu1 %vm1192_vm10, %v7097_v54  ;;  %v5553_v54 = vpop.eup %5552 }
 0x2c8   :  { %v5555_v43 = vpop.eup %5554  ;;  %v1281_v9 = vsel %vm1278_vm14, %v5553_v54, 0.0 }
 0x2c9   :  { %v1275_v51 = vsel %vm1263_vm15, %v5555_v43, 0.0  ;;  %v5557_v46 = vpop.eup %5556 }
 0x2ca   :  { %4970 = vmatmul.mubr.msk.bf16.vlgmr.msra.gmra.mrb[16].mxu1 %vm1192_vm10, %v7103_v1  ;;  %v1276_v60 = vsel %vm1264_vm7, %v5557_v46, 0.0  ;;  %v5559_v47 = vpop.eup %5558 }
 0x2cb   :  { %v4687_v48 = vpop.f32.mrb[0].mxu1  ;;  %4973 = vmatprep.mubr.msk.bf16.mxu1 %vm1192_vm10, %v7137_v12  ;;  %4978 = vmatpush3.bf16.msra.mxu1 %v5502_v11  ;;  %v1277_v39 = vsel %vm1265_vm12, %v5559_v47, 0.0  ;;  %v4410_v11 = vsel %vm1720_vm8, 1.0, %v7606_v56 }
 0x2cc   :  { %v4688_v6 = vpop.f32.mrb[1].mxu1  ;;  %4979 = vmatprep.subr.bf16.mxu1 %v5503_v49  ;;  %v2023_v33 = vadd.f32 %v4411_v32, %v4410_v11 }
 0x2cd   :  { %v4689_v10 = vadd.f32 %v4688_v6, %v4687_v48 }
 0x2ce   :  { %2024 = vadd.xlane.f32.xlu0 %v2023_v33 }
 0x2cf   :  { %v1367_v50 = vmul.f32 %v4689_v10, %v1274_v4  ;;  %v4690_v1 = vpop.f32.mrb[2].mxu1  ;;  %4980 = vmatpush3.bf16.msra.mxu1 %v5503_v49 }
 0x2d0   :  { %v4691_v18 = vpop.f32.mrb[3].mxu1  ;;  %5017 = vmatprep.subr.bf16.mxu1 %v5504_v53 }
 0x2d1   :  { %v7260_v7 = vmul.f32 %v1367_v50, %v1281_v9  ;;  %v4692_v19 = vadd.f32 %v4691_v18, %v4690_v1 }
 0x2d2   :  { %4974 = vmatmul.mubr.msk.bf16.gmra.mrb[20].mxu1 %vm1192_vm10, %v7151_v30 }
 0x2d3   :  { %v1368_v44 = vmul.f32 %v4692_v19, %v1275_v51  ;;  %v4693_v12 = vpop.f32.mrb[4].mxu1  ;;  %5037 = vmatprep.mubr.msk.f32.mxu0 %vm1192_vm10, %v7260_v7  ;;  %4981 = vmatprep.mubr.msk.bf16.mxu1 %vm1192_vm10, %v7625_v20 }
 0x2d4   :  { %v4694_v5 = vpop.f32.mrb[5].mxu1 }
 0x2d5   :  { %v7269_v38 = vmul.f32 %v1368_v44, %v1281_v9  ;;  %v4695_v36 = vadd.f32 %v4694_v5, %v4693_v12 }
 0x2d7   :  { %v1369_v29 = vmul.f32 %v4695_v36, %v1276_v60  ;;  %v4696_v40 = vpop.f32.mrb[6].mxu1  ;;  %5038 = vmatmul.mubr.msk.f32.vlgmr.msra.gmra.mrb[40].mxu0 %vm1192_vm10, %v7269_v38 }
 0x2d8   :  { %v4697_v14 = vpop.f32.mrb[7].mxu1  ;;  %5044 = vmatpush3.bf16.msra.mxu0 %v5506_v41 }
 0x2d9   :  { %v7274_v30 = vmul.f32 %v1369_v29, %v1281_v9  ;;  %v4698_v31 = vadd.f32 %v4697_v14, %v4696_v40  ;;  %5045 = vmatprep.subr.bf16.mxu0 %v5507_v26  ;;  %v5508_v40 = vld [vmem:[%s7547_s5 + $0x30] sm:$0xff]  }
 0x2da   :  { %4982 = vmatmul.mubr.msk.bf16.vlgmr.msra.gmra.mrb[16].mxu1 %vm1192_vm10, %v7626_v37  ;;  %v5510_v14 = vld [vmem:[%s7547_s5 + $0x50] sm:$0xff]  }
 0x2db   :  { %v1370_v17 = vmul.f32 %v4698_v31, %v1277_v39  ;;  %5040 = vmatprep.mubr.msk.f32.mxu0 %vm1192_vm10, %v7274_v30  ;;  %4985 = vmatprep.mubr.msk.bf16.mxu1 %vm1192_vm10, %v7627_v45  ;;  %v5512_v31 = vld [vmem:[%s7547_s5 + $0x60] sm:$0xff]  }
 0x2dc   :  { %5018 = vmatpush3.bf16.msra.mxu1 %v5504_v53  ;;  %5046 = vmatpush3.bf16.msra.mxu0 %v5507_v26  ;;  %v4520_v39 = vld [vmem:[%s7549_s6] ss:$0 sm:$0xff] }
 0x2dd   :  { %v7282_v15 = vmul.f32 %v1370_v17, %v1281_v9  ;;  %5019 = vmatprep.subr.bf16.mxu1 %v5505_v57  ;;  %5051 = vmatprep.subr.bf16.mxu0 %v5508_v40 }
 0x2df   :  { %5041 = vmatmul.mubr.msk.f32.gmra.mrb[42].mxu0 %vm1192_vm10, %v7282_v15 }
 0x2e0   :  { %5020 = vmatpush3.bf16.msra.mxu1 %v5505_v57 }
 0x2e2   :  { %4986 = vmatmul.mubr.msk.bf16.gmra.mrb[20].mxu1 %vm1192_vm10, %v7628_v34 }
 0x387   :  { %v5007_v59 = vpop.f32.mrb[32].mxu0 }
 0x388   :  { %v2443_v49 = vpop.f32.mrb[33].mxu0 }
 0x389   :  { %v2486_v35 = vpack.c.bf16 %v5007_v59, %v2443_v49 }
 0x38b   :  { %v5010_v55 = vpop.f32.mrb[34].mxu0  ;;  %5021 = vmatprep.mubr.msk.bf16.mxu1 %vm1192_vm10, %v2486_v35 }
 0x38c   :  { %v2453_v28 = vpop.f32.mrb[35].mxu0 }
 0x38d   :  { %v2487_v48 = vpack.c.bf16 %v5010_v55, %v2453_v28  ;;  %v4775_v6 = vpop.f32.mrb[8].mxu1 }
 0x38e   :  { %v4776_v24 = vpop.f32.mrb[9].mxu1 }
 0x38f   :  { %v5013_v54 = vpop.f32.mrb[36].mxu0  ;;  %5022 = vmatmul.mubr.msk.bf16.vlgmr.msra.gmra.mrb[16].mxu1 %vm1192_vm10, %v2487_v48  ;;  %v7334_v10 = vadd.f32 %v4776_v24, %v4775_v6 }
 0x390   :  { %v2463_v0 = vpop.f32.mrb[37].mxu0 }
 0x391   :  { %v2488_v56 = vpack.c.bf16 %v5013_v54, %v2463_v0  ;;  %v4778_v52 = vpop.f32.mrb[10].mxu1 }
 0x392   :  { %v4779_v4 = vpop.f32.mrb[11].mxu1 }
 0x393   :  { %v5016_v43 = vpop.f32.mrb[38].mxu0  ;;  %5025 = vmatprep.mubr.msk.bf16.mxu1 %vm1192_vm10, %v2488_v56  ;;  %v7337_v50 = vadd.f32 %v4779_v4, %v4778_v52 }
 0x394   :  { %v2473_v1 = vpop.f32.mrb[39].mxu0 }
 0x395   :  { %v2489_v9 = vpack.c.bf16 %v5016_v43, %v2473_v1  ;;  %v4781_v18 = vpop.f32.mrb[12].mxu1  ;;  %v5513_v43 = vld [vmem:[%s7547_s5 + $0x68] sm:$0xff]  }
 0x396   :  { %v4782_v19 = vpop.f32.mrb[13].mxu1 }
 0x397   :  { %5026 = vmatmul.mubr.msk.bf16.gmra.mrb[20].mxu1 %vm1192_vm10, %v2489_v9  ;;  %v7340_v51 = vadd.f32 %v4782_v19, %v4781_v18 }
 0x398   :  { %5067 = vmatprep.mubr.msk.f32.mxu1 %vm1192_vm10, %v7260_v7 }
 0x399   :  { %v4784_v46 = vpop.f32.mrb[14].mxu1 }
 0x39a   :  { %v4785_v44 = vpop.f32.mrb[15].mxu1 }
 0x39b   :  { %v7344_v12 = vadd.f32 %v4785_v44, %v4784_v46 }
 0x3aa   :  { %v5039_v20 = vpop.f32.mrb[40].mxu0 }
 0x3ab   :  { %v2696_v5 = vpop.f32.mrb[41].mxu0 }
 0x3ac   :  { %v2719_v36 = vpack.c.bf16 %v5039_v20, %v2696_v5 }
 0x3ae   :  { %5047 = vmatprep.mubr.msk.bf16.mxu0 %vm1192_vm10, %v2719_v36  ;;  %5388 = vmatprep.subr.bf16.mxu1 %v2719_v36 }
 0x3af   :  { %5390 = vmatpush3.bf16.msra.mxu1 %v2719_v36 }
 0x3b2   :  { %v5042_v60 = vpop.f32.mrb[42].mxu0 }
 0x3b3   :  { %v2706_v47 = vpop.f32.mrb[43].mxu0 }
 0x3b4   :  { %v2720_v29 = vpack.c.bf16 %v5042_v60, %v2706_v47 }
 0x3b6   :  { %5048 = vmatmul.mubr.msk.bf16.vlgmr.msra.gmra.mrb[44].mxu0 %vm1192_vm10, %v2720_v29  ;;  %5392 = vmatprep.subr.bf16.mxu1 %v2720_v29 }
 0x3b7   :  { %5394 = vmatpush3.bf16.msra.mxu1 %v2720_v29  ;;  %5055 = vmatprep.mubr.msk.bf16.mxu0 %vm1192_vm10, %v7153_v21  ;;  %v5509_v21 = vld [vmem:[%s7547_s5 + $0x38] sm:$0xff]  }
 0x3b8   :  { %5052 = vmatpush3.bf16.msra.mxu0 %v5508_v40 }
 0x3b9   :  { %5053 = vmatprep.subr.bf16.mxu0 %v5509_v21 }
 0x3ba   :  { %5068 = vmatmul.mubr.msk.f32.vlgmr.msra.gmra.mrb[24].mxu1 %vm1192_vm10, %v7269_v38 }
 0x3bb   :  { %5070 = vmatprep.mubr.msk.f32.mxu1 %vm1192_vm10, %v7274_v30 }
 0x3bc   :  { %5054 = vmatpush3.bf16.msra.mxu0 %v5509_v21 }
 0x3bd   :  { %5073 = vmatprep.subr.bf16.mxu0 %v5510_v14 }
 0x3be   :  { %5071 = vmatmul.mubr.msk.f32.gmra.mrb[26].mxu1 %vm1192_vm10, %v7282_v15 }
 0x3bf   :  { %5089 = vmatprep.mubr.msk.f32.mxu1 %vm1192_vm10, %v7260_v7  ;;  %v5511_v7 = vld [vmem:[%s7547_s5 + $0x58] sm:$0xff]  }
 0x3c2   :  { %5056 = vmatmul.mubr.msk.bf16.vlgmr.msra.gmra.mrb[44].mxu0 %vm1192_vm10, %v7167_v3 }
 0x3c3   :  { %5074 = vmatpush3.bf16.msra.mxu0 %v5510_v14 }
 0x3c4   :  { %5075 = vmatprep.subr.bf16.mxu0 %v5511_v7 }
 0x3c7   :  { %5076 = vmatpush3.bf16.msra.mxu0 %v5511_v7 }
 0x3c8   :  { %5095 = vmatprep.subr.bf16.mxu0 %v5512_v31 }
 0x462   :  { %v5023_v37 = vpop.f32.mrb[16].mxu1 }
 0x463   :  { %v2593_v17 = vadd.f32 %v5023_v37, %v4520_v39  ;;  %v2548_v45 = vpop.f32.mrb[17].mxu1 }
 0x464   :  { %v2591_v3 = vadd.f32 %v4520_v39, %v2548_v45  ;;  %v5024_v34 = vpop.f32.mrb[18].mxu1  ;;  %v5514_v45 = vld [vmem:[%s7547_s5 + $0x80] sm:$0xff]  }
 0x465   :  { %v2594_v53 = vadd.f32 %v5024_v34, %v4520_v39  ;;  %v2551_v57 = vpop.f32.mrb[19].mxu1  ;;  %v2601_v13 = vmax.f32 %v2593_v17, 0.0 }
 0x466   :  { %v2592_v41 = vadd.f32 %v4520_v39, %v2551_v57  ;;  %v2599_v16 = vmax.f32 %v2591_v3, 0.0 }
 0x467   :  { %v2602_v26 = vmax.f32 %v2594_v53, 0.0 }
 0x468   :  { %v2600_v2 = vmax.f32 %v2592_v41, 0.0 }
 0x469   :  { %v7378_v42 = vpack.c.bf16 %v2602_v26, %v2601_v13 }
 0x46a   :  { %v7380_v62 = vpack.c.bf16 %v2600_v2, %v2599_v16  ;;  %v5027_v27 = vpop.f32.mrb[20].mxu1 }
 0x46b   :  { %v2597_v32 = vadd.f32 %v5027_v27, %v4520_v39  ;;  %v2564_v11 = vpop.f32.mrb[21].mxu1 }
 0x46c   :  { %v2595_v8 = vadd.f32 %v4520_v39, %v2564_v11  ;;  %v5028_v58 = vpop.f32.mrb[22].mxu1 }
 0x46d   :  { %v2598_v33 = vadd.f32 %v5028_v58, %v4520_v39  ;;  %v2567_v63 = vpop.f32.mrb[23].mxu1  ;;  %v2605_v49 = vmax.f32 %v2597_v32, 0.0 }
 0x46e   :  { %v2596_v59 = vadd.f32 %v4520_v39, %v2567_v63  ;;  %v2603_v55 = vmax.f32 %v2595_v8, 0.0  ;;  %v5517_v8 = vld [vmem:[%s7547_s5 + $0x78] sm:$0xff]  }
 0x46f   :  { %v2606_v35 = vmax.f32 %v2598_v33, 0.0 }
 0x470   :  { %v2604_v28 = vmax.f32 %v2596_v59, 0.0 }
 0x471   :  { %v7382_v48 = vpack.c.bf16 %v2606_v35, %v2605_v49 }
 0x472   :  { %v5411_v6 = vpack.c.bf16 %v2604_v28, %v2603_v55  ;;  %v5518_v55 = vld [vmem:[%s7547_s5 + $0xa0] sm:$0xff]   ;;  %v5519_v28 = vld [vmem:[%s7547_s5 + $0xa8] sm:$0xff]  }
 0x48d   :  { %v5069_v24 = vpop.f32.mrb[24].mxu1 }
 0x48e   :  { %v2921_v54 = vpop.f32.mrb[25].mxu1 }
 0x48f   :  { %v2944_v0 = vpack.c.bf16 %v5069_v24, %v2921_v54 }
 0x491   :  { %v5072_v56 = vpop.f32.mrb[26].mxu1  ;;  %5077 = vmatprep.mubr.msk.bf16.mxu0 %vm1192_vm10, %v2944_v0  ;;  %5396 = vmatprep.subr.bf16.mxu1 %v2944_v0 }
 0x492   :  { %v2931_v52 = vpop.f32.mrb[27].mxu1  ;;  %5398 = vmatpush3.bf16.msra.mxu1 %v2944_v0 }
 0x493   :  { %v2945_v4 = vpack.c.bf16 %v5072_v56, %v2931_v52 }
 0x495   :  { %5078 = vmatmul.mubr.msk.bf16.vlgmr.msra.gmra.mrb[44].mxu0 %vm1192_vm10, %v2945_v4  ;;  %5400 = vmatprep.subr.bf16.mxu1 %v2945_v4 }
 0x496   :  { %5096 = vmatpush3.bf16.msra.mxu0 %v5512_v31  ;;  %5402 = vmatpush3.bf16.msra.mxu1 %v2945_v4 }
 0x497   :  { %5404 = vmatprep.subr.bf16.mxu1 %v7380_v62  ;;  %5097 = vmatprep.subr.bf16.mxu0 %v5513_v43 }
 0x499   :  { %5090 = vmatmul.mubr.msk.f32.vlgmr.msra.gmra.mrb[28].mxu1 %vm1192_vm10, %v7269_v38  ;;  %v2019_v38 = vpop.xlane.xlu1 %2018 }
 0x49a   :  { %5098 = vmatpush3.bf16.msra.mxu0 %v5513_v43  ;;  %5092 = vmatprep.mubr.msk.f32.mxu1 %vm1192_vm10, %v7274_v30  ;;  %v2029_v30 = vmax.f32 %v2019_v38, 1.0 }
 0x49b   :  { %5406 = vmatpush3.bf16.msra.mxu1 %v7380_v62  ;;  %5420 = vmatprep.subr.bf16.mxu0 %v7380_v62 }
 0x49c   :  { %5408 = vmatprep.subr.bf16.mxu1 %v7378_v42  ;;  %5560 = vrcp.f32 %v2029_v30 }
 0x49d   :  { %5093 = vmatmul.mubr.msk.f32.gmra.mrb[30].mxu1 %vm1192_vm10, %v7282_v15  ;;  %v2028_v5 = vpop.xlane.xlu1 %2027 }
 0x49e   :  { %5119 = vmatprep.mubr.msk.f32.mxu1 %vm535_vm3, %v7083_v25  ;;  %v2022_v25 = vpop.xlane.xlu0 %2021 }
 0x49f   :  { %5410 = vmatpush3.bf16.msra.mxu1 %v7378_v42  ;;  %v2030_v44 = vmax.f32 %v2022_v25, 1.0 }
 0x4a0   :  { %5412 = vmatprep.subr.bf16.mxu1 %v5411_v6 }
 0x4a1   :  { %5562 = vrcp.f32 %v2030_v44  ;;  %v5523_v44 = vld [vmem:[%s7547_s5 + $0xc8] sm:$0xff]  }
 0x4a2   :  { %v2025_v18 = vpop.xlane.xlu0 %2024 }
 0x4a3   :  { %5414 = vmatpush3.bf16.msra.mxu1 %v5411_v6  ;;  %v2031_v20 = vmax.f32 %v2025_v18, 1.0 }
 0x4a4   :  { %5416 = vmatprep.subr.bf16.mxu1 %v7382_v48 }
 0x4a5   :  { %5564 = vrcp.f32 %v2031_v20  ;;  %v4575_v20 = vld [vmem:[%s7549_s6 + $0x3] ss:$0 sm:$0xff] }
 0x4a6   :  { %v5561_v19 = vpop.eup %5560 }
 0x4a7   :  { %5418 = vmatpush3.bf16.msra.mxu1 %v7382_v48  ;;  %v2041_v36 = vmul.f32 %v5561_v19, %v7334_v10  ;;  %v5521_v19 = vld [vmem:[%s7547_s5 + $0x98] sm:$0xff]  }
 0x4a8   :  { %5147 = vmatprep.subr.bf16.mxu1 %v5514_v45 }
 0x4aa   :  { %5120 = vmatmul.mubr.msk.f32.vlgmr.msra.gmra.mrb[32].mxu1 %vm535_vm3, %v7087_v22 }
 0x4ab   :  { %5122 = vmatprep.mubr.msk.f32.mxu1 %vm535_vm3, %v7090_v23  ;;  %v5563_v10 = vpop.eup %5562  ;;  %5148 = vmatpush3.bf16.msra.mxu1 %v5514_v45  ;;  %v5527_v45 = vld [vmem:[%s7547_s5 + $0xe8] sm:$0xff]  }
 0x4ac   :  { %v2042_v14 = vmul.f32 %v5563_v10, %v7337_v50  ;;  %v5515_v50 = vld [vmem:[%s7547_s5 + $0x88] sm:$0xff]  }
 0x4ad   :  { %5149 = vmatprep.subr.bf16.mxu1 %v5515_v50 }
 0x4ae   :  { %5123 = vmatmul.mubr.msk.f32.gmra.mrb[34].mxu1 %vm535_vm3, %v7094_v61  ;;  %v2032_v61 = vmax.f32 %v2028_v5, 1.0 }
 0x4af   :  { %v5565_v40 = vpop.eup %5564  ;;  %5150 = vmatpush3.bf16.msra.mxu1 %v5515_v50  ;;  %v5528_v50 = vld [vmem:[%s7547_s5 + $0xd0] sm:$0xff]  }
 0x4b0   :  { %5566 = vrcp.f32 %v2032_v61  ;;  %v2043_v39 = vmul.f32 %v5565_v40, %v7340_v51  ;;  %v5516_v51 = vld [vmem:[%s7547_s5 + $0x70] sm:$0xff]  }
 0x4b1   :  { %5155 = vmatprep.subr.bf16.mxu1 %v5516_v51 }
 0x4ba   :  { %v5567_v31 = vpop.eup %5566 }
 0x4bb   :  { %v2044_v17 = vmul.f32 %v5567_v31, %v7344_v12  ;;  %v4549_v12 = vld [vmem:[%s7549_s6 + $0x1] ss:$0 sm:$0xff] }
 0x56c   :  { %v5091_v15 = vpop.f32.mrb[28].mxu1 }
 0x56d   :  { %v3083_v1 = vpop.f32.mrb[29].mxu1 }
 0x56e   :  { %v3106_v9 = vpack.c.bf16 %v5091_v15, %v3083_v1 }
 0x570   :  { %v5094_v46 = vpop.f32.mrb[30].mxu1  ;;  %5099 = vmatprep.mubr.msk.bf16.mxu0 %vm1192_vm10, %v3106_v9 }
 0x571   :  { %v3093_v22 = vpop.f32.mrb[31].mxu1 }
 0x572   :  { %v3107_v23 = vpack.c.bf16 %v5094_v46, %v3093_v22  ;;  %v5522_v46 = vld [vmem:[%s7547_s5 + $0xc0] sm:$0xff]   ;;  %v5524_v22 = vld [vmem:[%s7547_s5 + $0xb0] sm:$0xff]  }
 0x574   :  { %5100 = vmatmul.mubr.msk.bf16.vlgmr.msra.gmra.mrb[44].mxu0 %vm1192_vm10, %v3107_v23 }
 0x575   :  { %5422 = vmatpush3.bf16.msra.mxu0 %v7380_v62  ;;  %5141 = vmatprep.mubr.msk.f32.mxu0 %vm535_vm3, %v2041_v36 }
 0x576   :  { %5424 = vmatprep.subr.bf16.mxu0 %v7378_v42 }
 0x579   :  { %5426 = vmatpush3.bf16.msra.mxu0 %v7378_v42 }
 0x57a   :  { %5428 = vmatprep.subr.bf16.mxu0 %v5411_v6 }
 0x57d   :  { %v5121_v60 = vpop.f32.mrb[32].mxu1  ;;  %5430 = vmatpush3.bf16.msra.mxu0 %v5411_v6  ;;  %v4566_v6 = vld [vmem:[%s7549_s6 + $0x2] ss:$0 sm:$0xff] }
 0x57e   :  { %v3269_v47 = vpop.f32.mrb[33].mxu1  ;;  %5432 = vmatprep.subr.bf16.mxu0 %v7382_v48 }
 0x57f   :  { %v7418_v29 = vpack.c.bf16 %v5121_v60, %v3269_v47 }
 0x581   :  { %v5124_v21 = vpop.f32.mrb[34].mxu1  ;;  %5434 = vmatpush3.bf16.msra.mxu0 %v7382_v48  ;;  %v5520_v48 = vld [vmem:[%s7547_s5 + $0x90] sm:$0xff]  }
 0x582   :  { %v3279_v7 = vpop.f32.mrb[35].mxu1  ;;  %5163 = vmatprep.subr.bf16.mxu0 %v5518_v55 }
 0x583   :  { %v7423_v37 = vpack.c.bf16 %v5124_v21, %v3279_v7 }
 0x584   :  { %5142 = vmatmul.mubr.msk.f32.vlgmr.msra.gmra.mrb[48].mxu0 %vm535_vm3, %v2042_v14 }
 0x585   :  { %5144 = vmatprep.mubr.msk.f32.mxu0 %vm535_vm3, %v2043_v39  ;;  %5164 = vmatpush3.bf16.msra.mxu0 %v5518_v55 }
 0x586   :  { %5165 = vmatprep.subr.bf16.mxu0 %v5519_v28 }
 0x588   :  { %5145 = vmatmul.mubr.msk.f32.gmra.mrb[50].mxu0 %vm535_vm3, %v2044_v17  ;;  %v5526_v17 = vld [vmem:[%s7547_s5 + $0xe0] sm:$0xff]  }
 0x589   :  { %5166 = vmatpush3.bf16.msra.mxu0 %v5519_v28 }
 0x58a   :  { %5171 = vmatprep.subr.bf16.mxu0 %v5520_v48 }
 0x647   :  { %v5101_v3 = vpop.f32.mrb[44].mxu0 }
 0x648   :  { %v3185_v34 = vadd.f32 %v5101_v3, %v4549_v12  ;;  %v3160_v53 = vpop.f32.mrb[45].mxu0 }
 0x649   :  { %v3183_v57 = vadd.f32 %v4549_v12, %v3160_v53  ;;  %v5102_v41 = vpop.f32.mrb[46].mxu0 }
 0x64a   :  { %v3186_v13 = vadd.f32 %v5102_v41, %v4549_v12  ;;  %v3163_v26 = vpop.f32.mrb[47].mxu0  ;;  %v3189_v2 = vmax.f32 %v3185_v34, 0.0 }
 0x64b   :  { %v3184_v16 = vadd.f32 %v4549_v12, %v3163_v26  ;;  %v3187_v62 = vmax.f32 %v3183_v57, 0.0 }
 0x64c   :  { %v3190_v42 = vmax.f32 %v3186_v13, 0.0 }
 0x64d   :  { %v3188_v27 = vmax.f32 %v3184_v16, 0.0 }
 0x64e   :  { %v3397_v32 = vpack.c.bf16 %v3190_v42, %v3189_v2 }
 0x64f   :  { %v3396_v11 = vpack.c.bf16 %v3188_v27, %v3187_v62 }
 0x651   :  { %5151 = vmatprep.mubr.msk.bf16.mxu1 %vm1192_vm10, %v3396_v11  ;;  %v5529_v11 = vld [vmem:[%s7547_s5 + $0xd8] sm:$0xff]  }
 0x652   :  { %5152 = vmatmul.mubr.msk.bf16.vlgmr.msra.gmra.mrb[36].mxu1 %vm1192_vm10, %v3397_v32 }
 0x653   :  { %5159 = vmatprep.mubr.msk.bf16.mxu1 %vm1192_vm10, %v7418_v29  ;;  %5156 = vmatpush3.bf16.msra.mxu1 %v5516_v51  ;;  %v4584_v51 = vld [vmem:[%s7549_s6 + $0x4] ss:$0 sm:$0xff] }
 0x654   :  { %5157 = vmatprep.subr.bf16.mxu1 %v5517_v8 }
 0x657   :  { %v5143_v58 = vpop.f32.mrb[48].mxu0  ;;  %5158 = vmatpush3.bf16.msra.mxu1 %v5517_v8  ;;  %v5530_v8 = vld [vmem:[%s7547_s5 + $0xf0] sm:$0xff]  }
 0x658   :  { %v3366_v33 = vpop.f32.mrb[49].mxu0  ;;  %5179 = vmatprep.subr.bf16.mxu1 %v5522_v46 }
 0x659   :  { %v7448_v63 = vpack.c.bf16 %v5143_v58, %v3366_v33  ;;  %v5531_v58 = vld [vmem:[%s7547_s5 + $0xf8] sm:$0xff]   ;;  %v4593_v33 = vld [vmem:[%s7549_s6 + $0x5] ss:$0 sm:$0xff] }
 0x65b   :  { %v5146_v59 = vpop.f32.mrb[50].mxu0 }
 0x65c   :  { %v3376_v49 = vpop.f32.mrb[51].mxu0 }
 0x65d   :  { %v7450_v35 = vpack.c.bf16 %v5146_v59, %v3376_v49 }
 0x65e   :  { %5160 = vmatmul.mubr.msk.bf16.vlgmr.msra.gmra.mrb[36].mxu1 %vm1192_vm10, %v7423_v37 }
 0x65f   :  { %5180 = vmatpush3.bf16.msra.mxu1 %v5522_v46 }
 0x660   :  { %5181 = vmatprep.subr.bf16.mxu1 %v5523_v44 }
 0x663   :  { %5182 = vmatpush3.bf16.msra.mxu1 %v5523_v44 }
 0x664   :  { %5187 = vmatprep.subr.bf16.mxu1 %v5524_v22 }
 0x731   :  { %v5161_v24 = vpop.f32.mrb[36].mxu1 }
 0x732   :  { %v3538_v54 = vadd.f32 %v5161_v24, %v4566_v6  ;;  %v3517_v0 = vpop.f32.mrb[37].mxu1 }
 0x733   :  { %v3536_v56 = vadd.f32 %v4566_v6, %v3517_v0  ;;  %v5162_v52 = vpop.f32.mrb[38].mxu1 }
 0x734   :  { %v3539_v4 = vadd.f32 %v5162_v52, %v4566_v6  ;;  %v3520_v43 = vpop.f32.mrb[39].mxu1  ;;  %v3542_v30 = vmax.f32 %v3538_v54, 0.0 }
 0x735   :  { %v3537_v38 = vadd.f32 %v4566_v6, %v3520_v43  ;;  %v3540_v15 = vmax.f32 %v3536_v56, 0.0  ;;  %v4594_v43 = vld [vmem:[%s7549_s6 + $0x6] ss:$0 sm:$0xff] }
 0x736   :  { %v3543_v25 = vmax.f32 %v3539_v4, 0.0 }
 0x737   :  { %v3541_v1 = vmax.f32 %v3537_v38, 0.0 }
 0x738   :  { %v3554_v9 = vpack.c.bf16 %v3543_v25, %v3542_v30 }
 0x739   :  { %v3553_v18 = vpack.c.bf16 %v3541_v1, %v3540_v15 }
 0x73b   :  { %5167 = vmatprep.mubr.msk.bf16.mxu0 %vm1192_vm10, %v3553_v18 }
 0x73c   :  { %5168 = vmatmul.mubr.msk.bf16.vlgmr.msra.gmra.mrb[52].mxu0 %vm1192_vm10, %v3554_v9 }
 0x73d   :  { %5175 = vmatprep.mubr.msk.bf16.mxu0 %vm1192_vm10, %v7418_v29  ;;  %5172 = vmatpush3.bf16.msra.mxu0 %v5520_v48 }
 0x73e   :  { %5173 = vmatprep.subr.bf16.mxu0 %v5521_v19 }
 0x741   :  { %5174 = vmatpush3.bf16.msra.mxu0 %v5521_v19 }
 0x742   :  { %5195 = vmatprep.subr.bf16.mxu0 %v5526_v17 }
 0x748   :  { %5176 = vmatmul.mubr.msk.bf16.vlgmr.msra.gmra.mrb[52].mxu0 %vm1192_vm10, %v7423_v37  ;;  %v5525_v37 = vld [vmem:[%s7547_s5 + $0xb8] sm:$0xff]  }
 0x749   :  { %5196 = vmatpush3.bf16.msra.mxu0 %v5526_v17 }
 0x74a   :  { %5197 = vmatprep.subr.bf16.mxu0 %v5527_v45 }
 0x74d   :  { %5198 = vmatpush3.bf16.msra.mxu0 %v5527_v45 }
 0x74e   :  { %5203 = vmatprep.subr.bf16.mxu0 %v5528_v50 }
 0x81b   :  { %v5177_v5 = vpop.f32.mrb[52].mxu0 }
 0x81c   :  { %v3689_v23 = vadd.f32 %v5177_v5, %v4575_v20  ;;  %v3668_v36 = vpop.f32.mrb[53].mxu0 }
 0x81d   :  { %v3687_v61 = vadd.f32 %v4575_v20, %v3668_v36  ;;  %v5178_v60 = vpop.f32.mrb[54].mxu0 }
 0x81e   :  { %v3690_v47 = vadd.f32 %v5178_v60, %v4575_v20  ;;  %v3671_v10 = vpop.f32.mrb[55].mxu0  ;;  %v3693_v40 = vmax.f32 %v3689_v23, 0.0 }
 0x81f   :  { %v3688_v29 = vadd.f32 %v4575_v20, %v3671_v10  ;;  %v3691_v14 = vmax.f32 %v3687_v61, 0.0 }
 0x820   :  { %v3694_v21 = vmax.f32 %v3690_v47, 0.0 }
 0x821   :  { %v3692_v7 = vmax.f32 %v3688_v29, 0.0 }
 0x822   :  { %v3707_v31 = vpack.c.bf16 %v3694_v21, %v3693_v40 }
 0x823   :  { %v3706_v39 = vpack.c.bf16 %v3692_v7, %v3691_v14 }
 0x825   :  { %5183 = vmatprep.mubr.msk.bf16.mxu1 %vm1192_vm10, %v3706_v39 }
 0x826   :  { %5184 = vmatmul.mubr.msk.bf16.vlgmr.msra.gmra.mrb[40].mxu1 %vm1192_vm10, %v3707_v31 }
 0x827   :  { %5191 = vmatprep.mubr.msk.bf16.mxu1 %vm1192_vm10, %v7448_v63  ;;  %5188 = vmatpush3.bf16.msra.mxu1 %v5524_v22 }
 0x828   :  { %5189 = vmatprep.subr.bf16.mxu1 %v5525_v37 }
 0x82b   :  { %5190 = vmatpush3.bf16.msra.mxu1 %v5525_v37 }
 0x82c   :  { %5211 = vmatprep.subr.bf16.mxu1 %v5530_v8 }
 0x832   :  { %5192 = vmatmul.mubr.msk.bf16.vlgmr.msra.gmra.mrb[40].mxu1 %vm1192_vm10, %v7450_v35 }
 0x833   :  { %5212 = vmatpush3.bf16.msra.mxu1 %v5530_v8 }
 0x834   :  { %5213 = vmatprep.subr.bf16.mxu1 %v5531_v58 }
 0x837   :  { %5214 = vmatpush3.bf16.msra.mxu1 %v5531_v58 }
 0x905   :  { %v5193_v12 = vpop.f32.mrb[40].mxu1 }
 0x906   :  { %v3848_v3 = vadd.f32 %v5193_v12, %v4584_v51  ;;  %v3827_v34 = vpop.f32.mrb[41].mxu1 }
 0x907   :  { %v3846_v53 = vadd.f32 %v4584_v51, %v3827_v34  ;;  %v5194_v57 = vpop.f32.mrb[42].mxu1 }
 0x908   :  { %v3849_v41 = vadd.f32 %v5194_v57, %v4584_v51  ;;  %v3830_v13 = vpop.f32.mrb[43].mxu1  ;;  %v3852_v16 = vmax.f32 %v3848_v3, 0.0 }
 0x909   :  { %v3847_v26 = vadd.f32 %v4584_v51, %v3830_v13  ;;  %v3850_v42 = vmax.f32 %v3846_v53, 0.0 }
 0x90a   :  { %v3853_v2 = vmax.f32 %v3849_v41, 0.0 }
 0x90b   :  { %v3851_v62 = vmax.f32 %v3847_v26, 0.0 }
 0x90c   :  { %v3864_v27 = vpack.c.bf16 %v3853_v2, %v3852_v16 }
 0x90d   :  { %v3863_v32 = vpack.c.bf16 %v3851_v62, %v3850_v42 }
 0x90f   :  { %5199 = vmatprep.mubr.msk.bf16.mxu0 %vm1192_vm10, %v3863_v32 }
 0x910   :  { %5200 = vmatmul.mubr.msk.bf16.vlgmr.msra.gmra.mrb[56].mxu0 %vm1192_vm10, %v3864_v27 }
 0x911   :  { %5207 = vmatprep.mubr.msk.bf16.mxu0 %vm1192_vm10, %v7448_v63  ;;  %5204 = vmatpush3.bf16.msra.mxu0 %v5528_v50 }
 0x912   :  { %5205 = vmatprep.subr.bf16.mxu0 %v5529_v11 }
 0x915   :  { %5206 = vmatpush3.bf16.msra.mxu0 %v5529_v11 }
 0x91c   :  { %5208 = vmatmul.mubr.msk.bf16.vlgmr.msra.gmra.mrb[56].mxu0 %vm1192_vm10, %v7450_v35 }
 0x9ef   :  { %v5209_v63 = vpop.f32.mrb[56].mxu0 }
 0x9f0   :  { %v3999_v59 = vadd.f32 %v5209_v63, %v4593_v33  ;;  %v3978_v49 = vpop.f32.mrb[57].mxu0 }
 0x9f1   :  { %v3997_v35 = vadd.f32 %v4593_v33, %v3978_v49  ;;  %v5210_v55 = vpop.f32.mrb[58].mxu0 }
 0x9f2   :  { %v4000_v28 = vadd.f32 %v5210_v55, %v4593_v33  ;;  %v3981_v48 = vpop.f32.mrb[59].mxu0  ;;  %v4003_v24 = vmax.f32 %v3999_v59, 0.0 }
 0x9f3   :  { %v3998_v6 = vadd.f32 %v4593_v33, %v3981_v48  ;;  %v4001_v0 = vmax.f32 %v3997_v35, 0.0 }
 0x9f4   :  { %v4004_v54 = vmax.f32 %v4000_v28, 0.0 }
 0x9f5   :  { %v4002_v56 = vmax.f32 %v3998_v6, 0.0 }
 0x9f6   :  { %v4010_v52 = vpack.c.bf16 %v4004_v54, %v4003_v24 }
 0x9f7   :  { %v4009_v4 = vpack.c.bf16 %v4002_v56, %v4001_v0 }
 0x9f9   :  { %5215 = vmatprep.mubr.msk.bf16.mxu1 %vm1192_vm10, %v4009_v4 }
 0x9fa   :  { %5216 = vmatmul.mubr.msk.bf16.vlgmr.msra.gmra.mrb[44].mxu1 %vm1192_vm10, %v4010_v52 }
 0xacd   :  { %v5217_v38 = vpop.f32.mrb[44].mxu1 }
 0xace   :  { %v4077_v30 = vadd.f32 %v5217_v38, %v4594_v43  ;;  %v4068_v25 = vpop.f32.mrb[45].mxu1 }
 0xacf   :  { %v4069_v15 = vadd.f32 %v4594_v43, %v4068_v25  ;;  %v5218_v1 = vpop.f32.mrb[46].mxu1 }
 0xad0   :  { %4085 = vst [vmem:[%s7550_s7 + $0x10] sm:$0xff] %v4077_v30  ;;  %v4080_v9 = vadd.f32 %v5218_v1, %v4594_v43  ;;  %v4071_v18 = vpop.f32.mrb[47].mxu1 }
 0xad1   :  { %4083 = vst [vmem:[%s7550_s7] sm:$0xff] %v4069_v15  ;;  %v4072_v19 = vadd.f32 %v4594_v43, %v4071_v18 }
 0xad2   :  { %4086 = vst [vmem:[%s7550_s7 + $0x18] sm:$0xff] %v4080_v9 }
 0xad3   :  { %4084 = vst [vmem:[%s7550_s7 + $0x8] sm:$0xff] %v4072_v19 }

</bundles_post_ra>
